<compile_context>
chip_gen: v7x
topology: tpu7x:2x2x1
jax: 0.10.0
libtpu: 0.0.40
codegen_flags: <defaults>
</compile_context>

<pallas_src>
import math
import numpy as np
import jax
import jax.numpy as jnp
from jax.experimental import pallas as pl
from jax.experimental.pallas import tpu as pltpu

# ---- small-but-consistent hyper-parameters (module default n_channels=66) ----
N_CHANNELS = 6          # fc in_features = 9 * n_channels * 12 (module is parametric in this)
N_CLASSES = 14
HIDDEN = 1936
HIDDEN_PAD = 2048       # 1936 padded to a lane-dense multiple of 128 (zero-padded, exact)
T = 96                  # duration: 3x AvgPool1d(2) -> 12 time steps, required by the fc layer
BATCH = 2
PER_CH_FEAT = 9 * 12    # per-channel feature width: [high 4x12 | low 4x12 | res 12] = 108
FEAT_PAD = 128          # 108 padded to 128 (zero-padded, exact)
FEAT = PER_CH_FEAT * N_CHANNELS


# ------------------------- deterministic parameter init -------------------------
def xavier_uniform(key, shape, fan_in, fan_out, gain):
    bound = gain * math.sqrt(6.0 / (fan_in + fan_out))
    return jax.random.uniform(key, shape, jnp.float32, -bound, bound)


def init_params(key):
    gain = math.sqrt(2.0)  # torch.nn.init.calculate_gain('relu')
    params = {"high": [], "low": []}
    for _c in range(N_CHANNELS):
        for branch, k in (("high", 7), ("low", 3)):
            layers = []
            for (ci, co) in ((1, 8), (8, 4), (4, 4)):
                key, sub = jax.random.split(key)
                w = xavier_uniform(sub, (co, ci, k), ci * k, co * k, gain)
                b = jnp.full((co,), 0.1, jnp.float32)
                layers.append((w, b))
            params[branch].append(layers)
    key, k1 = jax.random.split(key)
    key, k2 = jax.random.split(key)
    params["fc_w1"] = xavier_uniform(k1, (FEAT, HIDDEN), FEAT, HIDDEN, gain)
    params["fc_b1"] = jnp.full((HIDDEN,), 0.1, jnp.float32)
    params["fc_w2"] = xavier_uniform(k2, (HIDDEN, N_CLASSES), HIDDEN, N_CLASSES, gain)
    params["fc_b2"] = jnp.full((N_CLASSES,), 0.1, jnp.float32)
    return params


# --------------- fold conv / avg-pool stacks into exact matmul operands ---------------
def conv_matrix(w, pad, t_in):
    """M such that flat_out = flat_in @ M reproduces Conv1d(w, padding=pad) on length t_in.
    Flat index convention: channel * t_in + t."""
    w = np.asarray(w)
    co, ci, K = w.shape
    M = np.zeros((ci * t_in, co * t_in), np.float32)
    for o in range(co):
        for i in range(ci):
            for k in range(K):
                d = k - pad
                t0, t1 = max(0, -d), min(t_in, t_in - d)
                ts = np.arange(t0, t1)
                M[i * t_in + ts + d, o * t_in + ts] = w[o, i, k]
    return M


def pool_matrix(t_in):
    P = np.zeros((t_in, t_in // 2), np.float32)
    s = np.arange(t_in // 2)
    P[2 * s, s] = 0.5
    P[2 * s + 1, s] = 0.5
    return P


def pool_matrix_flat(n_ch, t_in):
    return np.kron(np.eye(n_ch, dtype=np.float32), pool_matrix(t_in))


def fold_branch(layers, pad):
    (w1, b1), (w2, b2), (w3, b3) = layers
    a1 = conv_matrix(w1, pad, T)                                         # (96, 768)
    a2 = pool_matrix_flat(8, T) @ conv_matrix(w2, pad, T // 2)           # (768, 192)
    a3 = pool_matrix_flat(4, T // 2) @ conv_matrix(w3, pad, T // 4)      # (192, 96)
    bb1 = np.repeat(np.asarray(b1), T)
    bb2 = np.repeat(np.asarray(b2), T // 2)
    bb3 = np.repeat(np.asarray(b3), T // 4)
    return a1, bb1, a2, bb2, a3, bb3


def build_folded(params):
    A1, B1 = [], []
    A2H, B2H, A2L, B2L = [], [], [], []
    A3H, B3H, A3L, B3L = [], [], [], []
    for c in range(N_CHANNELS):
        a1h, b1h, a2h, b2h, a3h, b3h = fold_branch(params["high"][c], 3)
        a1l, b1l, a2l, b2l, a3l, b3l = fold_branch(params["low"][c], 1)
        A1.append(np.concatenate([a1h, a1l], axis=1))       # (96, 1536): [high 768 | low 768]
        B1.append(np.concatenate([b1h, b1l])[None, :])      # (1, 1536)
        A2H.append(a2h); B2H.append(b2h[None, :])
        A2L.append(a2l); B2L.append(b2l[None, :])
        A3H.append(a3h); B3H.append(b3h[None, :])
        A3L.append(a3l); B3L.append(b3l[None, :])

    # shared final projections: AvgPool(2) of each branch + 3x-pooled residual, placed into a
    # single lane-dense 128-wide per-channel feature [high 48 | low 48 | res 12 | zero-pad 20].
    p4 = pool_matrix_flat(4, T // 4)                                     # (96, 48)
    r3 = pool_matrix(T) @ pool_matrix(T // 2) @ pool_matrix(T // 4)      # (96, 12)
    a4h = np.zeros((96, FEAT_PAD), np.float32); a4h[:, 0:48] = p4
    a4l = np.zeros((96, FEAT_PAD), np.float32); a4l[:, 48:96] = p4
    a4r = np.zeros((96, FEAT_PAD), np.float32); a4r[:, 96:108] = r3

    # fc layer 1, split per channel (rows) and zero-padded to (128, 2048); fc tail padded too.
    w1 = np.asarray(params["fc_w1"], np.float32)                         # (648, 1936)
    w1c = np.zeros((N_CHANNELS, FEAT_PAD, HIDDEN_PAD), np.float32)
    w1c[:, :PER_CH_FEAT, :HIDDEN] = w1.reshape(N_CHANNELS, PER_CH_FEAT, HIDDEN)
    fb1 = np.zeros((1, HIDDEN_PAD), np.float32); fb1[0, :HIDDEN] = np.asarray(params["fc_b1"])
    w2 = np.zeros((HIDDEN_PAD, N_CLASSES), np.float32); w2[:HIDDEN] = np.asarray(params["fc_w2"])
    fb2 = np.asarray(params["fc_b2"], np.float32)[None, :]

    def _bf16(a):   # big stationary matrices -> bf16 (halves weight DMA; exact for 0.5*w entries)
        return jnp.asarray(np.stack(a) if isinstance(a, list) else a, jnp.bfloat16)

    def _f32(a):
        return jnp.asarray(np.stack(a) if isinstance(a, list) else a, jnp.float32)

    return dict(
        A1=_bf16(A1), B1=_f32(B1),
        A2H=_bf16(A2H), B2H=_f32(B2H), A2L=_bf16(A2L), B2L=_f32(B2L),
        A3H=_bf16(A3H), B3H=_f32(B3H), A3L=_bf16(A3L), B3L=_f32(B3L),
        A4H=_f32(a4h), A4L=_f32(a4l), A4R=_f32(a4r),
        W1C=_bf16(w1c), FB1=_f32(fb1), W2=_f32(w2), FB2=_f32(fb2),
    )


# ------------------------------ fused Pallas kernel ------------------------------
def _fused_kernel(x_ref,
                  a1_ref, b1_ref,
                  a2h_ref, b2h_ref, a2l_ref, b2l_ref,
                  a3h_ref, b3h_ref, a3l_ref, b3l_ref,
                  a4h_ref, a4l_ref, a4r_ref,
                  w1c_ref, fb1_ref, w2_ref, fb2_ref,
                  o_ref, acc_ref):
    c = pl.program_id(0)

    @pl.when(c == 0)
    def _init():
        acc_ref[...] = jnp.zeros_like(acc_ref)

    def mm(a, b):
        # narrow the (tiny) activation to the weight dtype at the MXU input only;
        # bias / ReLU / accumulation all stay f32 via preferred_element_type.
        return jnp.dot(a.astype(b.dtype), b, preferred_element_type=jnp.float32)

    x = x_ref[0]                                                        # (B, 96) f32

    # conv1 (high k=7 | low k=3, merged into one matrix) -> ReLU
    h1 = jnp.maximum(mm(x, a1_ref[0]) + b1_ref[0], 0.0)                 # (B, 1536)
    # AvgPool(2) -> conv2 -> ReLU (pool folded into the matrices), per branch
    h2h = jnp.maximum(mm(h1[:, :768], a2h_ref[0]) + b2h_ref[0], 0.0)    # (B, 192)
    h2l = jnp.maximum(mm(h1[:, 768:], a2l_ref[0]) + b2l_ref[0], 0.0)    # (B, 192)
    # AvgPool(2) -> conv3 -> ReLU, per branch
    h3h = jnp.maximum(mm(h2h, a3h_ref[0]) + b3h_ref[0], 0.0)            # (B, 96)
    h3l = jnp.maximum(mm(h2l, a3l_ref[0]) + b3l_ref[0], 0.0)            # (B, 96)
    # TODO(synk): Dropout(p=0.3) precedes the last AvgPool in train mode; inference identity here.
    # final AvgPool of both branches + 3x-pooled residual -> [high48 | low48 | res12 | pad]
    feat = mm(h3h, a4h_ref[...]) + mm(h3l, a4l_ref[...]) + mm(x, a4r_ref[...])   # (B, 128)
    # fc layer 1, accumulated per channel: this channel's rows of fc_w1
    acc_ref[...] += mm(feat, w1c_ref[0])                                # (B, 2048)

    @pl.when(c == pl.num_programs(0) - 1)
    def _finish():
        h = jnp.maximum(acc_ref[...] + fb1_ref[...], 0.0)               # (B, 2048)
        o_ref[...] = mm(h, w2_ref[...]) + fb2_ref[...]                  # (B, n_classes)


def _per_channel_spec(a):
    nd = a.ndim
    return pl.BlockSpec((1,) + tuple(a.shape[1:]),
                        lambda c, _nd=nd: (c,) + (0,) * (_nd - 1))


def _shared_spec(a):
    nd = a.ndim
    return pl.BlockSpec(tuple(a.shape), lambda c, _nd=nd: (0,) * _nd)


@jax.jit
def hand_gesture_net_forward(x, folded):
    """x: (batch, duration, n_channels), matching the PyTorch module's input convention."""
    B = x.shape[0]
    x_cbt = jnp.transpose(x, (2, 0, 1)).astype(jnp.float32)             # (C, B, T)

    operands = [x_cbt,
                folded["A1"], folded["B1"],
                folded["A2H"], folded["B2H"], folded["A2L"], folded["B2L"],
                folded["A3H"], folded["B3H"], folded["A3L"], folded["B3L"],
                folded["A4H"], folded["A4L"], folded["A4R"],
                folded["W1C"], folded["FB1"], folded["W2"], folded["FB2"]]
    in_specs = [_per_channel_spec(x_cbt),
                _per_channel_spec(folded["A1"]), _per_channel_spec(folded["B1"]),
                _per_channel_spec(folded["A2H"]), _per_channel_spec(folded["B2H"]),
                _per_channel_spec(folded["A2L"]), _per_channel_spec(folded["B2L"]),
                _per_channel_spec(folded["A3H"]), _per_channel_spec(folded["B3H"]),
                _per_channel_spec(folded["A3L"]), _per_channel_spec(folded["B3L"]),
                _shared_spec(folded["A4H"]), _shared_spec(folded["A4L"]),
                _shared_spec(folded["A4R"]),
                _per_channel_spec(folded["W1C"]), _shared_spec(folded["FB1"]),
                _shared_spec(folded["W2"]), _shared_spec(folded["FB2"])]

    return pl.pallas_call(
        _fused_kernel,
        grid=(N_CHANNELS,),
        in_specs=in_specs,
        out_specs=pl.BlockSpec((B, N_CLASSES), lambda c: (0, 0)),
        out_shape=jax.ShapeDtypeStruct((B, N_CLASSES), jnp.float32),
        scratch_shapes=[pltpu.VMEM((B, HIDDEN_PAD), jnp.float32)],
        compiler_params=pltpu.CompilerParams(
            # C axis carries the fc1 accumulator + resident output block -> must be sequential.
            dimension_semantics=("arbitrary",),
            vmem_limit_bytes=16 * 1024 * 1024),
    )(*operands)


# ------------------------------ pure-JAX reference ------------------------------
def reference_forward(x, params):
    def pool(h):
        return h.reshape(h.shape[0], h.shape[1], h.shape[2] // 2, 2).mean(-1)

    def branch(xc, layers, pad):
        h = xc
        for (w, b) in layers:
            h = jax.lax.conv_general_dilated(
                h, w, window_strides=(1,), padding=[(pad, pad)],
                dimension_numbers=("NCH", "OIH", "NCH")) + b[None, :, None]
            h = jnp.maximum(h, 0.0)
            h = pool(h)                       # Dropout = identity at inference
        return h

    B = x.shape[0]
    feats = []
    for c in range(N_CHANNELS):
        xc = x[:, :, c][:, None, :]
        hi = branch(xc, params["high"][c], 3)
        lo = branch(xc, params["low"][c], 1)
        rs = pool(pool(pool(xc)))
        feats.append(jnp.concatenate([hi, lo, rs], axis=1))
    allf = jnp.concatenate(feats, axis=1).reshape(B, -1)
    h = jnp.maximum(allf @ params["fc_w1"] + params["fc_b1"], 0.0)
    return h @ params["fc_w2"] + params["fc_b2"]


def _bf16_roundtrip(a):
    return jnp.asarray(a, jnp.bfloat16).astype(jnp.float32)


def quantize_like_kernel(params):
    """Reference params with the same bf16 rounding the kernel applies to its stationary
    weights (conv weights and fc_w1); biases and fc_w2 stay f32, as in the kernel."""
    q = {"high": [], "low": []}
    for branch in ("high", "low"):
        for layers in params[branch]:
            q[branch].append([(_bf16_roundtrip(w), b) for (w, b) in layers])
    q["fc_w1"] = _bf16_roundtrip(params["fc_w1"])
    q["fc_b1"] = params["fc_b1"]
    q["fc_w2"] = params["fc_w2"]
    q["fc_b2"] = params["fc_b2"]
    return q


if __name__ == "__main__":
    key = jax.random.PRNGKey(0)
    pkey, xkey = jax.random.split(key)
    params = init_params(pkey)
    folded = build_folded(params)
    x = jax.random.normal(xkey, (BATCH, T, N_CHANNELS), jnp.float32)

    out = jax.block_until_ready(hand_gesture_net_forward(x, folded))
    assert out.shape == (BATCH, N_CLASSES)

    # Compare against a pure-JAX reference using the same bf16-rounded conv / fc1 weights, so the
    # tolerance only absorbs accumulation-order / MXU-input-cast noise (tightened from 5e-2).
    ref = jax.block_until_ready(reference_forward(x, quantize_like_kernel(params)))
    rel_err = float(jnp.max(jnp.abs(out - ref)) / (jnp.max(jnp.abs(ref)) + 1e-6))
    assert rel_err < 1e-2, f"mismatch vs reference: rel err {rel_err}"

    print("KERNEL_OK")
</pallas_src>

<mosaic_0001>
module attributes {stable_mosaic.version = 11 : i64} {
  func.func @_fused_kernel(%arg0: i32, %arg1: memref<1x2x96xf32, #tpu.memory_space<vmem>>, %arg2: memref<1x96x1536xbf16, #tpu.memory_space<vmem>>, %arg3: memref<1x1x1536xf32, #tpu.memory_space<vmem>>, %arg4: memref<1x768x192xbf16, #tpu.memory_space<vmem>>, %arg5: memref<1x1x192xf32, #tpu.memory_space<vmem>>, %arg6: memref<1x768x192xbf16, #tpu.memory_space<vmem>>, %arg7: memref<1x1x192xf32, #tpu.memory_space<vmem>>, %arg8: memref<1x192x96xbf16, #tpu.memory_space<vmem>>, %arg9: memref<1x1x96xf32, #tpu.memory_space<vmem>>, %arg10: memref<1x192x96xbf16, #tpu.memory_space<vmem>>, %arg11: memref<1x1x96xf32, #tpu.memory_space<vmem>>, %arg12: memref<96x128xf32, #tpu.memory_space<vmem>>, %arg13: memref<96x128xf32, #tpu.memory_space<vmem>>, %arg14: memref<96x128xf32, #tpu.memory_space<vmem>>, %arg15: memref<1x128x2048xbf16, #tpu.memory_space<vmem>>, %arg16: memref<1x2048xf32, #tpu.memory_space<vmem>>, %arg17: memref<2048x14xf32, #tpu.memory_space<vmem>>, %arg18: memref<1x14xf32, #tpu.memory_space<vmem>>, %arg19: memref<2x14xf32, #tpu.memory_space<vmem>>, %arg20: memref<2x2048xf32, #tpu.memory_space<vmem>>) attributes {dimension_semantics = [#tpu.dimension_semantics<arbitrary>], iteration_bounds = array<i64: 6>, scalar_prefetch = 0 : i64, scratch_operands = 1 : i64, tpu.core_type = #tpu.core_type<tc>, window_params = [{transform_indices = @transform_0, window_bounds = array<i64: 1, 2, 96>}, {transform_indices = @transform_1, window_bounds = array<i64: 1, 96, 1536>}, {transform_indices = @transform_2, window_bounds = array<i64: 1, 1, 1536>}, {transform_indices = @transform_3, window_bounds = array<i64: 1, 768, 192>}, {transform_indices = @transform_4, window_bounds = array<i64: 1, 1, 192>}, {transform_indices = @transform_5, window_bounds = array<i64: 1, 768, 192>}, {transform_indices = @transform_6, window_bounds = array<i64: 1, 1, 192>}, {transform_indices = @transform_7, window_bounds = array<i64: 1, 192, 96>}, {transform_indices = @transform_8, window_bounds = array<i64: 1, 1, 96>}, {transform_indices = @transform_9, window_bounds = array<i64: 1, 192, 96>}, {transform_indices = @transform_10, window_bounds = array<i64: 1, 1, 96>}, {pipeline_mode = #tpu.pipeline_mode<synchronous>, transform_indices = @transform_11, window_bounds = array<i64: 96, 128>}, {pipeline_mode = #tpu.pipeline_mode<synchronous>, transform_indices = @transform_12, window_bounds = array<i64: 96, 128>}, {pipeline_mode = #tpu.pipeline_mode<synchronous>, transform_indices = @transform_13, window_bounds = array<i64: 96, 128>}, {transform_indices = @transform_14, window_bounds = array<i64: 1, 128, 2048>}, {pipeline_mode = #tpu.pipeline_mode<synchronous>, transform_indices = @transform_15, window_bounds = array<i64: 1, 2048>}, {pipeline_mode = #tpu.pipeline_mode<synchronous>, transform_indices = @transform_16, window_bounds = array<i64: 2048, 14>}, {pipeline_mode = #tpu.pipeline_mode<synchronous>, transform_indices = @transform_17, window_bounds = array<i64: 1, 14>}, {pipeline_mode = #tpu.pipeline_mode<synchronous>, transform_indices = @transform_18, window_bounds = array<i64: 2, 14>}]} {
    %c0_i32 = arith.constant 0 : i32
    %0 = arith.cmpi eq, %arg0, %c0_i32 : i32
    %1 = arith.extui %0 : i1 to i32
    %c0_i32_0 = arith.constant 0 : i32
    %2 = arith.cmpi ne, %1, %c0_i32_0 : i32
    scf.if %2 {
      %cst_60 = arith.constant 0.000000e+00 : f32
      %75 = vector.broadcast %cst_60 : f32 to vector<2x2048xf32>
      %c0_61 = arith.constant 0 : index
      %c0_62 = arith.constant 0 : index
      %76 = vector.load %arg20[%c0_61, %c0_62] : memref<2x2048xf32, #tpu.memory_space<vmem>>, vector<2x2048xf32>
      tpu.vector_store %arg20[%c0_61, %c0_62], %75 {strides = array<i32>} : memref<2x2048xf32, #tpu.memory_space<vmem>>, vector<2x2048xf32>,
    } else {
    }
    %c0 = arith.constant 0 : index
    %c0_1 = arith.constant 0 : index
    %c0_2 = arith.constant 0 : index
    %3 = vector.load %arg1[%c0, %c0_1, %c0_2] : memref<1x2x96xf32, #tpu.memory_space<vmem>>, vector<1x2x96xf32>
    %4 = vector.shape_cast %3 : vector<1x2x96xf32> to vector<2x96xf32>
    %c0_3 = arith.constant 0 : index
    %c0_4 = arith.constant 0 : index
    %c0_5 = arith.constant 0 : index
    %5 = vector.load %arg2[%c0_3, %c0_4, %c0_5] : memref<1x96x1536xbf16, #tpu.memory_space<vmem>>, vector<1x96x1536xbf16>
    %6 = vector.shape_cast %5 : vector<1x96x1536xbf16> to vector<96x1536xbf16>
    %7 = arith.truncf %4 : vector<2x96xf32> to vector<2x96xbf16>
    %cst = arith.constant dense<0.000000e+00> : vector<2x1536xf32>
    %8 = tpu.matmul %7, %6, %cst {dimension_numbers = #tpu.dot_dimension_numbers<[1], [0], [0], [1], [0, 0, 1, 1], [], []>} : vector<2x96xbf16>, vector<96x1536xbf16>, vector<2x1536xf32> -> vector<2x1536xf32>
    %c0_6 = arith.constant 0 : index
    %c0_7 = arith.constant 0 : index
    %c0_8 = arith.constant 0 : index
    %9 = vector.load %arg3[%c0_6, %c0_7, %c0_8] : memref<1x1x1536xf32, #tpu.memory_space<vmem>>, vector<1x1x1536xf32>
    %10 = vector.shape_cast %9 : vector<1x1x1536xf32> to vector<1x1536xf32>
    %11 = vector.broadcast %10 : vector<1x1536xf32> to vector<2x1536xf32>
    %12 = arith.addf %8, %11 : vector<2x1536xf32>
    %cst_9 = arith.constant 0.000000e+00 : f32
    %13 = vector.broadcast %cst_9 : f32 to vector<2x1536xf32>
    %14 = arith.maximumf %12, %13 : vector<2x1536xf32>
    %15 = vector.extract_strided_slice %14 {offsets = [0, 0], sizes = [2, 768], strides = [1, 1]} : vector<2x1536xf32> to vector<2x768xf32>
    %c0_10 = arith.constant 0 : index
    %c0_11 = arith.constant 0 : index
    %c0_12 = arith.constant 0 : index
    %16 = vector.load %arg4[%c0_10, %c0_11, %c0_12] : memref<1x768x192xbf16, #tpu.memory_space<vmem>>, vector<1x768x192xbf16>
    %17 = vector.shape_cast %16 : vector<1x768x192xbf16> to vector<768x192xbf16>
    %18 = arith.truncf %15 : vector<2x768xf32> to vector<2x768xbf16>
    %cst_13 = arith.constant dense<0.000000e+00> : vector<2x192xf32>
    %19 = tpu.matmul %18, %17, %cst_13 {dimension_numbers = #tpu.dot_dimension_numbers<[1], [0], [0], [1], [0, 0, 1, 1], [], []>} : vector<2x768xbf16>, vector<768x192xbf16>, vector<2x192xf32> -> vector<2x192xf32>
    %c0_14 = arith.constant 0 : index
    %c0_15 = arith.constant 0 : index
    %c0_16 = arith.constant 0 : index
    %20 = vector.load %arg5[%c0_14, %c0_15, %c0_16] : memref<1x1x192xf32, #tpu.memory_space<vmem>>, vector<1x1x192xf32>
    %21 = vector.shape_cast %20 : vector<1x1x192xf32> to vector<1x192xf32>
    %22 = vector.broadcast %21 : vector<1x192xf32> to vector<2x192xf32>
    %23 = arith.addf %19, %22 : vector<2x192xf32>
    %cst_17 = arith.constant 0.000000e+00 : f32
    %24 = vector.broadcast %cst_17 : f32 to vector<2x192xf32>
    %25 = arith.maximumf %23, %24 : vector<2x192xf32>
    %26 = vector.extract_strided_slice %14 {offsets = [0, 768], sizes = [2, 768], strides = [1, 1]} : vector<2x1536xf32> to vector<2x768xf32>
    %c0_18 = arith.constant 0 : index
    %c0_19 = arith.constant 0 : index
    %c0_20 = arith.constant 0 : index
    %27 = vector.load %arg6[%c0_18, %c0_19, %c0_20] : memref<1x768x192xbf16, #tpu.memory_space<vmem>>, vector<1x768x192xbf16>
    %28 = vector.shape_cast %27 : vector<1x768x192xbf16> to vector<768x192xbf16>
    %29 = arith.truncf %26 : vector<2x768xf32> to vector<2x768xbf16>
    %cst_21 = arith.constant dense<0.000000e+00> : vector<2x192xf32>
    %30 = tpu.matmul %29, %28, %cst_21 {dimension_numbers = #tpu.dot_dimension_numbers<[1], [0], [0], [1], [0, 0, 1, 1], [], []>} : vector<2x768xbf16>, vector<768x192xbf16>, vector<2x192xf32> -> vector<2x192xf32>
    %c0_22 = arith.constant 0 : index
    %c0_23 = arith.constant 0 : index
    %c0_24 = arith.constant 0 : index
    %31 = vector.load %arg7[%c0_22, %c0_23, %c0_24] : memref<1x1x192xf32, #tpu.memory_space<vmem>>, vector<1x1x192xf32>
    %32 = vector.shape_cast %31 : vector<1x1x192xf32> to vector<1x192xf32>
    %33 = vector.broadcast %32 : vector<1x192xf32> to vector<2x192xf32>
    %34 = arith.addf %30, %33 : vector<2x192xf32>
    %cst_25 = arith.constant 0.000000e+00 : f32
    %35 = vector.broadcast %cst_25 : f32 to vector<2x192xf32>
    %36 = arith.maximumf %34, %35 : vector<2x192xf32>
    %c0_26 = arith.constant 0 : index
    %c0_27 = arith.constant 0 : index
    %c0_28 = arith.constant 0 : index
    %37 = vector.load %arg8[%c0_26, %c0_27, %c0_28] : memref<1x192x96xbf16, #tpu.memory_space<vmem>>, vector<1x192x96xbf16>
    %38 = vector.shape_cast %37 : vector<1x192x96xbf16> to vector<192x96xbf16>
    %39 = arith.truncf %25 : vector<2x192xf32> to vector<2x192xbf16>
    %cst_29 = arith.constant dense<0.000000e+00> : vector<2x96xf32>
    %40 = tpu.matmul %39, %38, %cst_29 {dimension_numbers = #tpu.dot_dimension_numbers<[1], [0], [0], [1], [0, 0, 1, 1], [], []>} : vector<2x192xbf16>, vector<192x96xbf16>, vector<2x96xf32> -> vector<2x96xf32>
    %c0_30 = arith.constant 0 : index
    %c0_31 = arith.constant 0 : index
    %c0_32 = arith.constant 0 : index
    %41 = vector.load %arg9[%c0_30, %c0_31, %c0_32] : memref<1x1x96xf32, #tpu.memory_space<vmem>>, vector<1x1x96xf32>
    %42 = vector.shape_cast %41 : vector<1x1x96xf32> to vector<1x96xf32>
    %43 = vector.broadcast %42 : vector<1x96xf32> to vector<2x96xf32>
    %44 = arith.addf %40, %43 : vector<2x96xf32>
    %cst_33 = arith.constant 0.000000e+00 : f32
    %45 = vector.broadcast %cst_33 : f32 to vector<2x96xf32>
    %46 = arith.maximumf %44, %45 : vector<2x96xf32>
    %c0_34 = arith.constant 0 : index
    %c0_35 = arith.constant 0 : index
    %c0_36 = arith.constant 0 : index
    %47 = vector.load %arg10[%c0_34, %c0_35, %c0_36] : memref<1x192x96xbf16, #tpu.memory_space<vmem>>, vector<1x192x96xbf16>
    %48 = vector.shape_cast %47 : vector<1x192x96xbf16> to vector<192x96xbf16>
    %49 = arith.truncf %36 : vector<2x192xf32> to vector<2x192xbf16>
    %cst_37 = arith.constant dense<0.000000e+00> : vector<2x96xf32>
    %50 = tpu.matmul %49, %48, %cst_37 {dimension_numbers = #tpu.dot_dimension_numbers<[1], [0], [0], [1], [0, 0, 1, 1], [], []>} : vector<2x192xbf16>, vector<192x96xbf16>, vector<2x96xf32> -> vector<2x96xf32>
    %c0_38 = arith.constant 0 : index
    %c0_39 = arith.constant 0 : index
    %c0_40 = arith.constant 0 : index
    %51 = vector.load %arg11[%c0_38, %c0_39, %c0_40] : memref<1x1x96xf32, #tpu.memory_space<vmem>>, vector<1x1x96xf32>
    %52 = vector.shape_cast %51 : vector<1x1x96xf32> to vector<1x96xf32>
    %53 = vector.broadcast %52 : vector<1x96xf32> to vector<2x96xf32>
    %54 = arith.addf %50, %53 : vector<2x96xf32>
    %cst_41 = arith.constant 0.000000e+00 : f32
    %55 = vector.broadcast %cst_41 : f32 to vector<2x96xf32>
    %56 = arith.maximumf %54, %55 : vector<2x96xf32>
    %c0_42 = arith.constant 0 : index
    %c0_43 = arith.constant 0 : index
    %57 = vector.load %arg12[%c0_42, %c0_43] : memref<96x128xf32, #tpu.memory_space<vmem>>, vector<96x128xf32>
    %cst_44 = arith.constant dense<0.000000e+00> : vector<2x128xf32>
    %58 = tpu.matmul %46, %57, %cst_44 {dimension_numbers = #tpu.dot_dimension_numbers<[1], [0], [0], [1], [0, 0, 1, 1], [], []>} : vector<2x96xf32>, vector<96x128xf32>, vector<2x128xf32> -> vector<2x128xf32>
    %c0_45 = arith.constant 0 : index
    %c0_46 = arith.constant 0 : index
    %59 = vector.load %arg13[%c0_45, %c0_46] : memref<96x128xf32, #tpu.memory_space<vmem>>, vector<96x128xf32>
    %cst_47 = arith.constant dense<0.000000e+00> : vector<2x128xf32>
    %60 = tpu.matmul %56, %59, %cst_47 {dimension_numbers = #tpu.dot_dimension_numbers<[1], [0], [0], [1], [0, 0, 1, 1], [], []>} : vector<2x96xf32>, vector<96x128xf32>, vector<2x128xf32> -> vector<2x128xf32>
    %61 = arith.addf %58, %60 : vector<2x128xf32>
    %c0_48 = arith.constant 0 : index
    %c0_49 = arith.constant 0 : index
    %62 = vector.load %arg14[%c0_48, %c0_49] : memref<96x128xf32, #tpu.memory_space<vmem>>, vector<96x128xf32>
    %cst_50 = arith.constant dense<0.000000e+00> : vector<2x128xf32>
    %63 = tpu.matmul %4, %62, %cst_50 {dimension_numbers = #tpu.dot_dimension_numbers<[1], [0], [0], [1], [0, 0, 1, 1], [], []>} : vector<2x96xf32>, vector<96x128xf32>, vector<2x128xf32> -> vector<2x128xf32>
    %64 = arith.addf %61, %63 : vector<2x128xf32>
    %c0_51 = arith.constant 0 : index
    %c0_52 = arith.constant 0 : index
    %65 = vector.load %arg20[%c0_51, %c0_52] : memref<2x2048xf32, #tpu.memory_space<vmem>>, vector<2x2048xf32>
    %c0_53 = arith.constant 0 : index
    %c0_54 = arith.constant 0 : index
    %c0_55 = arith.constant 0 : index
    %66 = vector.load %arg15[%c0_53, %c0_54, %c0_55] : memref<1x128x2048xbf16, #tpu.memory_space<vmem>>, vector<1x128x2048xbf16>
    %67 = vector.shape_cast %66 : vector<1x128x2048xbf16> to vector<128x2048xbf16>
    %68 = arith.truncf %64 : vector<2x128xf32> to vector<2x128xbf16>
    %cst_56 = arith.constant dense<0.000000e+00> : vector<2x2048xf32>
    %69 = tpu.matmul %68, %67, %cst_56 {dimension_numbers = #tpu.dot_dimension_numbers<[1], [0], [0], [1], [0, 0, 1, 1], [], []>} : vector<2x128xbf16>, vector<128x2048xbf16>, vector<2x2048xf32> -> vector<2x2048xf32>
    %70 = arith.addf %65, %69 : vector<2x2048xf32>
    %c0_57 = arith.constant 0 : index
    %c0_58 = arith.constant 0 : index
    %71 = vector.load %arg20[%c0_57, %c0_58] : memref<2x2048xf32, #tpu.memory_space<vmem>>, vector<2x2048xf32>
    tpu.vector_store %arg20[%c0_57, %c0_58], %70 {strides = array<i32>} : memref<2x2048xf32, #tpu.memory_space<vmem>>, vector<2x2048xf32>,
    %c5_i32 = arith.constant 5 : i32
    %72 = arith.cmpi eq, %arg0, %c5_i32 : i32
    %73 = arith.extui %72 : i1 to i32
    %c0_i32_59 = arith.constant 0 : i32
    %74 = arith.cmpi ne, %73, %c0_i32_59 : i32
    scf.if %74 {
      %c0_60 = arith.constant 0 : index
      %c0_61 = arith.constant 0 : index
      %75 = vector.load %arg20[%c0_60, %c0_61] : memref<2x2048xf32, #tpu.memory_space<vmem>>, vector<2x2048xf32>
      %c0_62 = arith.constant 0 : index
      %c0_63 = arith.constant 0 : index
      %76 = vector.load %arg16[%c0_62, %c0_63] : memref<1x2048xf32, #tpu.memory_space<vmem>>, vector<1x2048xf32>
      %77 = vector.broadcast %76 : vector<1x2048xf32> to vector<2x2048xf32>
      %78 = arith.addf %75, %77 : vector<2x2048xf32>
      %cst_64 = arith.constant 0.000000e+00 : f32
      %79 = vector.broadcast %cst_64 : f32 to vector<2x2048xf32>
      %80 = arith.maximumf %78, %79 : vector<2x2048xf32>
      %c0_65 = arith.constant 0 : index
      %c0_66 = arith.constant 0 : index
      %81 = vector.load %arg17[%c0_65, %c0_66] : memref<2048x14xf32, #tpu.memory_space<vmem>>, vector<2048x14xf32>
      %cst_67 = arith.constant dense<0.000000e+00> : vector<2x14xf32>
      %82 = tpu.matmul %80, %81, %cst_67 {dimension_numbers = #tpu.dot_dimension_numbers<[1], [0], [0], [1], [0, 0, 1, 1], [], []>} : vector<2x2048xf32>, vector<2048x14xf32>, vector<2x14xf32> -> vector<2x14xf32>
      %c0_68 = arith.constant 0 : index
      %c0_69 = arith.constant 0 : index
      %83 = vector.load %arg18[%c0_68, %c0_69] : memref<1x14xf32, #tpu.memory_space<vmem>>, vector<1x14xf32>
      %84 = vector.broadcast %83 : vector<1x14xf32> to vector<2x14xf32>
      %85 = arith.addf %82, %84 : vector<2x14xf32>
      %c0_70 = arith.constant 0 : index
      %c0_71 = arith.constant 0 : index
      %86 = vector.load %arg19[%c0_70, %c0_71] : memref<2x14xf32, #tpu.memory_space<vmem>>, vector<2x14xf32>
      tpu.vector_store %arg19[%c0_70, %c0_71], %85 {strides = array<i32>} : memref<2x14xf32, #tpu.memory_space<vmem>>, vector<2x14xf32>,
    } else {
    }
    return
  }
  func.func @transform_0(%arg0: i32) -> (i32, i32, i32) {
    %c0_i32 = arith.constant 0 : i32
    %c0_i32_0 = arith.constant 0 : i32
    %c0_i32_1 = arith.constant 0 : i32
    return %arg0, %c0_i32, %c0_i32_0 : i32, i32, i32
  }
  func.func @transform_1(%arg0: i32) -> (i32, i32, i32) {
    %c0_i32 = arith.constant 0 : i32
    %c0_i32_0 = arith.constant 0 : i32
    %c0_i32_1 = arith.constant 0 : i32
    return %arg0, %c0_i32, %c0_i32_0 : i32, i32, i32
  }
  func.func @transform_2(%arg0: i32) -> (i32, i32, i32) {
    %c0_i32 = arith.constant 0 : i32
    %c0_i32_0 = arith.constant 0 : i32
    %c0_i32_1 = arith.constant 0 : i32
    return %arg0, %c0_i32, %c0_i32_0 : i32, i32, i32
  }
  func.func @transform_3(%arg0: i32) -> (i32, i32, i32) {
    %c0_i32 = arith.constant 0 : i32
    %c0_i32_0 = arith.constant 0 : i32
    %c0_i32_1 = arith.constant 0 : i32
    return %arg0, %c0_i32, %c0_i32_0 : i32, i32, i32
  }
  func.func @transform_4(%arg0: i32) -> (i32, i32, i32) {
    %c0_i32 = arith.constant 0 : i32
    %c0_i32_0 = arith.constant 0 : i32
    %c0_i32_1 = arith.constant 0 : i32
    return %arg0, %c0_i32, %c0_i32_0 : i32, i32, i32
  }
  func.func @transform_5(%arg0: i32) -> (i32, i32, i32) {
    %c0_i32 = arith.constant 0 : i32
    %c0_i32_0 = arith.constant 0 : i32
    %c0_i32_1 = arith.constant 0 : i32
    return %arg0, %c0_i32, %c0_i32_0 : i32, i32, i32
  }
  func.func @transform_6(%arg0: i32) -> (i32, i32, i32) {
    %c0_i32 = arith.constant 0 : i32
    %c0_i32_0 = arith.constant 0 : i32
    %c0_i32_1 = arith.constant 0 : i32
    return %arg0, %c0_i32, %c0_i32_0 : i32, i32, i32
  }
  func.func @transform_7(%arg0: i32) -> (i32, i32, i32) {
    %c0_i32 = arith.constant 0 : i32
    %c0_i32_0 = arith.constant 0 : i32
    %c0_i32_1 = arith.constant 0 : i32
    return %arg0, %c0_i32, %c0_i32_0 : i32, i32, i32
  }
  func.func @transform_8(%arg0: i32) -> (i32, i32, i32) {
    %c0_i32 = arith.constant 0 : i32
    %c0_i32_0 = arith.constant 0 : i32
    %c0_i32_1 = arith.constant 0 : i32
    return %arg0, %c0_i32, %c0_i32_0 : i32, i32, i32
  }
  func.func @transform_9(%arg0: i32) -> (i32, i32, i32) {
    %c0_i32 = arith.constant 0 : i32
    %c0_i32_0 = arith.constant 0 : i32
    %c0_i32_1 = arith.constant 0 : i32
    return %arg0, %c0_i32, %c0_i32_0 : i32, i32, i32
  }
  func.func @transform_10(%arg0: i32) -> (i32, i32, i32) {
    %c0_i32 = arith.constant 0 : i32
    %c0_i32_0 = arith.constant 0 : i32
    %c0_i32_1 = arith.constant 0 : i32
    return %arg0, %c0_i32, %c0_i32_0 : i32, i32, i32
  }
  func.func @transform_11(%arg0: i32) -> (i32, i32) {
    %c0_i32 = arith.constant 0 : i32
    %c0_i32_0 = arith.constant 0 : i32
    %c0_i32_1 = arith.constant 0 : i32
    return %c0_i32, %c0_i32_0 : i32, i32
  }
  func.func @transform_12(%arg0: i32) -> (i32, i32) {
    %c0_i32 = arith.constant 0 : i32
    %c0_i32_0 = arith.constant 0 : i32
    %c0_i32_1 = arith.constant 0 : i32
    return %c0_i32, %c0_i32_0 : i32, i32
  }
  func.func @transform_13(%arg0: i32) -> (i32, i32) {
    %c0_i32 = arith.constant 0 : i32
    %c0_i32_0 = arith.constant 0 : i32
    %c0_i32_1 = arith.constant 0 : i32
    return %c0_i32, %c0_i32_0 : i32, i32
  }
  func.func @transform_14(%arg0: i32) -> (i32, i32, i32) {
    %c0_i32 = arith.constant 0 : i32
    %c0_i32_0 = arith.constant 0 : i32
    %c0_i32_1 = arith.constant 0 : i32
    return %arg0, %c0_i32, %c0_i32_0 : i32, i32, i32
  }
  func.func @transform_15(%arg0: i32) -> (i32, i32) {
    %c0_i32 = arith.constant 0 : i32
    %c0_i32_0 = arith.constant 0 : i32
    %c0_i32_1 = arith.constant 0 : i32
    return %c0_i32, %c0_i32_0 : i32, i32
  }
  func.func @transform_16(%arg0: i32) -> (i32, i32) {
    %c0_i32 = arith.constant 0 : i32
    %c0_i32_0 = arith.constant 0 : i32
    %c0_i32_1 = arith.constant 0 : i32
    return %c0_i32, %c0_i32_0 : i32, i32
  }
  func.func @transform_17(%arg0: i32) -> (i32, i32) {
    %c0_i32 = arith.constant 0 : i32
    %c0_i32_0 = arith.constant 0 : i32
    %c0_i32_1 = arith.constant 0 : i32
    return %c0_i32, %c0_i32_0 : i32, i32
  }
  func.func @transform_18(%arg0: i32) -> (i32, i32) {
    %c0_i32 = arith.constant 0 : i32
    %c0_i32_0 = arith.constant 0 : i32
    %c0_i32_1 = arith.constant 0 : i32
    return %c0_i32, %c0_i32_0 : i32, i32
  }
}

</mosaic_0001>

<bundles_post_ra>
// kernel: hand_gesture_net_forward.1
= control target key start
LH: loop header
LB: loop body
LE: loop exit
PB: predicated region body
PF: predicated region fallthrough
CT: control target
= control target key end

     0   :  { %s9411_s0 = inlined_call_operand.vmem [shape: f32[6,2,96], index: 0, kind: input, shape index: {}]   ;;  %s9412_s1 = inlined_call_operand.vmem [shape: bf16[6,96,1536], index: 1, kind: input, shape index: {}]   ;;  %s9413_s2 = inlined_call_operand.vmem [shape: f32[6,1,1536], index: 2, kind: input, shape index: {}]   ;;  %s9414_s3 = inlined_call_operand.vmem [shape: bf16[6,768,192], index: 3, kind: input, shape index: {}]   ;;  %s9415_s4 = inlined_call_operand.vmem [shape: f32[6,1,192], index: 4, kind: input, shape index: {}]   ;;  %s9416_s5 = inlined_call_operand.vmem [shape: bf16[6,768,192], index: 5, kind: input, shape index: {}]   ;;  %s9417_s6 = inlined_call_operand.vmem [shape: f32[6,1,192], index: 6, kind: input, shape index: {}]   ;;  %s9418_s7 = inlined_call_operand.vmem [shape: bf16[6,192,96], index: 7, kind: input, shape index: {}]   ;;  %s9419_s8 = inlined_call_operand.vmem [shape: f32[6,1,96], index: 8, kind: input, shape index: {}]   ;;  %s9420_s9 = inlined_call_operand.vmem [shape: bf16[6,192,96], index: 9, kind: input, shape index: {}]   ;;  %s9421_s10 = inlined_call_operand.vmem [shape: f32[6,1,96], index: 10, kind: input, shape index: {}]   ;;  %s9422_s11 = inlined_call_operand.vmem [shape: f32[96,128], index: 11, kind: input, shape index: {}]   ;;  %s9423_s12 = inlined_call_operand.vmem [shape: f32[96,128], index: 12, kind: input, shape index: {}]   ;;  %s9424_s13 = inlined_call_operand.vmem [shape: f32[96,128], index: 13, kind: input, shape index: {}]   ;;  %s9425_s14 = inlined_call_operand.vmem [shape: bf16[6,128,2048], index: 14, kind: input, shape index: {}]   ;;  %s9426_s15 = inlined_call_operand.vmem [shape: f32[1,2048], index: 15, kind: input, shape index: {}]   ;;  %s9427_s16 = inlined_call_operand.vmem [shape: f32[2048,14], index: 16, kind: input, shape index: {}]   ;;  %s9428_s17 = inlined_call_operand.vmem [shape: f32[1,14], index: 17, kind: input, shape index: {}]   ;;  %s9429_s18 = inlined_call_operand.hbm [shape: f32[2,14], index: 18, kind: output, shape index: {}]  }
   0x1   :  { %9438 = sst [smem:[#allocation8_spill]] %s9411_s0 }
   0x2   :  { %9439 = sst [smem:[#allocation9_spill]] %s9412_s1 }
   0x3   :  { %9440 = sst [smem:[#allocation10_spill]] %s9413_s2 }
   0x4   :  { %9441 = sst [smem:[#allocation11_spill]] %s9414_s3 }
   0x5   :  { %9442 = sst [smem:[#allocation12_spill]] %s9422_s11 }
   0x6   :  { %9443 = sst [smem:[#allocation13_spill]] %s9423_s12 }
   0x7   :  { %9444 = sst [smem:[#allocation14_spill]] %s9424_s13 }
   0x8   :  { %9445 = sst [smem:[#allocation15_spill]] %s9426_s15 }
   0x9   :  { %9446 = sst [smem:[#allocation16_spill]] %s9427_s16 }
   0xa   :  { %9447 = sst [smem:[#allocation17_spill]] %s9428_s17 }
   0xb   :  { %9448 = sst [smem:[#allocation18_spill]] %s9429_s18 }
   0xc   :  { %23 = vsyncpa [#allocation4], 0  ;;  %s7729_s27 = smov 0  }
   0xd LB: > { %9449 = sst [smem:[#allocation6_spill]] %s7625_s27  ;;  %s7735_s28 = sadd.s32 4294967295, %s7625_s27   ;;  %s7625_s27 = sphi %s7729_s27, %s29_s27  }
   0xe   : > { %p5961_p0 = scmp.ge.s32.totalorder %s7625_s27, 1  ;;  %p610_p1 = scmp.lt.s32.totalorder %s7625_s27, 7 }
  0x10   : > { %p611_p2 = pnand %p5961_p0, %p610_p1 }
  0x12   : > { %614 = sbr.rel (%p611_p2) target bundleno = 1855 (0x73f), region = 92 }
  0x19   : > { %p706_p3 = scmp.lt.s32.totalorder %s7735_s28, 5  ;;  %s9450_s20 = sld [smem:[#allocation8_spill]] }
  0x1a   : > { %s9452_s24 = sld [smem:[#allocation9_spill]]  ;;  %s9453_s17 = sld [smem:[#allocation10_spill]] }
  0x1b   : > { %s7741_s29 = scalar_select %p706_p3, %s7735_s28, 5 }
  0x1c   : > { %s9454_s3 = sld [smem:[#allocation11_spill]]  ;;  %p5972_p4 = scmp.ne.s32.totalorder %s7735_s28, 0 }
  0x1d   : > { %s7744_s30 = sshll.u32 %s7741_s29, 1  ;;  %s7143_s0 = smul.u32 576, %s7741_s29  ;;  %v7627_v0 = vmov (!%p5972_p4), 0.0  }
  0x1e   : > { %s7144_s22 = smul.u32 12, %s7741_s29  ;;  %s744_s13 = scalar_lea.vmem %s9419_s8, %s7741_s29  ;;  %763 = vst [vmem:[#allocation2] sm:$0xff] (!%p5972_p4), %v7627_v0  ;;  %764 = vst [vmem:[#allocation2 + $0x8] sm:$0xff] (!%p5972_p4), %v7627_v0 }
  0x1f   : > { %s7751_s21 = scalar_lea.vmem %s9450_s20, %s7744_s30  ;;  %s7145_s26 = smul.u32 768, %s7741_s29  ;;  %765 = vst [vmem:[#allocation2 + $0x10] sm:$0xff] (!%p5972_p4), %v7627_v0  ;;  %766 = vst [vmem:[#allocation2 + $0x18] sm:$0xff] (!%p5972_p4), %v7627_v0 }
  0x20   : > { %9451 = sst [smem:[#allocation7_spill]] %s7751_s21  ;;  %s7757_s25 = scalar_lea.vmem %s9452_s24, %s7143_s0 }
  0x21   : > { %s7763_s15 = scalar_lea.vmem %s9453_s17, %s7144_s22  ;;  %s7777_s0 = scalar_lea.vmem %s9416_s5, %s7145_s26 }
  0x22   : > { %s7772_s1 = scalar_lea.vmem %s9454_s3, %s7145_s26  ;;  %s7146_s17 = smul.u32 96, %s7741_s29 }
  0x23   : > { %s752_s12 = scalar_lea.vmem %s9421_s10, %s7741_s29  ;;  %s6408_s2 = sshll.u32 %s7741_s29, 10 }
  0x24   : > { %s7795_s3 = scalar_lea.vmem %s9418_s7, %s7146_s17  ;;  %s7800_s20 = scalar_lea.vmem %s9420_s9, %s7146_s17 }
  0x25   : > { %s7806_s27 = scalar_lea.vmem %s9425_s14, %s6408_s2  ;;  %762 = sbr.rel (%p5972_p4) target bundleno = 44 (0x2c), region = 96 }
  0x2c PF: > { %v7168_v1 = vld [vmem:[%s7757_s25 + $0x4] ss:$48 sps:$4 sm:$0xff]   ;;  %v7170_v2 = vld [vmem:[%s7757_s25 + $0xc] ss:$48 sps:$4 sm:$0xff]   ;;  %v7628_v3 = vmov 0   ;;  %s9455_s11 = sld [smem:[#allocation7_spill]]  ;;  %s9457_s18 = scalar_lea.vmem %s9417_s6, %s7744_s30 }
  0x2d   : > { %1301 = vmatprep.mubr.bf16.mxu0 %v7628_v3  ;;  %1342 = vmatprep.mubr.bf16.mxu1 %v7628_v3  ;;  %v7172_v4 = vld [vmem:[%s7757_s25] ss:$48 sps:$4 sm:$0xff]   ;;  %v7173_v5 = vld [vmem:[%s7757_s25 + $0x8] ss:$48 sps:$4 sm:$0xff]   ;;  %v7174_v6 = vld [vmem:[%s7757_s25 + $0x64] ss:$48 sps:$4 sm:$0xff]  }
  0x2e   : > { %1269 = vmatprep.subr.bf16.mxu0 %v7168_v1  ;;  %1310 = vmatprep.subr.bf16.mxu1 %v7170_v2  ;;  %v7176_v7 = vld [vmem:[%s7757_s25 + $0x6c] ss:$48 sps:$4 sm:$0xff]   ;;  %v7178_v8 = vld [vmem:[%s7757_s25 + $0x60] ss:$48 sps:$4 sm:$0xff]   ;;  %v7179_v9 = vld [vmem:[%s7757_s25 + $0x68] ss:$48 sps:$4 sm:$0xff]  }
  0x2f   : > { %1270 = vmatpush1.bf16.msra.mxu0 %v7172_v4  ;;  %1311 = vmatpush1.bf16.msra.mxu1 %v7173_v5  ;;  %v7180_v10 = vld [vmem:[%s7757_s25 + $0xc4] ss:$48 sps:$4 sm:$0xff]   ;;  %v7182_v11 = vld [vmem:[%s7757_s25 + $0xcc] ss:$48 sps:$4 sm:$0xff]   ;;  %v7184_v12 = vld [vmem:[%s7757_s25 + $0xc0] ss:$48 sps:$4 sm:$0xff]  }
  0x30   : > { %1271 = vmatprep.subr.bf16.mxu0 %v7174_v6  ;;  %1312 = vmatprep.subr.bf16.mxu1 %v7176_v7  ;;  %v7185_v13 = vld [vmem:[%s7757_s25 + $0xc8] ss:$48 sps:$4 sm:$0xff]   ;;  %v7186_v14 = vld [vmem:[%s7757_s25 + $0x124] ss:$48 sps:$4 sm:$0xff]   ;;  %v7188_v15 = vld [vmem:[%s7757_s25 + $0x12c] ss:$48 sps:$4 sm:$0xff]  }
  0x31   : > { %v7190_v16 = vld [vmem:[%s7757_s25 + $0x120] ss:$48 sps:$4 sm:$0xff]   ;;  %v7191_v17 = vld [vmem:[%s7757_s25 + $0x128] ss:$48 sps:$4 sm:$0xff]   ;;  %v7192_v18 = vld [vmem:[%s7757_s25 + $0x184] ss:$48 sps:$4 sm:$0xff]  }
  0x32   : > { %v7194_v19 = vld [vmem:[%s7757_s25 + $0x18c] ss:$48 sps:$4 sm:$0xff]   ;;  %v7196_v20 = vld [vmem:[%s7757_s25 + $0x180] ss:$48 sps:$4 sm:$0xff]   ;;  %v7197_v21 = vld [vmem:[%s7757_s25 + $0x188] ss:$48 sps:$4 sm:$0xff]  }
  0x33   : > { %1272 = vmatpush1.bf16.msra.mxu0 %v7178_v8  ;;  %1313 = vmatpush1.bf16.msra.mxu1 %v7179_v9  ;;  %v7198_v22 = vld [vmem:[%s7757_s25 + $0x1e4] ss:$48 sps:$4 sm:$0xff]   ;;  %v7200_v23 = vld [vmem:[%s7757_s25 + $0x1ec] ss:$48 sps:$4 sm:$0xff]   ;;  %v7202_v24 = vld [vmem:[%s7757_s25 + $0x1e0] ss:$48 sps:$4 sm:$0xff]  }
  0x34   : > { %1273 = vmatprep.subr.bf16.mxu0 %v7180_v10  ;;  %1314 = vmatprep.subr.bf16.mxu1 %v7182_v11  ;;  %v7203_v25 = vld [vmem:[%s7757_s25 + $0x1e8] ss:$48 sps:$4 sm:$0xff]   ;;  %v767_v26 = vld [vmem:[%s9455_s11] sm:$0x3]  ;;  %v7206_v27 = vld [vmem:[%s7757_s25 + $0x1c] ss:$48 sps:$4 sm:$0xff]  }
  0x35   : > { %v7837_v28 = vpack.c.bf16 %v767_v26, %v767_v26  ;;  %vm1265_vm0 = vcmask 785408   ;;  %v7204_v29 = vld [vmem:[%s7757_s25 + $0x18] ss:$48 sps:$4 sm:$0xff]   ;;  %v7209_v30 = vld [vmem:[%s7757_s25 + $0x7c] ss:$48 sps:$4 sm:$0xff]   ;;  %vm3070_vm1 = vcmask 523264  }
  0x36   : > { %v7224_v31 = vld [vmem:[%s7757_s25 + $0x14] ss:$48 sps:$4 sm:$0xff]   ;;  %v7222_v32 = vld [vmem:[%s7757_s25 + $0x10] ss:$48 sps:$4 sm:$0xff]   ;;  %v7207_v34 = vld [vmem:[%s7757_s25 + $0x78] ss:$48 sps:$4 sm:$0xff]  }
  0x37   : > { %1274 = vmatpush1.bf16.msra.mxu0 %v7184_v12  ;;  %1315 = vmatpush1.bf16.msra.mxu1 %v7185_v13  ;;  %v7227_v33 = vld [vmem:[%s7757_s25 + $0x74] ss:$48 sps:$4 sm:$0xff]   ;;  %v7212_v35 = vld [vmem:[%s7757_s25 + $0xdc] ss:$48 sps:$4 sm:$0xff]   ;;  %v7225_v36 = vld [vmem:[%s7757_s25 + $0x70] ss:$48 sps:$4 sm:$0xff]  }
  0x38   : > { %1275 = vmatprep.subr.bf16.mxu0 %v7186_v14  ;;  %1316 = vmatprep.subr.bf16.mxu1 %v7188_v15  ;;  %v7230_v37 = vld [vmem:[%s7757_s25 + $0xd4] ss:$48 sps:$4 sm:$0xff]   ;;  %v7210_v38 = vld [vmem:[%s7757_s25 + $0xd8] ss:$48 sps:$4 sm:$0xff]   ;;  %v7215_v39 = vld [vmem:[%s7757_s25 + $0x13c] ss:$48 sps:$4 sm:$0xff]  }
  0x39   : > { %v7228_v40 = vld [vmem:[%s7757_s25 + $0xd0] ss:$48 sps:$4 sm:$0xff]   ;;  %v7233_v41 = vld [vmem:[%s7757_s25 + $0x134] ss:$48 sps:$4 sm:$0xff]   ;;  %v7213_v42 = vld [vmem:[%s7757_s25 + $0x138] ss:$48 sps:$4 sm:$0xff]  }
  0x3a   : > { %v7218_v43 = vld [vmem:[%s7757_s25 + $0x19c] ss:$48 sps:$4 sm:$0xff]   ;;  %v7231_v44 = vld [vmem:[%s7757_s25 + $0x130] ss:$48 sps:$4 sm:$0xff]   ;;  %v7236_v45 = vld [vmem:[%s7757_s25 + $0x194] ss:$48 sps:$4 sm:$0xff]  }
  0x3b   : > { %1276 = vmatpush1.bf16.msra.mxu0 %v7190_v16  ;;  %1317 = vmatpush1.bf16.msra.mxu1 %v7191_v17  ;;  %v7216_v46 = vld [vmem:[%s7757_s25 + $0x198] ss:$48 sps:$4 sm:$0xff]   ;;  %v7221_v47 = vld [vmem:[%s7757_s25 + $0x1fc] ss:$48 sps:$4 sm:$0xff]   ;;  %v7234_v48 = vld [vmem:[%s7757_s25 + $0x190] ss:$48 sps:$4 sm:$0xff]  }
  0x3c   : > { %1277 = vmatprep.subr.bf16.mxu0 %v7192_v18  ;;  %1318 = vmatprep.subr.bf16.mxu1 %v7194_v19  ;;  %v7239_v49 = vld [vmem:[%s7757_s25 + $0x1f4] ss:$48 sps:$4 sm:$0xff]   ;;  %v7219_v50 = vld [vmem:[%s7757_s25 + $0x1f8] ss:$48 sps:$4 sm:$0xff]   ;;  %v7260_v51 = vld [vmem:[%s7757_s25 + $0x2c] ss:$48 sps:$4 sm:$0xff]  }
  0x3d   : > { %v7237_v52 = vld [vmem:[%s7757_s25 + $0x1f0] ss:$48 sps:$4 sm:$0xff]   ;;  %v7242_v53 = vld [vmem:[%s7757_s25 + $0x24] ss:$48 sps:$4 sm:$0xff]   ;;  %v7258_v54 = vld [vmem:[%s7757_s25 + $0x28] ss:$48 sps:$4 sm:$0xff]  }
  0x3e   : > { %v7263_v55 = vld [vmem:[%s7757_s25 + $0x8c] ss:$48 sps:$4 sm:$0xff]   ;;  %v7240_v56 = vld [vmem:[%s7757_s25 + $0x20] ss:$48 sps:$4 sm:$0xff]   ;;  %v7245_v57 = vld [vmem:[%s7757_s25 + $0x84] ss:$48 sps:$4 sm:$0xff]  }
  0x3f   : > { %1278 = vmatpush1.bf16.msra.mxu0 %v7196_v20  ;;  %1319 = vmatpush1.bf16.msra.mxu1 %v7197_v21  ;;  %v7261_v58 = vld [vmem:[%s7757_s25 + $0x88] ss:$48 sps:$4 sm:$0xff]   ;;  %v7266_v59 = vld [vmem:[%s7757_s25 + $0xec] ss:$48 sps:$4 sm:$0xff]   ;;  %v7243_v60 = vld [vmem:[%s7757_s25 + $0x80] ss:$48 sps:$4 sm:$0xff]  }
  0x40   : > { %1279 = vmatprep.subr.bf16.mxu0 %v7198_v22  ;;  %1320 = vmatprep.subr.bf16.mxu1 %v7200_v23  ;;  %v7248_v61 = vld [vmem:[%s7757_s25 + $0xe4] ss:$48 sps:$4 sm:$0xff]   ;;  %v7264_v62 = vld [vmem:[%s7757_s25 + $0xe8] ss:$48 sps:$4 sm:$0xff]   ;;  %v7269_v63 = vld [vmem:[%s7757_s25 + $0x14c] ss:$48 sps:$4 sm:$0xff]  }
  0x41   : > { %v7246_v0 = vld [vmem:[%s7757_s25 + $0xe0] ss:$48 sps:$4 sm:$0xff]   ;;  %v7251_v1 = vld [vmem:[%s7757_s25 + $0x144] ss:$48 sps:$4 sm:$0xff]   ;;  %v7267_v2 = vld [vmem:[%s7757_s25 + $0x148] ss:$48 sps:$4 sm:$0xff]  }
  0x42   : > { %v7272_v4 = vld [vmem:[%s7757_s25 + $0x1ac] ss:$48 sps:$4 sm:$0xff]   ;;  %v7249_v5 = vld [vmem:[%s7757_s25 + $0x140] ss:$48 sps:$4 sm:$0xff]   ;;  %v7254_v6 = vld [vmem:[%s7757_s25 + $0x1a4] ss:$48 sps:$4 sm:$0xff]  }
  0x43   : > { %1280 = vmatpush1.bf16.msra.mxu0 %v7202_v24  ;;  %1321 = vmatpush1.bf16.msra.mxu1 %v7203_v25  ;;  %v7270_v7 = vld [vmem:[%s7757_s25 + $0x1a8] ss:$48 sps:$4 sm:$0xff]   ;;  %v7275_v8 = vld [vmem:[%s7757_s25 + $0x20c] ss:$48 sps:$4 sm:$0xff]   ;;  %v7252_v9 = vld [vmem:[%s7757_s25 + $0x1a0] ss:$48 sps:$4 sm:$0xff]  }
  0x44   : > { %1392 = vmatprep.subr.bf16.mxu1 %v7206_v27  ;;  %1351 = vmatprep.subr.bf16.mxu0 %v7224_v31  ;;  %v7257_v10 = vld [vmem:[%s7757_s25 + $0x204] ss:$48 sps:$4 sm:$0xff]   ;;  %v7273_v11 = vld [vmem:[%s7757_s25 + $0x208] ss:$48 sps:$4 sm:$0xff]   ;;  %v7255_v13 = vld [vmem:[%s7757_s25 + $0x200] ss:$48 sps:$4 sm:$0xff]   ;;  %s9456_s25 = scalar_lea.vmem %s9415_s4, %s7744_s30 }
  0x45   : > { %v7299_v12 = vld [vmem:[%s7777_s0 + $0x4] ss:$8 sps:$4 sm:$0xff]   ;;  %v7297_v15 = vld [vmem:[%s7777_s0] ss:$8 sps:$4 sm:$0xff]   ;;  %v7305_v16 = vld [vmem:[%s7777_s0 + $0x14] ss:$8 sps:$4 sm:$0xff]  }
  0x46   : > { %6045 = vmatmul.mubr.msk.bf16.vlgmr.msra.gmra.mrb[0].mxu0 %vm1265_vm0, %v7837_v28  ;;  %6046 = vmatmul.mubr.msk.bf16.vlgmr.msra.gmra.mrb[0].mxu1 %vm1265_vm0, %v7837_v28  ;;  %v7278_v14 = vld [vmem:[%s7772_s1 + $0x4] ss:$8 sps:$4 sm:$0xff]   ;;  %v7276_v17 = vld [vmem:[%s7772_s1] ss:$8 sps:$4 sm:$0xff]   ;;  %v7281_v18 = vld [vmem:[%s7772_s1 + $0x14] ss:$8 sps:$4 sm:$0xff]  }
  0x47   : > { %1393 = vmatpush1.bf16.msra.mxu1 %v7204_v29  ;;  %1424 = vmatprep.mubr.bf16.mxu1 %v7628_v3  ;;  %v7303_v19 = vld [vmem:[%s7777_s0 + $0x10] ss:$8 sps:$4 sm:$0xff]   ;;  %v7284_v21 = vld [vmem:[%s7772_s1 + $0x24] ss:$8 sps:$4 sm:$0xff]   ;;  %v7309_v23 = vld [vmem:[%s7777_s0 + $0x20] ss:$8 sps:$4 sm:$0xff]  }
  0x48   : > { %1394 = vmatprep.subr.bf16.mxu1 %v7209_v30  ;;  %1352 = vmatpush1.bf16.msra.mxu0 %v7222_v32  ;;  %v7279_v20 = vld [vmem:[%s7772_s1 + $0x10] ss:$8 sps:$4 sm:$0xff]   ;;  %v7311_v22 = vld [vmem:[%s7777_s0 + $0x24] ss:$8 sps:$4 sm:$0xff]   ;;  %v7317_v24 = vld [vmem:[%s7777_s0 + $0x34] ss:$8 sps:$4 sm:$0xff]  }
  0x49   : > { %1383 = vmatprep.mubr.bf16.mxu0 %v7628_v3  ;;  %1353 = vmatprep.subr.bf16.mxu0 %v7227_v33  ;;  %v7282_v25 = vld [vmem:[%s7772_s1 + $0x20] ss:$8 sps:$4 sm:$0xff]   ;;  %v7287_v26 = vld [vmem:[%s7772_s1 + $0x34] ss:$8 sps:$4 sm:$0xff]   ;;  %v7315_v27 = vld [vmem:[%s7777_s0 + $0x30] ss:$8 sps:$4 sm:$0xff]  }
  0x4a   : > { %v7285_v29 = vld [vmem:[%s7772_s1 + $0x30] ss:$8 sps:$4 sm:$0xff]   ;;  %v7290_v30 = vld [vmem:[%s7772_s1 + $0x44] ss:$8 sps:$4 sm:$0xff]   ;;  %v7321_v31 = vld [vmem:[%s7777_s0 + $0x40] ss:$8 sps:$4 sm:$0xff]  }
  0x4b   : > { %1395 = vmatpush1.bf16.msra.mxu1 %v7207_v34  ;;  %v7329_v32 = vld [vmem:[%s7777_s0 + $0x54] ss:$8 sps:$4 sm:$0xff]   ;;  %v7288_v33 = vld [vmem:[%s7772_s1 + $0x40] ss:$8 sps:$4 sm:$0xff]   ;;  %s9458_s22 = sld [smem:[#allocation13_spill]]  ;;  %vm7630_vm2 = vmmov 0  }
  0x4c   : > { %1396 = vmatprep.subr.bf16.mxu1 %v7212_v35  ;;  %1354 = vmatpush1.bf16.msra.mxu0 %v7225_v36  ;;  %v7293_v34 = vld [vmem:[%s7772_s1 + $0x54] ss:$8 sps:$4 sm:$0xff]   ;;  %v7327_v35 = vld [vmem:[%s7777_s0 + $0x50] ss:$8 sps:$4 sm:$0xff]   ;;  %v7335_v36 = vld [vmem:[%s7777_s0 + $0x64] ss:$8 sps:$4 sm:$0xff]  }
  0x4d   : > { %1355 = vmatprep.subr.bf16.mxu0 %v7230_v37  ;;  %v7291_v37 = vld [vmem:[%s7772_s1 + $0x50] ss:$8 sps:$4 sm:$0xff]   ;;  %s9460_s26 = sld [smem:[#allocation14_spill]]  ;;  %p6402_p5 = scmp.ne.s32.totalorder %s7735_s28, 5 }
  0x4e   : > { %vm5784_vm3 = vcmask (!%p6402_p5), 107520  }
  0x4f   : > { %1397 = vmatpush1.bf16.msra.mxu1 %v7210_v38  ;;  %v7296_v38 = vld [vmem:[%s7772_s1 + $0x64] ss:$8 sps:$4 sm:$0xff]  }
  0x50   : > { %1398 = vmatprep.subr.bf16.mxu1 %v7215_v39  ;;  %1356 = vmatpush1.bf16.msra.mxu0 %v7228_v40  ;;  %v7333_v39 = vld [vmem:[%s7777_s0 + $0x60] ss:$8 sps:$4 sm:$0xff]   ;;  %v7341_v40 = vld [vmem:[%s7777_s0 + $0x74] ss:$8 sps:$4 sm:$0xff]  }
  0x51   : > { %1357 = vmatprep.subr.bf16.mxu0 %v7233_v41  ;;  %v7294_v41 = vld [vmem:[%s7772_s1 + $0x60] ss:$8 sps:$4 sm:$0xff]  }
  0x53   : > { %1399 = vmatpush1.bf16.msra.mxu1 %v7213_v42  ;;  %v7302_v42 = vld [vmem:[%s7772_s1 + $0x74] ss:$8 sps:$4 sm:$0xff]  }
  0x54   : > { %1400 = vmatprep.subr.bf16.mxu1 %v7218_v43  ;;  %1358 = vmatpush1.bf16.msra.mxu0 %v7231_v44  ;;  %v7339_v43 = vld [vmem:[%s7777_s0 + $0x70] ss:$8 sps:$4 sm:$0xff]  }
  0x55   : > { %1359 = vmatprep.subr.bf16.mxu0 %v7236_v45  ;;  %v7300_v44 = vld [vmem:[%s7772_s1 + $0x70] ss:$8 sps:$4 sm:$0xff]   ;;  %v7308_v45 = vld [vmem:[%s7772_s1 + $0x84] ss:$8 sps:$4 sm:$0xff]  }
  0x57   : > { %1401 = vmatpush1.bf16.msra.mxu1 %v7216_v46  ;;  %v7306_v46 = vld [vmem:[%s7772_s1 + $0x80] ss:$8 sps:$4 sm:$0xff]  }
  0x58   : > { %1402 = vmatprep.subr.bf16.mxu1 %v7221_v47  ;;  %1360 = vmatpush1.bf16.msra.mxu0 %v7234_v48  ;;  %v7314_v47 = vld [vmem:[%s7772_s1 + $0x94] ss:$8 sps:$4 sm:$0xff]   ;;  %v7312_v48 = vld [vmem:[%s7772_s1 + $0x90] ss:$8 sps:$4 sm:$0xff]  }
  0x59   : > { %1361 = vmatprep.subr.bf16.mxu0 %v7239_v49  ;;  %v7347_v49 = vld [vmem:[%s7777_s0 + $0x84] ss:$8 sps:$4 sm:$0xff]  }
  0x5b   : > { %1403 = vmatpush1.bf16.msra.mxu1 %v7219_v50  ;;  %v7320_v50 = vld [vmem:[%s7772_s1 + $0xa4] ss:$8 sps:$4 sm:$0xff]  }
  0x5c   : > { %1474 = vmatprep.subr.bf16.mxu1 %v7260_v51  ;;  %1362 = vmatpush1.bf16.msra.mxu0 %v7237_v52  ;;  %v7345_v51 = vld [vmem:[%s7777_s0 + $0x80] ss:$8 sps:$4 sm:$0xff]  }
  0x5d   : > { %1433 = vmatprep.subr.bf16.mxu0 %v7242_v53  ;;  %v7318_v52 = vld [vmem:[%s7772_s1 + $0xa0] ss:$8 sps:$4 sm:$0xff]   ;;  %v7353_v53 = vld [vmem:[%s7777_s0 + $0x94] ss:$8 sps:$4 sm:$0xff]  }
  0x5e   : > { %6048 = vmatmul.mubr.msk.bf16.vlgmr.msra.gmra.mrb[4].mxu1 %vm1265_vm0, %v7837_v28 }
  0x5f   : > { %1475 = vmatpush1.bf16.msra.mxu1 %v7258_v54  ;;  %1506 = vmatprep.mubr.bf16.mxu1 %v7628_v3  ;;  %v7326_v54 = vld [vmem:[%s7772_s1 + $0xb4] ss:$8 sps:$4 sm:$0xff]  }
  0x60   : > { %6047 = vmatmul.mubr.msk.bf16.vlgmr.msra.gmra.mrb[4].mxu0 %vm1265_vm0, %v7837_v28  ;;  %1476 = vmatprep.subr.bf16.mxu1 %v7263_v55  ;;  %v7351_v55 = vld [vmem:[%s7777_s0 + $0x90] ss:$8 sps:$4 sm:$0xff]  }
  0x61   : > { %1434 = vmatpush1.bf16.msra.mxu0 %v7240_v56  ;;  %1465 = vmatprep.mubr.bf16.mxu0 %v7628_v3  ;;  %v7324_v56 = vld [vmem:[%s7772_s1 + $0xb0] ss:$8 sps:$4 sm:$0xff]  }
  0x62   : > { %1435 = vmatprep.subr.bf16.mxu0 %v7245_v57  ;;  %v7359_v57 = vld [vmem:[%s7777_s0 + $0xa4] ss:$8 sps:$4 sm:$0xff]  }
  0x63   : > { %1477 = vmatpush1.bf16.msra.mxu1 %v7261_v58  ;;  %v7332_v58 = vld [vmem:[%s7772_s1 + $0xc4] ss:$8 sps:$4 sm:$0xff]  }
  0x64   : > { %1478 = vmatprep.subr.bf16.mxu1 %v7266_v59  ;;  %v7357_v59 = vld [vmem:[%s7777_s0 + $0xa0] ss:$8 sps:$4 sm:$0xff]  }
  0x65   : > { %1436 = vmatpush1.bf16.msra.mxu0 %v7243_v60  ;;  %v7330_v60 = vld [vmem:[%s7772_s1 + $0xc0] ss:$8 sps:$4 sm:$0xff]  }
  0x66   : > { %1437 = vmatprep.subr.bf16.mxu0 %v7248_v61  ;;  %v7338_v61 = vld [vmem:[%s7772_s1 + $0xd4] ss:$8 sps:$4 sm:$0xff]  }
  0x67   : > { %1479 = vmatpush1.bf16.msra.mxu1 %v7264_v62  ;;  %v7363_v62 = vld [vmem:[%s7777_s0 + $0xb0] ss:$8 sps:$4 sm:$0xff]  }
  0x68   : > { %1480 = vmatprep.subr.bf16.mxu1 %v7269_v63  ;;  %v7365_v63 = vld [vmem:[%s7777_s0 + $0xb4] ss:$8 sps:$4 sm:$0xff]  }
  0x69   : > { %1438 = vmatpush1.bf16.msra.mxu0 %v7246_v0  ;;  %v7336_v0 = vld [vmem:[%s7772_s1 + $0xd0] ss:$8 sps:$4 sm:$0xff]  }
  0x6a   : > { %1439 = vmatprep.subr.bf16.mxu0 %v7251_v1  ;;  %v7344_v1 = vld [vmem:[%s7772_s1 + $0xe4] ss:$8 sps:$4 sm:$0xff]  }
  0x6b   : > { %1481 = vmatpush1.bf16.msra.mxu1 %v7267_v2  ;;  %v7369_v2 = vld [vmem:[%s7777_s0 + $0xc0] ss:$8 sps:$4 sm:$0xff]  }
  0x6c   : > { %1482 = vmatprep.subr.bf16.mxu1 %v7272_v4  ;;  %v7371_v4 = vld [vmem:[%s7777_s0 + $0xc4] ss:$8 sps:$4 sm:$0xff]  }
  0x6d   : > { %1440 = vmatpush1.bf16.msra.mxu0 %v7249_v5  ;;  %v7342_v5 = vld [vmem:[%s7772_s1 + $0xe0] ss:$8 sps:$4 sm:$0xff]  }
  0x6e   : > { %1441 = vmatprep.subr.bf16.mxu0 %v7254_v6  ;;  %v7350_v6 = vld [vmem:[%s7772_s1 + $0xf4] ss:$8 sps:$4 sm:$0xff]  }
  0x6f   : > { %1483 = vmatpush1.bf16.msra.mxu1 %v7270_v7  ;;  %v7375_v7 = vld [vmem:[%s7777_s0 + $0xd0] ss:$8 sps:$4 sm:$0xff]  }
  0x70   : > { %1484 = vmatprep.subr.bf16.mxu1 %v7275_v8  ;;  %v7377_v8 = vld [vmem:[%s7777_s0 + $0xd4] ss:$8 sps:$4 sm:$0xff]  }
  0x71   : > { %1442 = vmatpush1.bf16.msra.mxu0 %v7252_v9  ;;  %v7348_v9 = vld [vmem:[%s7772_s1 + $0xf0] ss:$8 sps:$4 sm:$0xff]  }
  0x72   : > { %1443 = vmatprep.subr.bf16.mxu0 %v7257_v10  ;;  %v7383_v10 = vld [vmem:[%s7777_s0 + $0xe4] ss:$8 sps:$4 sm:$0xff]  }
  0x73   : > { %1485 = vmatpush1.bf16.msra.mxu1 %v7273_v11  ;;  %v7356_v11 = vld [vmem:[%s7772_s1 + $0x104] ss:$8 sps:$4 sm:$0xff]  }
  0x74   : > { %2840 = vmatprep.subr.bf16.mxu1 %v7299_v12  ;;  %v7381_v12 = vld [vmem:[%s7777_s0 + $0xe0] ss:$8 sps:$4 sm:$0xff]  }
  0x75   : > { %1444 = vmatpush1.bf16.msra.mxu0 %v7255_v13  ;;  %v7389_v13 = vld [vmem:[%s7777_s0 + $0xf4] ss:$8 sps:$4 sm:$0xff]  }
  0x76   : > { %6050 = vmatmul.mubr.msk.bf16.vlgmr.msra.gmra.mrb[8].mxu1 %vm1265_vm0, %v7837_v28  ;;  %2121 = vmatprep.subr.bf16.mxu0 %v7278_v14  ;;  %v7387_v14 = vld [vmem:[%s7777_s0 + $0xf0] ss:$8 sps:$4 sm:$0xff]  }
  0x77   : > { %2841 = vmatpush1.bf16.msra.mxu1 %v7297_v15  ;;  %v7395_v15 = vld [vmem:[%s7777_s0 + $0x104] ss:$8 sps:$4 sm:$0xff]  }
  0x78   : > { %6049 = vmatmul.mubr.msk.bf16.vlgmr.msra.gmra.mrb[8].mxu0 %vm1265_vm0, %v7837_v28  ;;  %2842 = vmatprep.subr.bf16.mxu1 %v7305_v16  ;;  %v7323_v28 = vld [vmem:[%s7777_s0 + $0x44] ss:$8 sps:$4 sm:$0xff]   ;;  %v845_v16 = vlaneseq }
  0x79   : > { %2122 = vmatpush1.bf16.msra.mxu0 %v7276_v17 }
  0x7a   : > { %2123 = vmatprep.subr.bf16.mxu0 %v7281_v18  ;;  %v7968_v17 = vshrl.u32 %v845_v16, 7  ;;  %v7407_v16 = vld [vmem:[%s7777_s0 + $0x124] ss:$8 sps:$4 sm:$0xff]  }
  0x7b   : > { %2843 = vmatpush1.bf16.msra.mxu1 %v7303_v19  ;;  %v7974_v19 = vld [vmem:[%s7763_s15] sm:$0xff] }
  0x7c   : > { %2844 = vmatprep.subr.bf16.mxu1 %v7311_v22  ;;  %v7971_v18 = vsub.s32 0, %v7968_v17 }
  0x7d   : > { %2124 = vmatpush1.bf16.msra.mxu0 %v7279_v20  ;;  %v7977_v20 = vsub.s32 1, %v7968_v17 }
  0x7e   : > { %2125 = vmatprep.subr.bf16.mxu0 %v7284_v21  ;;  %v7980_v21 = vsub.s32 3, %v7968_v17  ;;  %v848_v22 = vrot.slane %v7974_v19, %v7971_v18 }
  0x7f   : > { %2845 = vmatpush1.bf16.msra.mxu1 %v7309_v23  ;;  %v852_v23 = vrot.slane %v7974_v19, %v7977_v20 }
  0x80   : > { %2846 = vmatprep.subr.bf16.mxu1 %v7317_v24  ;;  %v860_v24 = vrot.slane %v7974_v19, %v7980_v21 }
  0x81   : > { %2126 = vmatpush1.bf16.msra.mxu0 %v7282_v25 }
  0x82   : > { %2127 = vmatprep.subr.bf16.mxu0 %v7287_v26 }
  0x83   : > { %2847 = vmatpush1.bf16.msra.mxu1 %v7315_v27 }
  0x84   : > { %2848 = vmatprep.subr.bf16.mxu1 %v7323_v28 }
  0x85   : > { %2128 = vmatpush1.bf16.msra.mxu0 %v7285_v29 }
  0x86   : > { %2129 = vmatprep.subr.bf16.mxu0 %v7290_v30 }
  0x87   : > { %2849 = vmatpush1.bf16.msra.mxu1 %v7321_v31 }
  0x88   : > { %2850 = vmatprep.subr.bf16.mxu1 %v7329_v32 }
  0x89   : > { %2130 = vmatpush1.bf16.msra.mxu0 %v7288_v33 }
  0x8a   : > { %2131 = vmatprep.subr.bf16.mxu0 %v7293_v34 }
  0x8b   : > { %2851 = vmatpush1.bf16.msra.mxu1 %v7327_v35 }
  0x8c   : > { %2852 = vmatprep.subr.bf16.mxu1 %v7335_v36 }
  0x8d   : > { %2132 = vmatpush1.bf16.msra.mxu0 %v7291_v37 }
  0x8e   : > { %2133 = vmatprep.subr.bf16.mxu0 %v7296_v38 }
  0x8f   : > { %2853 = vmatpush1.bf16.msra.mxu1 %v7333_v39 }
  0x90   : > { %2854 = vmatprep.subr.bf16.mxu1 %v7341_v40 }
  0x91   : > { %2134 = vmatpush1.bf16.msra.mxu0 %v7294_v41  ;;  %v7354_v41 = vld [vmem:[%s7772_s1 + $0x100] ss:$8 sps:$4 sm:$0xff]  }
  0x92   : > { %2135 = vmatprep.subr.bf16.mxu0 %v7302_v42  ;;  %v7362_v42 = vld [vmem:[%s7772_s1 + $0x114] ss:$8 sps:$4 sm:$0xff]  }
  0x93   : > { %2855 = vmatpush1.bf16.msra.mxu1 %v7339_v43 }
  0x94   : > { %2856 = vmatprep.subr.bf16.mxu1 %v7347_v49  ;;  %v7372_v49 = vld [vmem:[%s7772_s1 + $0x130] ss:$8 sps:$4 sm:$0xff]  }
  0x95   : > { %2136 = vmatpush1.bf16.msra.mxu0 %v7300_v44  ;;  %v7360_v44 = vld [vmem:[%s7772_s1 + $0x110] ss:$8 sps:$4 sm:$0xff]  }
  0x96   : > { %2137 = vmatprep.subr.bf16.mxu0 %v7308_v45  ;;  %v7368_v45 = vld [vmem:[%s7772_s1 + $0x124] ss:$8 sps:$4 sm:$0xff]  }
  0x97   : > { %2857 = vmatpush1.bf16.msra.mxu1 %v7345_v51  ;;  %v7380_v51 = vld [vmem:[%s7772_s1 + $0x144] ss:$8 sps:$4 sm:$0xff]  }
  0x98   : > { %2858 = vmatprep.subr.bf16.mxu1 %v7353_v53  ;;  %v7378_v53 = vld [vmem:[%s7772_s1 + $0x140] ss:$8 sps:$4 sm:$0xff]  }
  0x99   : > { %2138 = vmatpush1.bf16.msra.mxu0 %v7306_v46  ;;  %v7366_v46 = vld [vmem:[%s7772_s1 + $0x120] ss:$8 sps:$4 sm:$0xff]  }
  0x9a   : > { %2139 = vmatprep.subr.bf16.mxu0 %v7314_v47  ;;  %v7374_v47 = vld [vmem:[%s7772_s1 + $0x134] ss:$8 sps:$4 sm:$0xff]  }
  0x9b   : > { %2859 = vmatpush1.bf16.msra.mxu1 %v7351_v55  ;;  %v7386_v55 = vld [vmem:[%s7772_s1 + $0x154] ss:$8 sps:$4 sm:$0xff]  }
  0x9c   : > { %2860 = vmatprep.subr.bf16.mxu1 %v7359_v57 }
  0x9d   : > { %2140 = vmatpush1.bf16.msra.mxu0 %v7312_v48  ;;  %v7997_v48 = vsub.s32 6, %v7968_v17 }
  0x9e   : > { %2141 = vmatprep.subr.bf16.mxu0 %v7320_v50  ;;  %v8001_v50 = vsub.s32 7, %v7968_v17 }
  0x9f   : > { %2861 = vmatpush1.bf16.msra.mxu1 %v7357_v59 }
  0xa0   : > { %2862 = vmatprep.subr.bf16.mxu1 %v7365_v63 }
  0xa1   : > { %2142 = vmatpush1.bf16.msra.mxu0 %v7318_v52  ;;  %v872_v52 = vrot.slane %v7974_v19, %v7997_v48 }
  0xa2   : > { %2143 = vmatprep.subr.bf16.mxu0 %v7326_v54  ;;  %v876_v54 = vrot.slane %v7974_v19, %v8001_v50 }
  0xa3   : > { %2863 = vmatpush1.bf16.msra.mxu1 %v7363_v62 }
  0xa4   : > { %2864 = vmatprep.subr.bf16.mxu1 %v7371_v4 }
  0xa5   : > { %2144 = vmatpush1.bf16.msra.mxu0 %v7324_v56 }
  0xa6   : > { %2145 = vmatprep.subr.bf16.mxu0 %v7332_v58 }
  0xa7   : > { %2865 = vmatpush1.bf16.msra.mxu1 %v7369_v2 }
  0xa8   : > { %2866 = vmatprep.subr.bf16.mxu1 %v7377_v8  ;;  %v7390_v8 = vld [vmem:[%s7772_s1 + $0x160] ss:$8 sps:$4 sm:$0xff]  }
  0xa9   : > { %2146 = vmatpush1.bf16.msra.mxu0 %v7330_v60 }
  0xaa   : > { %2147 = vmatprep.subr.bf16.mxu0 %v7338_v61  ;;  %v7384_v61 = vld [vmem:[%s7772_s1 + $0x150] ss:$8 sps:$4 sm:$0xff]  }
  0xab   : > { %2867 = vmatpush1.bf16.msra.mxu1 %v7375_v7 }
  0xac   : > { %2868 = vmatprep.subr.bf16.mxu1 %v7383_v10 }
  0xad   : > { %2148 = vmatpush1.bf16.msra.mxu0 %v7336_v0 }
  0xae   : > { %2149 = vmatprep.subr.bf16.mxu0 %v7344_v1  ;;  %v7392_v1 = vld [vmem:[%s7772_s1 + $0x164] ss:$8 sps:$4 sm:$0xff]  }
  0xaf   : > { %2869 = vmatpush1.bf16.msra.mxu1 %v7381_v12  ;;  %v7401_v12 = vld [vmem:[%s7777_s0 + $0x114] ss:$8 sps:$4 sm:$0xff]  }
  0xb0   : > { %2870 = vmatprep.subr.bf16.mxu1 %v7389_v13  ;;  %v7396_v13 = vld [vmem:[%s7772_s1 + $0x170] ss:$8 sps:$4 sm:$0xff]  }
  0xb1   : > { %2150 = vmatpush1.bf16.msra.mxu0 %v7342_v5 }
  0xb2   : > { %2151 = vmatprep.subr.bf16.mxu0 %v7350_v6 }
  0xb3   : > { %2871 = vmatpush1.bf16.msra.mxu1 %v7387_v14  ;;  %v7399_v14 = vld [vmem:[%s7777_s0 + $0x110] ss:$8 sps:$4 sm:$0xff]  }
  0xb4   : > { %2881 = vmatprep.subr.bf16.mxu1 %v7395_v15  ;;  %v7404_v15 = vld [vmem:[%s7772_s1 + $0x184] ss:$8 sps:$4 sm:$0xff]  }
  0xb5   : > { %2152 = vmatpush1.bf16.msra.mxu0 %v7348_v9  ;;  %v7393_v9 = vld [vmem:[%s7777_s0 + $0x100] ss:$8 sps:$4 sm:$0xff]  }
  0xb6   : > { %2162 = vmatprep.subr.bf16.mxu0 %v7356_v11  ;;  %v7398_v11 = vld [vmem:[%s7772_s1 + $0x174] ss:$8 sps:$4 sm:$0xff]  }
 0x119   : > { %v1303_v25 = vpop.f32.mrb[0].mxu0  ;;  %v7988_v26 = vpop.f32.mrb[0].mxu1 }
 0x11a   : > { %v1304_v27 = vadd.f32 %v1303_v25, %v848_v22  ;;  %v1305_v28 = vpop.f32.mrb[1].mxu0  ;;  %v1346_v29 = vpop.f32.mrb[1].mxu1  ;;  %v7402_v22 = vld [vmem:[%s7772_s1 + $0x180] ss:$8 sps:$4 sm:$0xff]   ;;  %v7413_v25 = vld [vmem:[%s7777_s0 + $0x134] ss:$8 sps:$4 sm:$0xff]  }
 0x11b   : > { %v1306_v30 = vadd.f32 %v1305_v28, %v852_v23  ;;  %v1347_v31 = vadd.f32 %v1346_v29, %v860_v24  ;;  %v1348_v32 = vpop.f32.mrb[2].mxu1  ;;  %v1307_v33 = vpop.f32.mrb[2].mxu0  ;;  %v7405_v23 = vld [vmem:[%s7777_s0 + $0x120] ss:$8 sps:$4 sm:$0xff]   ;;  %v7410_v24 = vld [vmem:[%s7772_s1 + $0x194] ss:$8 sps:$4 sm:$0xff]  }
 0x11c   : > { %v1515_v34 = vmax.f32 %v1304_v27, 0.0  ;;  %v1349_v35 = vpop.f32.mrb[3].mxu1  ;;  %v1308_v36 = vpop.f32.mrb[3].mxu0  ;;  %v7408_v27 = vld [vmem:[%s7772_s1 + $0x190] ss:$8 sps:$4 sm:$0xff]   ;;  %v8031_v29 = vsub.s32 2, %v7968_v17 }
 0x11d   : > { %v1516_v37 = vmax.f32 %v1306_v30, 0.0  ;;  %v1518_v38 = vmax.f32 %v1347_v31, 0.0  ;;  %v7411_v28 = vld [vmem:[%s7777_s0 + $0x130] ss:$8 sps:$4 sm:$0xff]   ;;  %v7416_v30 = vld [vmem:[%s7772_s1 + $0x1a4] ss:$8 sps:$4 sm:$0xff]  }
 0x11e   : > { %v1623_v39 = vpack.c.bf16 %v1515_v34, %v1515_v34  ;;  %v7419_v31 = vld [vmem:[%s7777_s0 + $0x144] ss:$8 sps:$4 sm:$0xff]   ;;  %v8036_v32 = vld [vmem:[%s7763_s15 + $0x8] sm:$0xf]  ;;  %v7422_v36 = vld [vmem:[%s7772_s1 + $0x1b4] ss:$8 sps:$4 sm:$0xff]  }
 0x11f   : > { %v1624_v40 = vpack.c.bf16 %v1516_v37, %v1516_v37  ;;  %v1626_v43 = vpack.c.bf16 %v1518_v38, %v1518_v38  ;;  %v888_v33 = vrot.slane %v8036_v32, %v8031_v29  ;;  %v7414_v34 = vld [vmem:[%s7772_s1 + $0x1a0] ss:$8 sps:$4 sm:$0xff]   ;;  %v7425_v37 = vld [vmem:[%s7777_s0 + $0x154] ss:$8 sps:$4 sm:$0xff]   ;;  %v884_v38 = vrot.slane %v8036_v32, %v7977_v20  ;;  %s9463_s15 = sld [smem:[#allocation17_spill]] (!%p6402_p5) }
 0x120   : > { %v7417_v35 = vld [vmem:[%s7777_s0 + $0x140] ss:$8 sps:$4 sm:$0xff]  }
 0x121   : > { %2153 = vmatprep.mubr.bf16.mxu0 %v1624_v40 }
 0x122   : > { %2154 = vmatmul.mubr.bf16.vlgmr.msra.gmra.mrb[12].mxu0 %v1623_v39 }
 0x123   : > { %2163 = vmatpush1.bf16.msra.mxu0 %v7354_v41  ;;  %2194 = vmatprep.mubr.bf16.mxu0 %v1626_v43  ;;  %v7423_v43 = vld [vmem:[%s7777_s0 + $0x150] ss:$8 sps:$4 sm:$0xff]  }
 0x124   : > { %2164 = vmatprep.subr.bf16.mxu0 %v7362_v42  ;;  %v7420_v42 = vld [vmem:[%s7772_s1 + $0x1b0] ss:$8 sps:$4 sm:$0xff]  }
 0x127   : > { %2165 = vmatpush1.bf16.msra.mxu0 %v7360_v44 }
 0x128   : > { %2166 = vmatprep.subr.bf16.mxu0 %v7368_v45 }
 0x12b   : > { %2167 = vmatpush1.bf16.msra.mxu0 %v7366_v46  ;;  %v7428_v46 = vld [vmem:[%s7772_s1 + $0x1c4] ss:$8 sps:$4 sm:$0xff]  }
 0x12c   : > { %2168 = vmatprep.subr.bf16.mxu0 %v7374_v47  ;;  %v7431_v47 = vld [vmem:[%s7777_s0 + $0x164] ss:$8 sps:$4 sm:$0xff]  }
 0x12f   : > { %2169 = vmatpush1.bf16.msra.mxu0 %v7372_v49 }
 0x130   : > { %2170 = vmatprep.subr.bf16.mxu0 %v7380_v51 }
 0x131   : > { %v1426_v56 = vpop.f32.mrb[4].mxu1 }
 0x132   : > { %v1427_v57 = vadd.f32 %v1426_v56, %v872_v52  ;;  %v1428_v58 = vpop.f32.mrb[5].mxu1  ;;  %v7429_v56 = vld [vmem:[%s7777_s0 + $0x160] ss:$8 sps:$4 sm:$0xff]  }
 0x133   : > { %v1429_v59 = vadd.f32 %v1428_v58, %v876_v54  ;;  %2171 = vmatpush1.bf16.msra.mxu0 %v7378_v53  ;;  %v1430_v60 = vpop.f32.mrb[6].mxu1  ;;  %v8011_v62 = vpop.f32.mrb[4].mxu0 }
 0x134   : > { %v1521_v63 = vmax.f32 %v1427_v57, 0.0  ;;  %v1431_v0 = vpop.f32.mrb[7].mxu1  ;;  %2172 = vmatprep.subr.bf16.mxu0 %v7386_v55  ;;  %v8014_v2 = vpop.f32.mrb[5].mxu0  ;;  %v7426_v55 = vld [vmem:[%s7772_s1 + $0x1c0] ss:$8 sps:$4 sm:$0xff]   ;;  %v8059_v57 = vsub.s32 5, %v7968_v17 }
 0x135   : > { %v1522_v4 = vmax.f32 %v1429_v59, 0.0  ;;  %v1389_v5 = vpop.f32.mrb[6].mxu0  ;;  %v7434_v59 = vld [vmem:[%s7772_s1 + $0x1d4] ss:$8 sps:$4 sm:$0xff]   ;;  %v7435_v0 = vld [vmem:[%s7777_s0 + $0x170] ss:$8 sps:$4 sm:$0xff]  }
 0x136   : > { %v1390_v6 = vpop.f32.mrb[7].mxu0  ;;  %v2342_v10 = vpack.c.bf16 %v1521_v63, %v1521_v63  ;;  %v7437_v60 = vld [vmem:[%s7777_s0 + $0x174] ss:$8 sps:$4 sm:$0xff]   ;;  %v7432_v63 = vld [vmem:[%s7772_s1 + $0x1d0] ss:$8 sps:$4 sm:$0xff]  }
 0x137   : > { %v2343_v7 = vpack.c.bf16 %v1522_v4, %v1522_v4  ;;  %2173 = vmatpush1.bf16.msra.mxu0 %v7384_v61  ;;  %v856_v4 = vrot.slane %v7974_v19, %v8031_v29  ;;  %v7440_v5 = vld [vmem:[%s7772_s1 + $0x1e4] ss:$8 sps:$4 sm:$0xff]  }
 0x138   : > { %2174 = vmatprep.subr.bf16.mxu0 %v7392_v1  ;;  %v868_v1 = vrot.slane %v7974_v19, %v8059_v57  ;;  %v7443_v6 = vld [vmem:[%s7777_s0 + $0x184] ss:$8 sps:$4 sm:$0xff]  }
 0x139   : > { %2872 = vmatprep.mubr.bf16.mxu1 %v2343_v7 }
 0x13a   : > { %2873 = vmatmul.mubr.bf16.vlgmr.msra.gmra.mrb[12].mxu1 %v2342_v10  ;;  %v1388_v7 = vadd.f32 %v8014_v2, %v868_v1  ;;  %v1345_v10 = vadd.f32 %v7988_v26, %v856_v4  ;;  %v7497_v1 = vld [vmem:[%s7777_s0 + $0x214] ss:$8 sps:$4 sm:$0xff]  }
 0x13b   : > { %2175 = vmatpush1.bf16.msra.mxu0 %v7390_v8  ;;  %2882 = vmatpush1.bf16.msra.mxu1 %v7393_v9  ;;  %v7438_v8 = vld [vmem:[%s7772_s1 + $0x1e0] ss:$8 sps:$4 sm:$0xff]  }
 0x13c   : > { %2176 = vmatprep.subr.bf16.mxu0 %v7398_v11  ;;  %2883 = vmatprep.subr.bf16.mxu1 %v7401_v12  ;;  %v7441_v9 = vld [vmem:[%s7777_s0 + $0x180] ss:$8 sps:$4 sm:$0xff]   ;;  %v7446_v11 = vld [vmem:[%s7772_s1 + $0x1f4] ss:$8 sps:$4 sm:$0xff]   ;;  %v1517_v2 = vmax.f32 %v1345_v10, 0.0 }
 0x13d   : > { %v7449_v12 = vld [vmem:[%s7777_s0 + $0x194] ss:$8 sps:$4 sm:$0xff]   ;;  %v7501_v10 = vld [vmem:[%s7777_s0 + $0x220] ss:$8 sps:$4 sm:$0xff]  }
 0x13f   : > { %2177 = vmatpush1.bf16.msra.mxu0 %v7396_v13  ;;  %2884 = vmatpush1.bf16.msra.mxu1 %v7399_v14  ;;  %v1520_v13 = vmax.f32 %v1388_v7, 0.0  ;;  %v7444_v14 = vld [vmem:[%s7772_s1 + $0x1f0] ss:$8 sps:$4 sm:$0xff]   ;;  %v7500_v7 = vld [vmem:[%s7772_s1 + $0x284] ss:$8 sps:$4 sm:$0xff]  }
 0x140   : > { %2178 = vmatprep.subr.bf16.mxu0 %v7404_v15  ;;  %2885 = vmatprep.subr.bf16.mxu1 %v7407_v16  ;;  %v7447_v15 = vld [vmem:[%s7777_s0 + $0x190] ss:$8 sps:$4 sm:$0xff]   ;;  %v7452_v16 = vld [vmem:[%s7772_s1 + $0x204] ss:$8 sps:$4 sm:$0xff]  }
 0x141   : > { %v1628_v26 = vpack.c.bf16 %v1520_v13, %v1520_v13  ;;  %v7504_v13 = vld [vmem:[%s7772_s1 + $0x290] ss:$8 sps:$4 sm:$0xff]  }
 0x143   : > { %2179 = vmatpush1.bf16.msra.mxu0 %v7402_v22  ;;  %2886 = vmatpush1.bf16.msra.mxu1 %v7405_v23  ;;  %v7455_v22 = vld [vmem:[%s7777_s0 + $0x1a4] ss:$8 sps:$4 sm:$0xff]   ;;  %v7450_v23 = vld [vmem:[%s7772_s1 + $0x200] ss:$8 sps:$4 sm:$0xff]  }
 0x144   : > { %2180 = vmatprep.subr.bf16.mxu0 %v7410_v24  ;;  %2887 = vmatprep.subr.bf16.mxu1 %v7413_v25  ;;  %v1625_v24 = vpack.c.bf16 %v1517_v2, %v1517_v2  ;;  %v7453_v25 = vld [vmem:[%s7777_s0 + $0x1a0] ss:$8 sps:$4 sm:$0xff]   ;;  %v7515_v2 = vld [vmem:[%s7777_s0 + $0x244] ss:$8 sps:$4 sm:$0xff]  }
 0x147   : > { %2181 = vmatpush1.bf16.msra.mxu0 %v7408_v27  ;;  %2888 = vmatpush1.bf16.msra.mxu1 %v7411_v28  ;;  %v7458_v27 = vld [vmem:[%s7772_s1 + $0x214] ss:$8 sps:$4 sm:$0xff]  }
 0x148   : > { %2182 = vmatprep.subr.bf16.mxu0 %v7416_v30  ;;  %2889 = vmatprep.subr.bf16.mxu1 %v7419_v31  ;;  %v7461_v28 = vld [vmem:[%s7777_s0 + $0x1b4] ss:$8 sps:$4 sm:$0xff]   ;;  %v7456_v30 = vld [vmem:[%s7772_s1 + $0x210] ss:$8 sps:$4 sm:$0xff]  }
 0x149   : > { %v1508_v39 = vpop.f32.mrb[8].mxu1  ;;  %v7459_v31 = vld [vmem:[%s7777_s0 + $0x1b0] ss:$8 sps:$4 sm:$0xff]  }
 0x14a   : > { %v8046_v40 = vadd.f32 %v1508_v39, %v888_v33  ;;  %v8048_v41 = vpop.f32.mrb[9].mxu1  ;;  %v7464_v33 = vld [vmem:[%s7772_s1 + $0x224] ss:$8 sps:$4 sm:$0xff]   ;;  %v7468_v39 = vld [vmem:[%s7772_s1 + $0x230] ss:$8 sps:$4 sm:$0xff]  }
 0x14b   : > { %2183 = vmatpush1.bf16.msra.mxu0 %v7414_v34  ;;  %2890 = vmatpush1.bf16.msra.mxu1 %v7417_v35  ;;  %v8052_v44 = vpop.f32.mrb[8].mxu0  ;;  %v1512_v45 = vpop.f32.mrb[10].mxu1  ;;  %v7467_v34 = vld [vmem:[%s7777_s0 + $0x1c4] ss:$8 sps:$4 sm:$0xff]   ;;  %v7462_v35 = vld [vmem:[%s7772_s1 + $0x220] ss:$8 sps:$4 sm:$0xff]  }
 0x14c   : > { %2184 = vmatprep.subr.bf16.mxu0 %v7422_v36  ;;  %2891 = vmatprep.subr.bf16.mxu1 %v7425_v37  ;;  %v1469_v49 = vpop.f32.mrb[9].mxu0  ;;  %v1513_v51 = vpop.f32.mrb[11].mxu1  ;;  %v7465_v36 = vld [vmem:[%s7777_s0 + $0x1c0] ss:$8 sps:$4 sm:$0xff]   ;;  %v7470_v37 = vld [vmem:[%s7772_s1 + $0x234] ss:$8 sps:$4 sm:$0xff]  }
 0x14d   : > { %v1470_v52 = vadd.f32 %v1469_v49, %v884_v38  ;;  %v1471_v53 = vpop.f32.mrb[10].mxu0  ;;  %v7473_v38 = vld [vmem:[%s7777_s0 + $0x1d4] ss:$8 sps:$4 sm:$0xff]   ;;  %v7476_v45 = vld [vmem:[%s7772_s1 + $0x244] ss:$8 sps:$4 sm:$0xff]  }
 0x14e   : > { %v1472_v54 = vpop.f32.mrb[11].mxu0  ;;  %v7474_v51 = vld [vmem:[%s7772_s1 + $0x240] ss:$8 sps:$4 sm:$0xff]   ;;  %v7482_v53 = vld [vmem:[%s7772_s1 + $0x254] ss:$8 sps:$4 sm:$0xff]  }
 0x14f   : > { %2185 = vmatpush1.bf16.msra.mxu0 %v7420_v42  ;;  %2892 = vmatpush1.bf16.msra.mxu1 %v7423_v43  ;;  %v1524_v58 = vmax.f32 %v1470_v52, 0.0  ;;  %v880_v42 = vrot.slane %v8036_v32, %v7971_v18  ;;  %v7471_v43 = vld [vmem:[%s7777_s0 + $0x1d0] ss:$8 sps:$4 sm:$0xff]   ;;  %v7477_v52 = vld [vmem:[%s7777_s0 + $0x1e0] ss:$8 sps:$4 sm:$0xff]  }
 0x150   : > { %2186 = vmatprep.subr.bf16.mxu0 %v7428_v46  ;;  %2893 = vmatprep.subr.bf16.mxu1 %v7431_v47  ;;  %v7479_v46 = vld [vmem:[%s7777_s0 + $0x1e4] ss:$8 sps:$4 sm:$0xff]   ;;  %v892_v47 = vrot.slane %v8036_v32, %v7980_v21  ;;  %v7485_v54 = vld [vmem:[%s7777_s0 + $0x1f4] ss:$8 sps:$4 sm:$0xff]   ;;  %v7480_v32 = vld [vmem:[%s7772_s1 + $0x250] ss:$8 sps:$4 sm:$0xff]  }
 0x151   : > { %v2345_v61 = vpack.c.bf16 %v1524_v58, %v1524_v58  ;;  %v1468_v49 = vadd.f32 %v8052_v44, %v880_v42  ;;  %v7483_v44 = vld [vmem:[%s7777_s0 + $0x1f0] ss:$8 sps:$4 sm:$0xff]   ;;  %v7488_v58 = vld [vmem:[%s7772_s1 + $0x264] ss:$8 sps:$4 sm:$0xff]  }
 0x152   : > { %v7539_v42 = vld [vmem:[%s7777_s0 + $0x284] ss:$8 sps:$4 sm:$0xff]  }
 0x153   : > { %2187 = vmatpush1.bf16.msra.mxu0 %v7426_v55  ;;  %2894 = vmatpush1.bf16.msra.mxu1 %v7429_v56  ;;  %v1511_v55 = vadd.f32 %v8048_v41, %v892_v47  ;;  %v1523_v56 = vmax.f32 %v1468_v49, 0.0  ;;  %v7489_v41 = vld [vmem:[%s7777_s0 + $0x200] ss:$8 sps:$4 sm:$0xff]   ;;  %v7542_v47 = vld [vmem:[%s7772_s1 + $0x2f4] ss:$8 sps:$4 sm:$0xff]  }
 0x154   : > { %2188 = vmatprep.subr.bf16.mxu0 %v7434_v59  ;;  %2895 = vmatprep.subr.bf16.mxu1 %v7437_v60  ;;  %v7491_v59 = vld [vmem:[%s7777_s0 + $0x204] ss:$8 sps:$4 sm:$0xff]   ;;  %v7540_v49 = vld [vmem:[%s7772_s1 + $0x2f0] ss:$8 sps:$4 sm:$0xff]  }
 0x155   : > { %2913 = vmatprep.mubr.bf16.mxu1 %v2345_v61  ;;  %v1526_v60 = vmax.f32 %v1511_v55, 0.0  ;;  %v2344_v61 = vpack.c.bf16 %v1523_v56, %v1523_v56  ;;  %v7546_v55 = vld [vmem:[%s7777_s0 + $0x2a0] ss:$8 sps:$4 sm:$0xff]   ;;  %v7551_v56 = vld [vmem:[%s7777_s0 + $0x2b4] ss:$8 sps:$4 sm:$0xff]  }
 0x157   : > { %2189 = vmatpush1.bf16.msra.mxu0 %v7432_v63  ;;  %2896 = vmatpush1.bf16.msra.mxu1 %v7435_v0  ;;  %v7486_v63 = vld [vmem:[%s7772_s1 + $0x260] ss:$8 sps:$4 sm:$0xff]   ;;  %v7494_v0 = vld [vmem:[%s7772_s1 + $0x274] ss:$8 sps:$4 sm:$0xff]   ;;  %v2347_v4 = vpack.c.bf16 %v1526_v60, %v1526_v60 }
 0x158   : > { %2190 = vmatprep.subr.bf16.mxu0 %v7440_v5  ;;  %2897 = vmatprep.subr.bf16.mxu1 %v7443_v6  ;;  %v7492_v5 = vld [vmem:[%s7772_s1 + $0x270] ss:$8 sps:$4 sm:$0xff]   ;;  %v7552_v60 = vld [vmem:[%s7777_s0 + $0x2c0] ss:$8 sps:$4 sm:$0xff]  }
 0x159   : > { %v7495_v6 = vld [vmem:[%s7777_s0 + $0x210] ss:$8 sps:$4 sm:$0xff]  }
 0x15b   : > { %2191 = vmatpush1.bf16.msra.mxu0 %v7438_v8  ;;  %2898 = vmatpush1.bf16.msra.mxu1 %v7441_v9  ;;  %v7503_v8 = vld [vmem:[%s7777_s0 + $0x224] ss:$8 sps:$4 sm:$0xff]   ;;  %v7498_v9 = vld [vmem:[%s7772_s1 + $0x280] ss:$8 sps:$4 sm:$0xff]  }
 0x15c   : > { %2192 = vmatprep.subr.bf16.mxu0 %v7446_v11  ;;  %2899 = vmatprep.subr.bf16.mxu1 %v7449_v12  ;;  %v7506_v11 = vld [vmem:[%s7772_s1 + $0x294] ss:$8 sps:$4 sm:$0xff]  }
 0x15d   : > { %v7509_v12 = vld [vmem:[%s7777_s0 + $0x234] ss:$8 sps:$4 sm:$0xff]  }
 0x15f   : > { %2193 = vmatpush1.bf16.msra.mxu0 %v7444_v14  ;;  %2900 = vmatpush1.bf16.msra.mxu1 %v7447_v15  ;;  %v7507_v14 = vld [vmem:[%s7777_s0 + $0x230] ss:$8 sps:$4 sm:$0xff]   ;;  %v7512_v15 = vld [vmem:[%s7772_s1 + $0x2a4] ss:$8 sps:$4 sm:$0xff]  }
 0x160   : > { %2203 = vmatprep.subr.bf16.mxu0 %v7452_v16  ;;  %2901 = vmatprep.subr.bf16.mxu1 %v7455_v22  ;;  %v7510_v16 = vld [vmem:[%s7772_s1 + $0x2a0] ss:$8 sps:$4 sm:$0xff]  }
 0x161   : > { %v7513_v22 = vld [vmem:[%s7777_s0 + $0x240] ss:$8 sps:$4 sm:$0xff]  }
 0x162   : > { %2195 = vmatmul.mubr.bf16.vlgmr.msra.gmra.mrb[12].mxu0 %v1625_v24  ;;  %v7516_v24 = vld [vmem:[%s7772_s1 + $0x2b0] ss:$8 sps:$4 sm:$0xff]  }
 0x163   : > { %2204 = vmatpush1.bf16.msra.mxu0 %v7450_v23  ;;  %2235 = vmatprep.mubr.bf16.mxu0 %v1628_v26  ;;  %v7518_v26 = vld [vmem:[%s7772_s1 + $0x2b4] ss:$8 sps:$4 sm:$0xff]  }
 0x164   : > { %2902 = vmatpush1.bf16.msra.mxu1 %v7453_v25  ;;  %2205 = vmatprep.subr.bf16.mxu0 %v7458_v27  ;;  %v7521_v23 = vld [vmem:[%s7777_s0 + $0x254] ss:$8 sps:$4 sm:$0xff]   ;;  %v7519_v25 = vld [vmem:[%s7777_s0 + $0x250] ss:$8 sps:$4 sm:$0xff]   ;;  %v7524_v27 = vld [vmem:[%s7772_s1 + $0x2c4] ss:$8 sps:$4 sm:$0xff]  }
 0x165   : > { %2903 = vmatprep.subr.bf16.mxu1 %v7461_v28  ;;  %v7527_v28 = vld [vmem:[%s7777_s0 + $0x264] ss:$8 sps:$4 sm:$0xff]  }
 0x167   : > { %2206 = vmatpush1.bf16.msra.mxu0 %v7456_v30  ;;  %v7522_v30 = vld [vmem:[%s7772_s1 + $0x2c0] ss:$8 sps:$4 sm:$0xff]  }
 0x168   : > { %2904 = vmatpush1.bf16.msra.mxu1 %v7459_v31  ;;  %2207 = vmatprep.subr.bf16.mxu0 %v7464_v33  ;;  %v8137_v31 = vsub.s32 4, %v7968_v17  ;;  %v7525_v33 = vld [vmem:[%s7777_s0 + $0x260] ss:$8 sps:$4 sm:$0xff]  }
 0x169   : > { %2905 = vmatprep.subr.bf16.mxu1 %v7467_v34  ;;  %v7530_v34 = vld [vmem:[%s7772_s1 + $0x2d4] ss:$8 sps:$4 sm:$0xff]  }
 0x16b   : > { %2208 = vmatpush1.bf16.msra.mxu0 %v7462_v35  ;;  %v7533_v35 = vld [vmem:[%s7777_s0 + $0x274] ss:$8 sps:$4 sm:$0xff]  }
 0x16c   : > { %2906 = vmatpush1.bf16.msra.mxu1 %v7465_v36  ;;  %2209 = vmatprep.subr.bf16.mxu0 %v7470_v37  ;;  %v7528_v36 = vld [vmem:[%s7772_s1 + $0x2d0] ss:$8 sps:$4 sm:$0xff]   ;;  %v864_v37 = vrot.slane %v7974_v19, %v8137_v31  ;;  %v7545_v19 = vld [vmem:[%s7777_s0 + $0x294] ss:$8 sps:$4 sm:$0xff]  }
 0x16d   : > { %2907 = vmatprep.subr.bf16.mxu1 %v7473_v38  ;;  %v7531_v38 = vld [vmem:[%s7777_s0 + $0x270] ss:$8 sps:$4 sm:$0xff]  }
 0x16f   : > { %2210 = vmatpush1.bf16.msra.mxu0 %v7468_v39  ;;  %v7536_v39 = vld [vmem:[%s7772_s1 + $0x2e4] ss:$8 sps:$4 sm:$0xff]  }
 0x170   : > { %2908 = vmatpush1.bf16.msra.mxu1 %v7471_v43  ;;  %2211 = vmatprep.subr.bf16.mxu0 %v7476_v45  ;;  %v7534_v43 = vld [vmem:[%s7772_s1 + $0x2e0] ss:$8 sps:$4 sm:$0xff]   ;;  %v1386_v45 = vadd.f32 %v8011_v62, %v864_v37 }
 0x171   : > { %2909 = vmatprep.subr.bf16.mxu1 %v7479_v46  ;;  %v7537_v46 = vld [vmem:[%s7777_s0 + $0x280] ss:$8 sps:$4 sm:$0xff]  }
 0x172   : > { %v7564_v62 = vld [vmem:[%s7795_s3] sm:$0xff]  }
 0x173   : > { %2212 = vmatpush1.bf16.msra.mxu0 %v7474_v51  ;;  %v1519_v51 = vmax.f32 %v1386_v45, 0.0 }
 0x174   : > { %2910 = vmatpush1.bf16.msra.mxu1 %v7477_v52  ;;  %2213 = vmatprep.subr.bf16.mxu0 %v7482_v53  ;;  %v7543_v52 = vld [vmem:[%s7777_s0 + $0x290] ss:$8 sps:$4 sm:$0xff]   ;;  %v7548_v53 = vld [vmem:[%s7777_s0 + $0x2a4] ss:$8 sps:$4 sm:$0xff]  }
 0x175   : > { %2911 = vmatprep.subr.bf16.mxu1 %v7485_v54  ;;  %v1627_v54 = vpack.c.bf16 %v1519_v51, %v1519_v51  ;;  %v2348_v51 = vld [vmem:[%s9457_s18] sm:$0x3] }
 0x177   : > { %2214 = vmatpush1.bf16.msra.mxu0 %v7480_v32  ;;  %v7565_v32 = vld [vmem:[%s7795_s3 + $0x8] sm:$0xff]  }
 0x178   : > { %2912 = vmatpush1.bf16.msra.mxu1 %v7483_v44  ;;  %2215 = vmatprep.subr.bf16.mxu0 %v7488_v58  ;;  %v7549_v44 = vld [vmem:[%s7777_s0 + $0x2b0] ss:$8 sps:$4 sm:$0xff]   ;;  %v7554_v58 = vld [vmem:[%s7777_s0 + $0x2c4] ss:$8 sps:$4 sm:$0xff]  }
 0x179   : > { %2922 = vmatprep.subr.bf16.mxu1 %v7491_v59  ;;  %v7566_v59 = vld [vmem:[%s7795_s3 + $0x10] sm:$0xff]  }
 0x17b   : > { %2914 = vmatmul.mubr.bf16.vlgmr.msra.gmra.mrb[12].mxu1 %v2344_v61  ;;  %2216 = vmatpush1.bf16.msra.mxu0 %v7486_v63  ;;  %v7557_v61 = vld [vmem:[%s7777_s0 + $0x2d4] ss:$8 sps:$4 sm:$0xff]  }
 0x17c   : > { %2923 = vmatpush1.bf16.msra.mxu1 %v7489_v41  ;;  %2217 = vmatprep.subr.bf16.mxu0 %v7494_v0  ;;  %v7567_v63 = vld [vmem:[%s7795_s3 + $0x18] sm:$0xff]   ;;  %v7560_v0 = vld [vmem:[%s7777_s0 + $0x2e4] ss:$8 sps:$4 sm:$0xff]  }
 0x17d   : > { %2924 = vmatprep.subr.bf16.mxu1 %v7497_v1  ;;  %2954 = vmatprep.mubr.bf16.mxu1 %v2347_v4  ;;  %v7555_v41 = vld [vmem:[%s7777_s0 + $0x2d0] ss:$8 sps:$4 sm:$0xff]   ;;  %v7568_v1 = vld [vmem:[%s7795_s3 + $0x20] sm:$0xff]  }
 0x17e   : > { %v7558_v4 = vld [vmem:[%s7777_s0 + $0x2e0] ss:$8 sps:$4 sm:$0xff]  }
 0x17f   : > { %2218 = vmatpush1.bf16.msra.mxu0 %v7492_v5  ;;  %v7563_v5 = vld [vmem:[%s7777_s0 + $0x2f4] ss:$8 sps:$4 sm:$0xff]  }
 0x180   : > { %2925 = vmatpush1.bf16.msra.mxu1 %v7495_v6  ;;  %2219 = vmatprep.subr.bf16.mxu0 %v7500_v7  ;;  %v7569_v6 = vld [vmem:[%s7795_s3 + $0x28] sm:$0xff]   ;;  %v7561_v7 = vld [vmem:[%s7777_s0 + $0x2f0] ss:$8 sps:$4 sm:$0xff]   ;;  %s9462_s0 = sld [smem:[#allocation15_spill]] (!%p6402_p5) }
 0x181   : > { %2926 = vmatprep.subr.bf16.mxu1 %v7503_v8  ;;  %v1525_v8 = vmax.f32 %v8046_v40, 0.0  ;;  %v7573_v40 = vld [vmem:[%s7800_s20 + $0x8] sm:$0xff]  }
 0x183   : > { %2220 = vmatpush1.bf16.msra.mxu0 %v7498_v9  ;;  %v7570_v9 = vld [vmem:[%s7795_s3 + $0x30] sm:$0xff]  }
 0x184   : > { %2927 = vmatpush1.bf16.msra.mxu1 %v7501_v10  ;;  %2221 = vmatprep.subr.bf16.mxu0 %v7506_v11  ;;  %v7571_v10 = vld [vmem:[%s7800_s20] sm:$0xff]   ;;  %v2346_v11 = vpack.c.bf16 %v1525_v8, %v1525_v8  ;;  %v3281_v8 = vld [vmem:[%s9458_s22 + $0x28] sm:$0xff] }
 0x185   : > { %2928 = vmatprep.subr.bf16.mxu1 %v7509_v12  ;;  %v7572_v12 = vld [vmem:[%s7795_s3 + $0x38] sm:$0xff]  }
 0x187   : > { %2222 = vmatpush1.bf16.msra.mxu0 %v7504_v13  ;;  %v7574_v13 = vld [vmem:[%s7795_s3 + $0x40] sm:$0xff]  }
 0x188   : > { %2929 = vmatpush1.bf16.msra.mxu1 %v7507_v14  ;;  %2223 = vmatprep.subr.bf16.mxu0 %v7512_v15  ;;  %v7575_v14 = vld [vmem:[%s7800_s20 + $0x10] sm:$0xff]   ;;  %v7576_v15 = vld [vmem:[%s7795_s3 + $0x48] sm:$0xff]  }
 0x189   : > { %2930 = vmatprep.subr.bf16.mxu1 %v7515_v2  ;;  %v7577_v2 = vld [vmem:[%s7800_s20 + $0x18] sm:$0xff]  }
 0x18b   : > { %2224 = vmatpush1.bf16.msra.mxu0 %v7510_v16  ;;  %v7578_v16 = vld [vmem:[%s7795_s3 + $0x50] sm:$0xff]  }
 0x18c   : > { %2931 = vmatpush1.bf16.msra.mxu1 %v7513_v22  ;;  %2225 = vmatprep.subr.bf16.mxu0 %v7518_v26  ;;  %v7579_v22 = vld [vmem:[%s7800_s20 + $0x20] sm:$0xff]   ;;  %v7580_v26 = vld [vmem:[%s7795_s3 + $0x58] sm:$0xff]   ;;  %s9461_s3 = sld [smem:[#allocation16_spill]] (!%p6402_p5) }
 0x18d   : > { %2932 = vmatprep.subr.bf16.mxu1 %v7521_v23  ;;  %v7581_v23 = vld [vmem:[%s7800_s20 + $0x28] sm:$0xff]  }
 0x18f   : > { %2226 = vmatpush1.bf16.msra.mxu0 %v7516_v24  ;;  %v7582_v24 = vld [vmem:[%s7800_s20 + $0x30] sm:$0xff]  }
 0x190   : > { %2933 = vmatpush1.bf16.msra.mxu1 %v7519_v25  ;;  %2227 = vmatprep.subr.bf16.mxu0 %v7524_v27  ;;  %v7583_v25 = vld [vmem:[%s7800_s20 + $0x38] sm:$0xff]   ;;  %v7584_v27 = vld [vmem:[%s7800_s20 + $0x40] sm:$0xff]  }
 0x191   : > { %2934 = vmatprep.subr.bf16.mxu1 %v7527_v28  ;;  %v7585_v28 = vld [vmem:[%s7800_s20 + $0x48] sm:$0xff]  }
 0x193   : > { %2228 = vmatpush1.bf16.msra.mxu0 %v7522_v30  ;;  %v7586_v30 = vld [vmem:[%s7800_s20 + $0x50] sm:$0xff]  }
 0x194   : > { %2935 = vmatpush1.bf16.msra.mxu1 %v7525_v33  ;;  %2229 = vmatprep.subr.bf16.mxu0 %v7530_v34  ;;  %v7587_v33 = vld [vmem:[%s7800_s20 + $0x58] sm:$0xff]   ;;  %v1629_v34 = vld [vmem:[%s9456_s25] sm:$0x3]  ;;  %s9459_s25 = sld [smem:[#allocation12_spill]] }
 0x195   : > { %2936 = vmatprep.subr.bf16.mxu1 %v7533_v35  ;;  %v1634_v35 = vrot.slane %v1629_v34, %v7971_v18 }
 0x197   : > { %2230 = vmatpush1.bf16.msra.mxu0 %v7528_v36  ;;  %v1638_v36 = vrot.slane %v1629_v34, %v7977_v20  ;;  %v3556_v34 = vld [vmem:[%s7806_s27 + $0x100] sm:$0xff] }
 0x198   : > { %2937 = vmatpush1.bf16.msra.mxu1 %v7531_v38  ;;  %2231 = vmatprep.subr.bf16.mxu0 %v7536_v39 }
 0x199   : > { %2938 = vmatprep.subr.bf16.mxu1 %v7539_v42 }
 0x19b   : > { %2232 = vmatpush1.bf16.msra.mxu0 %v7534_v43 }
 0x19c   : > { %2939 = vmatpush1.bf16.msra.mxu1 %v7537_v46  ;;  %2233 = vmatprep.subr.bf16.mxu0 %v7542_v47 }
 0x19d   : > { %2940 = vmatprep.subr.bf16.mxu1 %v7545_v19 }
 0x19f   : > { %2234 = vmatpush1.bf16.msra.mxu0 %v7540_v49 }
 0x1a0   : > { %2941 = vmatpush1.bf16.msra.mxu1 %v7543_v52  ;;  %3074 = vmatprep.subr.bf16.mxu0 %v7628_v3  ;;  %v2353_v52 = vrot.slane %v2348_v51, %v7971_v18 }
 0x1a1   : > { %2942 = vmatprep.subr.bf16.mxu1 %v7548_v53  ;;  %v2357_v53 = vrot.slane %v2348_v51, %v7977_v20  ;;  %v3612_v51 = vld [vmem:[%s7806_s27 + $0x2c0] sm:$0xff] }
 0x1a2   : > { %2236 = vmatmul.mubr.bf16.vlgmr.msra.gmra.mrb[12].mxu0 %v1627_v54 }
 0x1a3   : > { %3075 = vmatpush1.bf16.msra.mxu0 %v7564_v62 }
 0x1a4   : > { %2943 = vmatpush1.bf16.msra.mxu1 %v7546_v55  ;;  %3076 = vmatprep.subr.bf16.mxu0 %v7628_v3 }
 0x1a5   : > { %2944 = vmatprep.subr.bf16.mxu1 %v7551_v56 }
 0x1a7   : > { %3077 = vmatpush1.bf16.msra.mxu0 %v7565_v32 }
 0x1a8   : > { %2945 = vmatpush1.bf16.msra.mxu1 %v7549_v44  ;;  %3078 = vmatprep.subr.bf16.mxu0 %v7628_v3 }
 0x1a9   : > { %2946 = vmatprep.subr.bf16.mxu1 %v7554_v58 }
 0x1ab   : > { %3079 = vmatpush1.bf16.msra.mxu0 %v7566_v59 }
 0x1ac   : > { %2947 = vmatpush1.bf16.msra.mxu1 %v7552_v60  ;;  %3080 = vmatprep.subr.bf16.mxu0 %v7628_v3 }
 0x1ad   : > { %2948 = vmatprep.subr.bf16.mxu1 %v7557_v61 }
 0x1af   : > { %3081 = vmatpush1.bf16.msra.mxu0 %v7567_v63  ;;  %v3276_v63 = vld [vmem:[%s9458_s22] sm:$0xff] }
 0x1b0   : > { %2949 = vmatpush1.bf16.msra.mxu1 %v7555_v41  ;;  %3082 = vmatprep.subr.bf16.mxu0 %v7628_v3  ;;  %v3277_v41 = vld [vmem:[%s9458_s22 + $0x8] sm:$0xff] }
 0x1b1   : > { %2950 = vmatprep.subr.bf16.mxu1 %v7560_v0  ;;  %v3278_v0 = vld [vmem:[%s9458_s22 + $0x10] sm:$0xff] }
 0x1b3   : > { %3083 = vmatpush1.bf16.msra.mxu0 %v7568_v1  ;;  %v7629_v1 = vmov 0.0|0.0  }
 0x1b4   : > { %2951 = vmatpush1.bf16.msra.mxu1 %v7558_v4  ;;  %3084 = vmatprep.subr.bf16.mxu0 %v7628_v3  ;;  %v6810_v4 = vpack.c.bf16 %v3277_v41, %v3276_v63 }
 0x1b5   : > { %2952 = vmatprep.subr.bf16.mxu1 %v7563_v5  ;;  %v3279_v5 = vld [vmem:[%s9458_s22 + $0x18] sm:$0xff] }
 0x1b7   : > { %3085 = vmatpush1.bf16.msra.mxu0 %v7569_v6  ;;  %v6813_v6 = vpack.c.bf16 %v3279_v5, %v3278_v0  ;;  %v6257_v0 = vld [vmem:[%s752_s12] ss:$0 sm:$0xff]  ;;  %v3265_v5 = vld [vmem:[%s9459_s25 + $0x8] sm:$0xff] }
 0x1b8   : > { %2953 = vmatpush1.bf16.msra.mxu1 %v7561_v7  ;;  %3086 = vmatprep.subr.bf16.mxu0 %v7628_v3  ;;  %v3280_v7 = vld [vmem:[%s9458_s22 + $0x20] sm:$0xff] }
 0x1b9   : > { %3223 = vmatprep.subr.bf16.mxu1 %v7628_v3 }
 0x1bb   : > { %2955 = vmatmul.mubr.bf16.vlgmr.msra.gmra.mrb[12].mxu1 %v2346_v11  ;;  %3087 = vmatpush1.bf16.msra.mxu0 %v7570_v9  ;;  %v6816_v9 = vpack.c.bf16 %v3281_v8, %v3280_v7  ;;  %v3283_v11 = vld [vmem:[%s9458_s22 + $0x38] sm:$0xff] }
 0x1bc   : > { %3224 = vmatpush1.bf16.msra.mxu1 %v7571_v10  ;;  %3088 = vmatprep.subr.bf16.mxu0 %v7628_v3  ;;  %v3282_v10 = vld [vmem:[%s9458_s22 + $0x30] sm:$0xff] }
 0x1bd   : > { %3225 = vmatprep.subr.bf16.mxu1 %v7628_v3 }
 0x1bf   : > { %3089 = vmatpush1.bf16.msra.mxu0 %v7572_v12  ;;  %v6819_v12 = vpack.c.bf16 %v3283_v11, %v3282_v10 }
 0x1c0   : > { %3226 = vmatpush1.bf16.msra.mxu1 %v7573_v40  ;;  %3090 = vmatprep.subr.bf16.mxu0 %v7628_v3  ;;  %v3284_v40 = vld [vmem:[%s9458_s22 + $0x40] sm:$0xff] }
 0x1c1   : > { %3227 = vmatprep.subr.bf16.mxu1 %v7628_v3 }
 0x1c3   : > { %3091 = vmatpush1.bf16.msra.mxu0 %v7574_v13  ;;  %v3285_v13 = vld [vmem:[%s9458_s22 + $0x48] sm:$0xff] }
 0x1c4   : > { %3228 = vmatpush1.bf16.msra.mxu1 %v7575_v14  ;;  %3092 = vmatprep.subr.bf16.mxu0 %v7628_v3  ;;  %v6822_v14 = vpack.c.bf16 %v3285_v13, %v3284_v40  ;;  %v3266_v40 = vld [vmem:[%s9459_s25 + $0x10] sm:$0xff]  ;;  %v3267_v13 = vld [vmem:[%s9459_s25 + $0x18] sm:$0xff] }
 0x1c5   : > { %3229 = vmatprep.subr.bf16.mxu1 %v7628_v3 }
 0x1c7   : > { %3093 = vmatpush1.bf16.msra.mxu0 %v7576_v15  ;;  %v3286_v15 = vld [vmem:[%s9458_s22 + $0x50] sm:$0xff] }
 0x1c8   : > { %3230 = vmatpush1.bf16.msra.mxu1 %v7577_v2  ;;  %3094 = vmatprep.subr.bf16.mxu0 %v7628_v3  ;;  %v3287_v2 = vld [vmem:[%s9458_s22 + $0x58] sm:$0xff] }
 0x1c9   : > { %3231 = vmatprep.subr.bf16.mxu1 %v7628_v3 }
 0x1cb   : > { %3095 = vmatpush1.bf16.msra.mxu0 %v7578_v16  ;;  %v6825_v16 = vpack.c.bf16 %v3287_v2, %v3286_v15  ;;  %v3268_v15 = vld [vmem:[%s9459_s25 + $0x20] sm:$0xff]  ;;  %v3269_v2 = vld [vmem:[%s9459_s25 + $0x28] sm:$0xff] }
 0x1cc   : > { %3232 = vmatpush1.bf16.msra.mxu1 %v7579_v22  ;;  %3096 = vmatprep.subr.bf16.mxu0 %v7628_v3  ;;  %v7631_v22 = vmov 0.0  }
 0x1cd   : > { %3233 = vmatprep.subr.bf16.mxu1 %v7628_v3 }
 0x1cf   : > { %3097 = vmatpush1.bf16.msra.mxu0 %v7580_v26  ;;  %v3524_v26 = vld [vmem:[%s7806_s27] sm:$0xff] }
 0x1d0   : > { %3234 = vmatpush1.bf16.msra.mxu1 %v7581_v23  ;;  %6809 = vmatprep.subr.bf16.mxu0 %v7629_v1  ;;  %v3532_v23 = vld [vmem:[%s7806_s27 + $0x40] sm:$0xff] }
 0x1d1   : > { %3235 = vmatprep.subr.bf16.mxu1 %v7628_v3 }
 0x1d4   : > { %3236 = vmatpush1.bf16.msra.mxu1 %v7582_v24  ;;  %v6274_v24 = vcombine.low %v3524_v26, %v3532_v23 }
 0x1d5   : > { %3237 = vmatprep.subr.bf16.mxu1 %v7628_v3 }
 0x1d8   : > { %3238 = vmatpush1.bf16.msra.mxu1 %v7583_v25  ;;  %v6275_v25 = vcombine.high %v3524_v26, %v3532_v23  ;;  %v3270_v26 = vld [vmem:[%s9459_s25 + $0x30] sm:$0xff]  ;;  %v3271_v23 = vld [vmem:[%s9459_s25 + $0x38] sm:$0xff] }
 0x1d9   : > { %3239 = vmatprep.subr.bf16.mxu1 %v7628_v3 }
 0x1dc   : > { %3240 = vmatpush1.bf16.msra.mxu1 %v7584_v27  ;;  %v3540_v27 = vld [vmem:[%s7806_s27 + $0x80] sm:$0xff] }
 0x1dd   : > { %3241 = vmatprep.subr.bf16.mxu1 %v7628_v3 }
 0x1e0   : > { %3242 = vmatpush1.bf16.msra.mxu1 %v7585_v28  ;;  %v3548_v28 = vld [vmem:[%s7806_s27 + $0xc0] sm:$0xff] }
 0x1e1   : > { %3243 = vmatprep.subr.bf16.mxu1 %v7628_v3 }
 0x1e4   : > { %3244 = vmatpush1.bf16.msra.mxu1 %v7586_v30  ;;  %v6291_v30 = vcombine.high %v3540_v27, %v3548_v28 }
 0x1e5   : > { %3245 = vmatprep.subr.bf16.mxu1 %v7628_v3 }
 0x1e8   : > { %3246 = vmatpush1.bf16.msra.mxu1 %v7587_v33  ;;  %v6290_v33 = vcombine.low %v3540_v27, %v3548_v28  ;;  %v3273_v27 = vld [vmem:[%s9459_s25 + $0x48] sm:$0xff] }
 0x1e9   : > { %4293 = vmatprep.subr.bf16.mxu1 %v6275_v25  ;;  %v3272_v25 = vld [vmem:[%s9459_s25 + $0x40] sm:$0xff] }
 0x1ea   : > { %v6840_v28 = vpack.c.bf16 %v3273_v27, %v3272_v25  ;;  %v3639_v27 = vld [vmem:[%s7806_s27 + $0x398] sm:$0xff] }
 0x275   : > { %v2237_v37 = vpop.f32.mrb[12].mxu0 }
 0x276   : > { %v7119_v38 = vadd.f32 %v2237_v37, %v1634_v35  ;;  %v2239_v39 = vpop.f32.mrb[13].mxu0  ;;  %v3564_v35 = vld [vmem:[%s7806_s27 + $0x140] sm:$0xff] }
 0x277   : > { %v7120_v42 = vadd.f32 %v2239_v39, %v1638_v36  ;;  %v2241_v43 = vpop.f32.mrb[14].mxu0  ;;  %v6307_v36 = vcombine.high %v3556_v34, %v3564_v35  ;;  %v6306_v37 = vcombine.low %v3556_v34, %v3564_v35  ;;  %v3580_v39 = vld [vmem:[%s7806_s27 + $0x1c0] sm:$0xff] }
 0x278   : > { %v2244_v45 = vmax.f32 %v7119_v38, 0.0  ;;  %v2242_v46 = vpop.f32.mrb[15].mxu0  ;;  %v3572_v38 = vld [vmem:[%s7806_s27 + $0x180] sm:$0xff] }
 0x279   : > { %v2245_v47 = vmax.f32 %v7120_v42, 0.0  ;;  %v6323_v42 = vcombine.high %v3572_v38, %v3580_v39  ;;  %v6322_v43 = vcombine.low %v3572_v38, %v3580_v39  ;;  %v3596_v46 = vld [vmem:[%s7806_s27 + $0x240] sm:$0xff]  ;;  %v3435_v38 = vld [vmem:[%s9460_s26 + $0x8] sm:$0xff] }
 0x27a   : > { %v2989_v49 = vpack.c.bf16 %v2244_v45, %v2244_v45  ;;  %v3588_v45 = vld [vmem:[%s7806_s27 + $0x200] sm:$0xff] }
 0x27b   : > { %v2990_v19 = vpack.c.bf16 %v2245_v47, %v2245_v47  ;;  %v6339_v47 = vcombine.high %v3588_v45, %v3596_v46  ;;  %v6243_v34 = vld [vmem:[%s744_s13] ss:$0 sm:$0xff] }
 0x27d   : > { %6256 = vmatprep.mubr.msk.bf16.mxu0 %vm3070_vm1, %v2990_v19  ;;  %v6338_v19 = vcombine.low %v3588_v45, %v3596_v46  ;;  %v3437_v45 = vld [vmem:[%s9460_s26 + $0x18] sm:$0xff] }
 0x27e   : > { %3107 = vmatmul.mubr.bf16.vlgmr.msra.gmra.mrb[16].mxu0 %v2989_v49  ;;  %v3604_v49 = vld [vmem:[%s7806_s27 + $0x280] sm:$0xff] }
 0x27f   : > { %6811 = vmatpush3.bf16.msra.mxu0 %v6810_v4  ;;  %6752 = vmatprep.mubr.msk.f32.mxu0 %vm7630_vm2, %v7631_v22  ;;  %v3264_v4 = vld [vmem:[%s9459_s25] sm:$0xff] }
 0x280   : > { %6812 = vmatprep.subr.bf16.mxu0 %v7629_v1  ;;  %v6828_v10 = vpack.c.bf16 %v3265_v5, %v3264_v4  ;;  %v3567_v4 = vld [vmem:[%s7806_s27 + $0x158] sm:$0xff]  ;;  %v7588_v5 = vld [vmem:[%s9455_s11] sm:$0x3] }
 0x283   : > { %6814 = vmatpush3.bf16.msra.mxu0 %v6813_v6 }
 0x284   : > { %6815 = vmatprep.subr.bf16.mxu0 %v7629_v1 }
 0x287   : > { %6817 = vmatpush3.bf16.msra.mxu0 %v6816_v9 }
 0x288   : > { %6818 = vmatprep.subr.bf16.mxu0 %v7629_v1 }
 0x28b   : > { %6820 = vmatpush3.bf16.msra.mxu0 %v6819_v12 }
 0x28c   : > { %6821 = vmatprep.subr.bf16.mxu0 %v7629_v1 }
 0x28e   : > { %v2956_v62 = vpop.f32.mrb[12].mxu1 }
 0x28f   : > { %v7121_v54 = vadd.f32 %v2956_v62, %v2353_v52  ;;  %v2958_v55 = vpop.f32.mrb[13].mxu1  ;;  %6823 = vmatpush3.bf16.msra.mxu0 %v6822_v14  ;;  %v6355_v52 = vcombine.high %v3604_v49, %v3612_v51  ;;  %v3620_v62 = vld [vmem:[%s7806_s27 + $0x300] sm:$0xff]  ;;  %v6831_v14 = vpack.c.bf16 %v3267_v13, %v3266_v40 }
 0x290   : > { %v7122_v56 = vadd.f32 %v2958_v55, %v2357_v53  ;;  %v2960_v32 = vpop.f32.mrb[14].mxu1  ;;  %6824 = vmatprep.subr.bf16.mxu0 %v7629_v1  ;;  %v6354_v53 = vcombine.low %v3604_v49, %v3612_v51  ;;  %v3441_v51 = vld [vmem:[%s9460_s26 + $0x38] sm:$0xff] }
 0x291   : > { %v2963_v44 = vmax.f32 %v7121_v54, 0.0  ;;  %v2961_v58 = vpop.f32.mrb[15].mxu1  ;;  %v3628_v54 = vld [vmem:[%s7806_s27 + $0x340] sm:$0xff] }
 0x292   : > { %v2964_v59 = vmax.f32 %v7122_v56, 0.0  ;;  %v6371_v55 = vcombine.high %v3620_v62, %v3628_v54  ;;  %v6370_v56 = vcombine.low %v3620_v62, %v3628_v54  ;;  %v3636_v32 = vld [vmem:[%s7806_s27 + $0x380] sm:$0xff]  ;;  %v3443_v62 = vld [vmem:[%s9460_s26 + $0x48] sm:$0xff] }
 0x293   : > { %v3139_v61 = vpack.c.bf16 %v2963_v44, %v2963_v44  ;;  %6826 = vmatpush3.bf16.msra.mxu0 %v6825_v16  ;;  %v3644_v44 = vld [vmem:[%s7806_s27 + $0x3c0] sm:$0xff]  ;;  %v6834_v16 = vpack.c.bf16 %v3269_v2, %v3268_v15  ;;  %v3615_v15 = vld [vmem:[%s7806_s27 + $0x2d8] sm:$0xff] }
 0x294   : > { %v3140_v60 = vpack.c.bf16 %v2964_v59, %v2964_v59  ;;  %6827 = vmatprep.subr.bf16.mxu0 %v7629_v1  ;;  %v6387_v58 = vcombine.high %v3636_v32, %v3644_v44  ;;  %v6386_v59 = vcombine.low %v3636_v32, %v3644_v44  ;;  %v3527_v32 = vld [vmem:[%s7806_s27 + $0x18] sm:$0xff] }
 0x295   : > { %v3535_v44 = vld [vmem:[%s7806_s27 + $0x58] sm:$0xff] }
 0x296   : > { %6270 = vmatprep.mubr.msk.bf16.mxu1 %vm3070_vm1, %v3140_v60 }
 0x297   : > { %3256 = vmatmul.mubr.bf16.vlgmr.msra.gmra.mrb[16].mxu1 %v3139_v61 }
 0x298   : > { %4325 = vmatprep.mubr.bf16.mxu1 %v7628_v3  ;;  %4294 = vmatpush1.bf16.msra.mxu1 %v6274_v24  ;;  %v6837_v24 = vpack.c.bf16 %v3271_v23, %v3270_v26  ;;  %v3623_v26 = vld [vmem:[%s7806_s27 + $0x318] sm:$0xff] }
 0x299   : > { %4295 = vmatprep.subr.bf16.mxu1 %v6291_v30  ;;  %v3274_v30 = vld [vmem:[%s9459_s25 + $0x50] sm:$0xff]  ;;  %v3631_v23 = vld [vmem:[%s7806_s27 + $0x358] sm:$0xff] }
 0x29a   : > { %v6377_v25 = vcombine.high %v3623_v26, %v3631_v23 }
 0x29c   : > { %4296 = vmatpush1.bf16.msra.mxu1 %v6290_v33  ;;  %v3275_v33 = vld [vmem:[%s9459_s25 + $0x58] sm:$0xff] }
 0x29d   : > { %4297 = vmatprep.subr.bf16.mxu1 %v6307_v36  ;;  %v6843_v35 = vpack.c.bf16 %v3275_v33, %v3274_v30  ;;  %v6376_v30 = vcombine.low %v3623_v26, %v3631_v23 }
 0x2a0   : > { %4298 = vmatpush1.bf16.msra.mxu1 %v6306_v37  ;;  %v3434_v37 = vld [vmem:[%s9460_s26] sm:$0xff] }
 0x2a1   : > { %4299 = vmatprep.subr.bf16.mxu1 %v6323_v42  ;;  %v6846_v39 = vpack.c.bf16 %v3435_v38, %v3434_v37  ;;  %v3529_v37 = vld [vmem:[%s7806_s27 + $0x28] sm:$0xff] }
 0x2a4   : > { %4300 = vmatpush1.bf16.msra.mxu1 %v6322_v43  ;;  %v3436_v43 = vld [vmem:[%s9460_s26 + $0x10] sm:$0xff] }
 0x2a5   : > { %4301 = vmatprep.subr.bf16.mxu1 %v6339_v47  ;;  %v6849_v46 = vpack.c.bf16 %v3437_v45, %v3436_v43  ;;  %v3438_v47 = vld [vmem:[%s9460_s26 + $0x20] sm:$0xff] }
 0x2a8   : > { %4302 = vmatpush1.bf16.msra.mxu1 %v6338_v19  ;;  %v3439_v19 = vld [vmem:[%s9460_s26 + $0x28] sm:$0xff] }
 0x2a9   : > { %4303 = vmatprep.subr.bf16.mxu1 %v6355_v52  ;;  %v6852_v49 = vpack.c.bf16 %v3439_v19, %v3438_v47  ;;  %v3549_v47 = vld [vmem:[%s7806_s27 + $0xc8] sm:$0xff] }
 0x2aa   : > { %v3545_v19 = vld [vmem:[%s7806_s27 + $0xa8] sm:$0xff] }
 0x2ac   : > { %4304 = vmatpush1.bf16.msra.mxu1 %v6354_v53  ;;  %v3442_v53 = vld [vmem:[%s9460_s26 + $0x40] sm:$0xff] }
 0x2ad   : > { %4305 = vmatprep.subr.bf16.mxu1 %v6371_v55  ;;  %v6858_v54 = vpack.c.bf16 %v3443_v62, %v3442_v53  ;;  %v3444_v55 = vld [vmem:[%s9460_s26 + $0x50] sm:$0xff] }
 0x2b0   : > { %4306 = vmatpush1.bf16.msra.mxu1 %v6370_v56  ;;  %v3445_v56 = vld [vmem:[%s9460_s26 + $0x58] sm:$0xff] }
 0x2b1   : > { %4307 = vmatprep.subr.bf16.mxu1 %v6387_v58  ;;  %v6861_v58 = vpack.c.bf16 %v3445_v56, %v3444_v55  ;;  %v3565_v55 = vld [vmem:[%s7806_s27 + $0x148] sm:$0xff] }
 0x2b2   : > { %v3561_v56 = vld [vmem:[%s7806_s27 + $0x128] sm:$0xff] }
 0x2b4   : > { %4308 = vmatpush1.bf16.msra.mxu1 %v6386_v59  ;;  %v6281_v59 = vcombine.high %v3527_v32, %v3535_v44 }
 0x351   : > { %v3108_v60 = vpop.f32.mrb[16].mxu0 }
 0x352   : > { %v3110_v61 = vpop.f32.mrb[17].mxu0  ;;  %v3109_v36 = vadd.f32 %v6243_v34, %v3108_v60  ;;  %v3543_v60 = vld [vmem:[%s7806_s27 + $0x98] sm:$0xff] }
 0x353   : > { %v3111_v63 = vpop.f32.mrb[18].mxu0  ;;  %v3551_v61 = vld [vmem:[%s7806_s27 + $0xd8] sm:$0xff] }
 0x354   : > { %v3112_v41 = vpop.f32.mrb[19].mxu0  ;;  %v3114_v42 = vmax.f32 %v3109_v36, 0.0  ;;  %v6280_v63 = vcombine.low %v3527_v32, %v3535_v44  ;;  %v3533_v36 = vld [vmem:[%s7806_s27 + $0x48] sm:$0xff] }
 0x355   : > { %v6297_v41 = vcombine.high %v3543_v60, %v3551_v61  ;;  %v3569_v32 = vld [vmem:[%s7806_s27 + $0x168] sm:$0xff] }
 0x36a   : > { %v3257_v6 = vpop.f32.mrb[16].mxu1 }
 0x36b   : > { %v3258_v7 = vadd.f32 %v6257_v0, %v3257_v6  ;;  %v3259_v8 = vpop.f32.mrb[17].mxu1  ;;  %v3559_v0 = vld [vmem:[%s7806_s27 + $0x118] sm:$0xff]  ;;  %v6296_v6 = vcombine.low %v3543_v60, %v3551_v61  ;;  %v6317_v60 = vcombine.high %v3561_v56, %v3569_v32  ;;  %v3573_v61 = vld [vmem:[%s7806_s27 + $0x188] sm:$0xff] }
 0x36c   : > { %v3260_v9 = vpop.f32.mrb[18].mxu1  ;;  %v3583_v8 = vld [vmem:[%s7806_s27 + $0x1d8] sm:$0xff] }
 0x36d   : > { %v3263_v11 = vmax.f32 %v3258_v7, 0.0  ;;  %v3261_v12 = vpop.f32.mrb[19].mxu1  ;;  %v3575_v7 = vld [vmem:[%s7806_s27 + $0x198] sm:$0xff]  ;;  %v6312_v9 = vcombine.low %v3559_v0, %v3567_v4 }
 0x36e   : > { %v3599_v12 = vld [vmem:[%s7806_s27 + $0x258] sm:$0xff]  ;;  %v6328_v40 = vcombine.low %v3575_v7, %v3583_v8 }
 0x36f   : > { %6753 = vmatmul.mubr.msk.f32.vlgmr.msra.gmra.mrb[20].mxu0 %vm1265_vm0, %v3263_v11  ;;  %v3591_v11 = vld [vmem:[%s7806_s27 + $0x218] sm:$0xff] }
 0x370   : > { %6829 = vmatpush3.bf16.msra.mxu0 %v6828_v10  ;;  %6779 = vmatprep.mubr.msk.f32.mxu0 %vm7630_vm2, %v7631_v22  ;;  %v6329_v10 = vcombine.high %v3575_v7, %v3583_v8  ;;  %v6345_v13 = vcombine.high %v3591_v11, %v3599_v12  ;;  %v6344_v2 = vcombine.low %v3591_v11, %v3599_v12  ;;  %v3589_v7 = vld [vmem:[%s7806_s27 + $0x208] sm:$0xff] }
 0x371   : > { %6830 = vmatprep.subr.bf16.mxu0 %v7629_v1  ;;  %v3597_v8 = vld [vmem:[%s7806_s27 + $0x248] sm:$0xff] }
 0x372   : > { %v6340_v26 = vcombine.low %v3589_v7, %v3597_v8 }
 0x374   : > { %6832 = vmatpush3.bf16.msra.mxu0 %v6831_v14  ;;  %v3607_v14 = vld [vmem:[%s7806_s27 + $0x298] sm:$0xff] }
 0x375   : > { %6833 = vmatprep.subr.bf16.mxu0 %v7629_v1 }
 0x378   : > { %6835 = vmatpush3.bf16.msra.mxu0 %v6834_v16  ;;  %v6361_v16 = vcombine.high %v3607_v14, %v3615_v15 }
 0x379   : > { %6836 = vmatprep.subr.bf16.mxu0 %v7629_v1 }
 0x37c   : > { %6838 = vmatpush3.bf16.msra.mxu0 %v6837_v24  ;;  %v6360_v24 = vcombine.low %v3607_v14, %v3615_v15  ;;  %v3605_v14 = vld [vmem:[%s7806_s27 + $0x288] sm:$0xff] }
 0x37d   : > { %6839 = vmatprep.subr.bf16.mxu0 %v7629_v1  ;;  %v3613_v15 = vld [vmem:[%s7806_s27 + $0x2c8] sm:$0xff] }
 0x380   : > { %6841 = vmatpush3.bf16.msra.mxu0 %v6840_v28  ;;  %v3647_v28 = vld [vmem:[%s7806_s27 + $0x3d8] sm:$0xff] }
 0x381   : > { %6842 = vmatprep.subr.bf16.mxu0 %v7629_v1  ;;  %v6393_v33 = vcombine.high %v3639_v27, %v3647_v28  ;;  %v6392_v34 = vcombine.low %v3639_v27, %v3647_v28  ;;  %v3621_v27 = vld [vmem:[%s7806_s27 + $0x308] sm:$0xff] }
 0x382   : > { %v3629_v28 = vld [vmem:[%s7806_s27 + $0x348] sm:$0xff] }
 0x384   : > { %6844 = vmatpush3.bf16.msra.mxu0 %v6843_v35  ;;  %v3525_v35 = vld [vmem:[%s7806_s27 + $0x8] sm:$0xff] }
 0x385   : > { %6845 = vmatprep.subr.bf16.mxu0 %v7629_v1  ;;  %v6277_v38 = vcombine.high %v3525_v35, %v3533_v36 }
 0x387   : > { %6780 = vmatmul.mubr.msk.f32.vlgmr.msra.gmra.mrb[20].mxu0 %vm1265_vm0, %v3114_v42  ;;  %v6276_v42 = vcombine.low %v3525_v35, %v3533_v36  ;;  %4334 = vmatprep.subr.bf16.mxu1 %v6277_v38  ;;  %v6373_v36 = vcombine.high %v3621_v27, %v3629_v28  ;;  %v3637_v38 = vld [vmem:[%s7806_s27 + $0x388] sm:$0xff] }
 0x388   : > { %6847 = vmatpush3.bf16.msra.mxu0 %v6846_v39  ;;  %6806 = vmatprep.mubr.msk.f32.mxu0 %vm7630_vm2, %v7631_v22  ;;  %v3440_v22 = vld [vmem:[%s9460_s26 + $0x30] sm:$0xff]  ;;  %v3537_v39 = vld [vmem:[%s7806_s27 + $0x68] sm:$0xff] }
 0x389   : > { %6848 = vmatprep.subr.bf16.mxu0 %v7629_v1  ;;  %v6855_v52 = vpack.c.bf16 %v3441_v51, %v3440_v22  ;;  %v6284_v43 = vcombine.low %v3529_v37, %v3537_v39  ;;  %v6285_v45 = vcombine.high %v3529_v37, %v3537_v39  ;;  %v3645_v39 = vld [vmem:[%s7806_s27 + $0x3c8] sm:$0xff] }
 0x38c   : > { %6850 = vmatpush3.bf16.msra.mxu0 %v6849_v46  ;;  %v3541_v46 = vld [vmem:[%s7806_s27 + $0x88] sm:$0xff] }
 0x38d   : > { %6851 = vmatprep.subr.bf16.mxu0 %v7629_v1  ;;  %v6293_v53 = vcombine.high %v3541_v46, %v3549_v47  ;;  %v6292_v44 = vcombine.low %v3541_v46, %v3549_v47  ;;  %v6389_v47 = vcombine.high %v3637_v38, %v3645_v39 }
 0x390   : > { %6853 = vmatpush3.bf16.msra.mxu0 %v6852_v49  ;;  %v3553_v49 = vld [vmem:[%s7806_s27 + $0xe8] sm:$0xff] }
 0x391   : > { %6854 = vmatprep.subr.bf16.mxu0 %v7629_v1  ;;  %v6301_v62 = vcombine.high %v3545_v19, %v3553_v49 }
 0x394   : > { %6856 = vmatpush3.bf16.msra.mxu0 %v6855_v52 }
 0x395   : > { %6857 = vmatprep.subr.bf16.mxu0 %v7629_v1 }
 0x398   : > { %6859 = vmatpush3.bf16.msra.mxu0 %v6858_v54  ;;  %v3557_v54 = vld [vmem:[%s7806_s27 + $0x108] sm:$0xff] }
 0x399   : > { %6860 = vmatprep.subr.bf16.mxu0 %v7629_v1  ;;  %v6313_v1 = vcombine.high %v3559_v0, %v3567_v4  ;;  %v3585_v0 = vld [vmem:[%s7806_s27 + $0x1e8] sm:$0xff]  ;;  %v6308_v4 = vcombine.low %v3557_v54, %v3565_v55 }
 0x39c   : > { %6862 = vmatpush3.bf16.msra.mxu0 %v6861_v58  ;;  %v6300_v58 = vcombine.low %v3545_v19, %v3553_v49  ;;  %v3526_v49 = vld [vmem:[%s7806_s27 + $0x10] sm:$0xff] }
 0x39d   : > { %4416 = vmatprep.subr.bf16.mxu0 %v6281_v59  ;;  %v6309_v59 = vcombine.high %v3557_v54, %v3565_v55 }
 0x39f   : > { %6807 = vmatmul.mubr.msk.f32.vlgmr.msra.gmra.mrb[20].mxu0 %vm1265_vm0, %v7588_v5  ;;  %v6316_v5 = vcombine.low %v3561_v56, %v3569_v32  ;;  %v3542_v32 = vld [vmem:[%s7806_s27 + $0x90] sm:$0xff] }
 0x3a0   : > { %4417 = vmatpush1.bf16.msra.mxu0 %v6280_v63  ;;  %4448 = vmatprep.mubr.bf16.mxu0 %v7628_v3  ;;  %v3581_v63 = vld [vmem:[%s7806_s27 + $0x1c8] sm:$0xff] }
 0x3a1   : > { %4418 = vmatprep.subr.bf16.mxu0 %v6297_v41  ;;  %v3577_v41 = vld [vmem:[%s7806_s27 + $0x1a8] sm:$0xff]  ;;  %v6324_v11 = vcombine.low %v3573_v61, %v3581_v63 }
 0x3a2   : > { %v6332_v12 = vcombine.low %v3577_v41, %v3585_v0 }
 0x3a4   : > { %4419 = vmatpush1.bf16.msra.mxu0 %v6296_v6  ;;  %v6325_v6 = vcombine.high %v3573_v61, %v3581_v63 }
 0x3a5   : > { %4420 = vmatprep.subr.bf16.mxu0 %v6313_v1  ;;  %v6333_v1 = vcombine.high %v3577_v41, %v3585_v0  ;;  %v3558_v0 = vld [vmem:[%s7806_s27 + $0x110] sm:$0xff] }
 0x3a8   : > { %4421 = vmatpush1.bf16.msra.mxu0 %v6312_v9  ;;  %v3593_v9 = vld [vmem:[%s7806_s27 + $0x228] sm:$0xff] }
 0x3a9   : > { %4422 = vmatprep.subr.bf16.mxu0 %v6329_v10  ;;  %v3601_v10 = vld [vmem:[%s7806_s27 + $0x268] sm:$0xff] }
 0x3aa   : > { %v6348_v23 = vcombine.low %v3593_v9, %v3601_v10 }
 0x3ac   : > { %4423 = vmatpush1.bf16.msra.mxu0 %v6328_v40  ;;  %v6341_v40 = vcombine.high %v3589_v7, %v3597_v8 }
 0x3ad   : > { %4424 = vmatprep.subr.bf16.mxu0 %v6345_v13  ;;  %v6349_v13 = vcombine.high %v3593_v9, %v3601_v10  ;;  %v3574_v10 = vld [vmem:[%s7806_s27 + $0x190] sm:$0xff] }
 0x3b0   : > { %4425 = vmatpush1.bf16.msra.mxu0 %v6344_v2  ;;  %v3609_v2 = vld [vmem:[%s7806_s27 + $0x2a8] sm:$0xff] }
 0x3b1   : > { %4426 = vmatprep.subr.bf16.mxu0 %v6361_v16  ;;  %v3617_v16 = vld [vmem:[%s7806_s27 + $0x2e8] sm:$0xff] }
 0x3b2   : > { %v6364_v35 = vcombine.low %v3609_v2, %v3617_v16 }
 0x3b4   : > { %4427 = vmatpush1.bf16.msra.mxu0 %v6360_v24  ;;  %v6357_v24 = vcombine.high %v3605_v14, %v3613_v15 }
 0x3b5   : > { %4428 = vmatprep.subr.bf16.mxu0 %v6377_v25  ;;  %v6365_v25 = vcombine.high %v3609_v2, %v3617_v16  ;;  %v3590_v16 = vld [vmem:[%s7806_s27 + $0x210] sm:$0xff] }
 0x3b8   : > { %4429 = vmatpush1.bf16.msra.mxu0 %v6376_v30  ;;  %v3625_v30 = vld [vmem:[%s7806_s27 + $0x328] sm:$0xff] }
 0x3b9   : > { %4430 = vmatprep.subr.bf16.mxu0 %v6393_v33  ;;  %v3633_v33 = vld [vmem:[%s7806_s27 + $0x368] sm:$0xff] }
 0x3ba   : > { %v6381_v37 = vcombine.high %v3625_v30, %v3633_v33  ;;  %v6380_v46 = vcombine.low %v3625_v30, %v3633_v33  ;;  %v3606_v33 = vld [vmem:[%s7806_s27 + $0x290] sm:$0xff] }
 0x3bc   : > { %4431 = vmatpush1.bf16.msra.mxu0 %v6392_v34  ;;  %v6356_v34 = vcombine.low %v3605_v14, %v3613_v15 }
 0x3bd   : > { %4498 = vmatprep.subr.bf16.mxu0 %v6285_v45  ;;  %v6372_v45 = vcombine.low %v3621_v27, %v3629_v28 }
 0x472   : > { %v3515_v22 = vpop.f32.mrb[20].mxu0 }
 0x473   : > { %v8420_v51 = vpack.c.bf16 %v3515_v22, %v3515_v22  ;;  %v6808_v52 = vpop.f32.mrb[21].mxu0  ;;  %v3534_v22 = vld [vmem:[%s7806_s27 + $0x50] sm:$0xff] }
 0x474   : > { %v3531_v52 = vld [vmem:[%s7806_s27 + $0x38] sm:$0xff]  ;;  %v6279_v55 = vcombine.high %v3526_v49, %v3534_v22 }
 0x475   : > { %4326 = vmatmul.mubr.bf16.vlgmr.msra.gmra.mrb[20].mxu1 %v8420_v51  ;;  %4449 = vmatmul.mubr.bf16.vlgmr.msra.gmra.mrb[24].mxu0 %v8420_v51 }
 0x476   : > { %4335 = vmatpush1.bf16.msra.mxu1 %v6276_v42  ;;  %4499 = vmatpush1.bf16.msra.mxu0 %v6284_v43  ;;  %v3641_v42 = vld [vmem:[%s7806_s27 + $0x3a8] sm:$0xff] }
 0x477   : > { %4336 = vmatprep.subr.bf16.mxu1 %v6293_v53  ;;  %4500 = vmatprep.subr.bf16.mxu0 %v6301_v62  ;;  %v3649_v43 = vld [vmem:[%s7806_s27 + $0x3e8] sm:$0xff]  ;;  %v3539_v53 = vld [vmem:[%s7806_s27 + $0x78] sm:$0xff]  ;;  %v6388_v62 = vcombine.low %v3637_v38, %v3645_v39 }
 0x478   : > { %4366 = vmatprep.mubr.bf16.mxu1 %v7628_v3  ;;  %4530 = vmatprep.mubr.bf16.mxu0 %v7628_v3  ;;  %v6397_v19 = vcombine.high %v3641_v42, %v3649_v43  ;;  %v6396_v54 = vcombine.low %v3641_v42, %v3649_v43  ;;  %v6289_v56 = vcombine.high %v3531_v52, %v3539_v53  ;;  %v3622_v43 = vld [vmem:[%s7806_s27 + $0x310] sm:$0xff] }
 0x479   : > { %v6288_v61 = vcombine.low %v3531_v52, %v3539_v53  ;;  %v3638_v53 = vld [vmem:[%s7806_s27 + $0x390] sm:$0xff] }
 0x47a   : > { %4337 = vmatpush1.bf16.msra.mxu1 %v6292_v44  ;;  %4501 = vmatpush1.bf16.msra.mxu0 %v6300_v58  ;;  %v3550_v44 = vld [vmem:[%s7806_s27 + $0xd0] sm:$0xff]  ;;  %v3547_v58 = vld [vmem:[%s7806_s27 + $0xb8] sm:$0xff] }
 0x47b   : > { %4338 = vmatprep.subr.bf16.mxu1 %v6309_v59  ;;  %4502 = vmatprep.subr.bf16.mxu0 %v6317_v60  ;;  %v3555_v59 = vld [vmem:[%s7806_s27 + $0xf8] sm:$0xff]  ;;  %v6278_v60 = vcombine.low %v3526_v49, %v3534_v22  ;;  %v6295_v63 = vcombine.high %v3542_v32, %v3550_v44 }
 0x47c   : > { %v6305_v41 = vcombine.high %v3547_v58, %v3555_v59  ;;  %v6304_v7 = vcombine.low %v3547_v58, %v3555_v59  ;;  %v3528_v59 = vld [vmem:[%s7806_s27 + $0x20] sm:$0xff] }
 0x47e   : > { %4339 = vmatpush1.bf16.msra.mxu1 %v6308_v4  ;;  %4503 = vmatpush1.bf16.msra.mxu0 %v6316_v5  ;;  %v3566_v4 = vld [vmem:[%s7806_s27 + $0x150] sm:$0xff]  ;;  %v3563_v5 = vld [vmem:[%s7806_s27 + $0x138] sm:$0xff] }
 0x47f   : > { %4340 = vmatprep.subr.bf16.mxu1 %v6325_v6  ;;  %4504 = vmatprep.subr.bf16.mxu0 %v6333_v1  ;;  %v3571_v6 = vld [vmem:[%s7806_s27 + $0x178] sm:$0xff]  ;;  %v6294_v1 = vcombine.low %v3542_v32, %v3550_v44  ;;  %v6311_v8 = vcombine.high %v3558_v0, %v3566_v4 }
 0x480   : > { %v6321_v9 = vcombine.high %v3563_v5, %v3571_v6  ;;  %v6320_v14 = vcombine.low %v3563_v5, %v3571_v6 }
 0x482   : > { %4341 = vmatpush1.bf16.msra.mxu1 %v6324_v11  ;;  %4505 = vmatpush1.bf16.msra.mxu0 %v6332_v12  ;;  %v3582_v11 = vld [vmem:[%s7806_s27 + $0x1d0] sm:$0xff]  ;;  %v3579_v12 = vld [vmem:[%s7806_s27 + $0x1b8] sm:$0xff] }
 0x483   : > { %4342 = vmatprep.subr.bf16.mxu1 %v6341_v40  ;;  %4506 = vmatprep.subr.bf16.mxu0 %v6349_v13  ;;  %v3587_v40 = vld [vmem:[%s7806_s27 + $0x1f8] sm:$0xff]  ;;  %v6310_v13 = vcombine.low %v3558_v0, %v3566_v4  ;;  %v6327_v15 = vcombine.high %v3574_v10, %v3582_v11  ;;  %v3544_v0 = vld [vmem:[%s7806_s27 + $0xa0] sm:$0xff] }
 0x484   : > { %v6337_v2 = vcombine.high %v3579_v12, %v3587_v40  ;;  %v6336_v27 = vcombine.low %v3579_v12, %v3587_v40  ;;  %v3552_v4 = vld [vmem:[%s7806_s27 + $0xe0] sm:$0xff] }
 0x485   : > { %v6299_v6 = vcombine.high %v3544_v0, %v3552_v4 }
 0x486   : > { %4343 = vmatpush1.bf16.msra.mxu1 %v6340_v26  ;;  %4507 = vmatpush1.bf16.msra.mxu0 %v6348_v23  ;;  %v3598_v26 = vld [vmem:[%s7806_s27 + $0x250] sm:$0xff]  ;;  %v3595_v23 = vld [vmem:[%s7806_s27 + $0x238] sm:$0xff] }
 0x487   : > { %4344 = vmatprep.subr.bf16.mxu1 %v6357_v24  ;;  %4508 = vmatprep.subr.bf16.mxu0 %v6365_v25  ;;  %v3603_v24 = vld [vmem:[%s7806_s27 + $0x278] sm:$0xff]  ;;  %v6326_v25 = vcombine.low %v3574_v10, %v3582_v11  ;;  %v6343_v28 = vcombine.high %v3590_v16, %v3598_v26  ;;  %v3576_v10 = vld [vmem:[%s7806_s27 + $0x1a0] sm:$0xff] }
 0x488   : > { %v6353_v30 = vcombine.high %v3595_v23, %v3603_v24  ;;  %v6352_v38 = vcombine.low %v3595_v23, %v3603_v24  ;;  %v3584_v11 = vld [vmem:[%s7806_s27 + $0x1e0] sm:$0xff] }
 0x489   : > { %v6331_v40 = vcombine.high %v3576_v10, %v3584_v11 }
 0x48a   : > { %4345 = vmatpush1.bf16.msra.mxu1 %v6356_v34  ;;  %4509 = vmatpush1.bf16.msra.mxu0 %v6364_v35  ;;  %v3614_v34 = vld [vmem:[%s7806_s27 + $0x2d0] sm:$0xff]  ;;  %v3611_v35 = vld [vmem:[%s7806_s27 + $0x2b8] sm:$0xff] }
 0x48b   : > { %4346 = vmatprep.subr.bf16.mxu1 %v6373_v36  ;;  %4510 = vmatprep.subr.bf16.mxu0 %v6381_v37  ;;  %v3619_v36 = vld [vmem:[%s7806_s27 + $0x2f8] sm:$0xff]  ;;  %v6342_v37 = vcombine.low %v3590_v16, %v3598_v26  ;;  %v6359_v39 = vcombine.high %v3606_v33, %v3614_v34  ;;  %v3608_v16 = vld [vmem:[%s7806_s27 + $0x2a0] sm:$0xff] }
 0x48c   : > { %v6369_v42 = vcombine.high %v3611_v35, %v3619_v36  ;;  %v6368_v49 = vcombine.low %v3611_v35, %v3619_v36  ;;  %v3616_v26 = vld [vmem:[%s7806_s27 + $0x2e0] sm:$0xff] }
 0x48d   : > { %v6363_v24 = vcombine.high %v3608_v16, %v3616_v26 }
 0x48e   : > { %4347 = vmatpush1.bf16.msra.mxu1 %v6372_v45  ;;  %4511 = vmatpush1.bf16.msra.mxu0 %v6380_v46  ;;  %v3630_v45 = vld [vmem:[%s7806_s27 + $0x350] sm:$0xff]  ;;  %v3627_v46 = vld [vmem:[%s7806_s27 + $0x338] sm:$0xff] }
 0x48f   : > { %4348 = vmatprep.subr.bf16.mxu1 %v6389_v47  ;;  %4512 = vmatprep.subr.bf16.mxu0 %v6397_v19  ;;  %v3635_v47 = vld [vmem:[%s7806_s27 + $0x378] sm:$0xff]  ;;  %v6358_v19 = vcombine.low %v3606_v33, %v3614_v34  ;;  %v6375_v22 = vcombine.high %v3622_v43, %v3630_v45  ;;  %v3640_v33 = vld [vmem:[%s7806_s27 + $0x3a0] sm:$0xff] }
 0x490   : > { %v6385_v52 = vcombine.high %v3627_v46, %v3635_v47  ;;  %v6384_v32 = vcombine.low %v3627_v46, %v3635_v47  ;;  %v3648_v34 = vld [vmem:[%s7806_s27 + $0x3e0] sm:$0xff] }
 0x491   : > { %v6395_v36 = vcombine.high %v3640_v33, %v3648_v34 }
 0x492   : > { %4349 = vmatpush1.bf16.msra.mxu1 %v6388_v62  ;;  %4513 = vmatpush1.bf16.msra.mxu0 %v6396_v54  ;;  %v3646_v62 = vld [vmem:[%s7806_s27 + $0x3d0] sm:$0xff]  ;;  %v3643_v54 = vld [vmem:[%s7806_s27 + $0x3b8] sm:$0xff] }
 0x493   : > { %4375 = vmatprep.subr.bf16.mxu1 %v6279_v55  ;;  %4580 = vmatprep.subr.bf16.mxu0 %v6289_v56  ;;  %v3651_v55 = vld [vmem:[%s7806_s27 + $0x3f8] sm:$0xff]  ;;  %v6374_v56 = vcombine.low %v3622_v43, %v3630_v45  ;;  %v6391_v44 = vcombine.high %v3638_v53, %v3646_v62  ;;  %v3546_v43 = vld [vmem:[%s7806_s27 + $0xb0] sm:$0xff] }
 0x494   : > { %v6401_v58 = vcombine.high %v3643_v54, %v3651_v55  ;;  %v3554_v45 = vld [vmem:[%s7806_s27 + $0xf0] sm:$0xff] }
 0x495   : > { %4367 = vmatmul.mubr.bf16.vlgmr.msra.gmra.mrb[24].mxu1 %v8420_v51  ;;  %4531 = vmatmul.mubr.bf16.vlgmr.msra.gmra.mrb[28].mxu0 %v8420_v51  ;;  %v6303_v47 = vcombine.high %v3546_v43, %v3554_v45 }
 0x496   : > { %4376 = vmatpush1.bf16.msra.mxu1 %v6278_v60  ;;  %4581 = vmatpush1.bf16.msra.mxu0 %v6288_v61  ;;  %v3536_v60 = vld [vmem:[%s7806_s27 + $0x60] sm:$0xff]  ;;  %v6390_v61 = vcombine.low %v3638_v53, %v3646_v62  ;;  %v3578_v53 = vld [vmem:[%s7806_s27 + $0x1b0] sm:$0xff] }
 0x497   : > { %4377 = vmatprep.subr.bf16.mxu1 %v6295_v63  ;;  %4582 = vmatprep.subr.bf16.mxu0 %v6305_v41  ;;  %v6400_v63 = vcombine.low %v3643_v54, %v3651_v55  ;;  %v6283_v41 = vcombine.high %v3528_v59, %v3536_v60  ;;  %v6282_v5 = vcombine.low %v3528_v59, %v3536_v60  ;;  %v3586_v62 = vld [vmem:[%s7806_s27 + $0x1f0] sm:$0xff] }
 0x498   : > { %4407 = vmatprep.mubr.bf16.mxu1 %v7628_v3  ;;  %4612 = vmatprep.mubr.bf16.mxu0 %v7628_v3  ;;  %v6335_v55 = vcombine.high %v3578_v53, %v3586_v62  ;;  %v3618_v59 = vld [vmem:[%s7806_s27 + $0x2f0] sm:$0xff] }
 0x49a   : > { %4378 = vmatpush1.bf16.msra.mxu1 %v6294_v1  ;;  %4583 = vmatpush1.bf16.msra.mxu0 %v6304_v7  ;;  %v3560_v1 = vld [vmem:[%s7806_s27 + $0x120] sm:$0xff] }
 0x49b   : > { %4379 = vmatprep.subr.bf16.mxu1 %v6311_v8  ;;  %4584 = vmatprep.subr.bf16.mxu0 %v6321_v9  ;;  %v3568_v7 = vld [vmem:[%s7806_s27 + $0x160] sm:$0xff]  ;;  %v6298_v8 = vcombine.low %v3544_v0, %v3552_v4 }
 0x49c   : > { %v6315_v9 = vcombine.high %v3560_v1, %v3568_v7  ;;  %v6314_v12 = vcombine.low %v3560_v1, %v3568_v7 }
 0x49e   : > { %4380 = vmatpush1.bf16.msra.mxu1 %v6310_v13  ;;  %4585 = vmatpush1.bf16.msra.mxu0 %v6320_v14  ;;  %v3592_v13 = vld [vmem:[%s7806_s27 + $0x220] sm:$0xff] }
 0x49f   : > { %4381 = vmatprep.subr.bf16.mxu1 %v6327_v15  ;;  %4586 = vmatprep.subr.bf16.mxu0 %v6337_v2  ;;  %v3600_v14 = vld [vmem:[%s7806_s27 + $0x260] sm:$0xff]  ;;  %v6330_v15 = vcombine.low %v3576_v10, %v3584_v11 }
 0x4a0   : > { %v6347_v2 = vcombine.high %v3592_v13, %v3600_v14  ;;  %v6346_v23 = vcombine.low %v3592_v13, %v3600_v14 }
 0x4a2   : > { %4382 = vmatpush1.bf16.msra.mxu1 %v6326_v25  ;;  %4587 = vmatpush1.bf16.msra.mxu0 %v6336_v27  ;;  %v3624_v25 = vld [vmem:[%s7806_s27 + $0x320] sm:$0xff] }
 0x4a3   : > { %4383 = vmatprep.subr.bf16.mxu1 %v6343_v28  ;;  %4588 = vmatprep.subr.bf16.mxu0 %v6353_v30  ;;  %v3632_v27 = vld [vmem:[%s7806_s27 + $0x360] sm:$0xff]  ;;  %v6362_v28 = vcombine.low %v3608_v16, %v3616_v26  ;;  %v7632_v26 = vmov 1983009808  }
 0x4a4   : > { %v6379_v30 = vcombine.high %v3624_v25, %v3632_v27  ;;  %v6378_v35 = vcombine.low %v3624_v25, %v3632_v27 }
 0x4a6   : > { %4384 = vmatpush1.bf16.msra.mxu1 %v6342_v37  ;;  %4589 = vmatpush1.bf16.msra.mxu0 %v6352_v38  ;;  %v3530_v37 = vld [vmem:[%s7806_s27 + $0x30] sm:$0xff] }
 0x4a7   : > { %4385 = vmatprep.subr.bf16.mxu1 %v6359_v39  ;;  %4590 = vmatprep.subr.bf16.mxu0 %v6369_v42  ;;  %v3538_v38 = vld [vmem:[%s7806_s27 + $0x70] sm:$0xff]  ;;  %v6394_v39 = vcombine.low %v3640_v33, %v3648_v34 }
 0x4a8   : > { %v6287_v42 = vcombine.high %v3530_v37, %v3538_v38  ;;  %v6286_v46 = vcombine.low %v3530_v37, %v3538_v38 }
 0x4aa   : > { %4386 = vmatpush1.bf16.msra.mxu1 %v6358_v19  ;;  %4591 = vmatpush1.bf16.msra.mxu0 %v6368_v49  ;;  %v3562_v19 = vld [vmem:[%s7806_s27 + $0x130] sm:$0xff] }
 0x4ab   : > { %4387 = vmatprep.subr.bf16.mxu1 %v6375_v22  ;;  %4592 = vmatprep.subr.bf16.mxu0 %v6385_v52  ;;  %v3570_v49 = vld [vmem:[%s7806_s27 + $0x170] sm:$0xff]  ;;  %v6302_v22 = vcombine.low %v3546_v43, %v3554_v45  ;;  %v3520_v43 = vld [vmem:[#allocation2] sm:$0xff] }
 0x4ac   : > { %v6319_v52 = vcombine.high %v3562_v19, %v3570_v49  ;;  %v6318_v54 = vcombine.low %v3562_v19, %v3570_v49 }
 0x4ae   : > { %4388 = vmatpush1.bf16.msra.mxu1 %v6374_v56  ;;  %4593 = vmatpush1.bf16.msra.mxu0 %v6384_v32  ;;  %v3594_v56 = vld [vmem:[%s7806_s27 + $0x230] sm:$0xff] }
 0x4af   : > { %4389 = vmatprep.subr.bf16.mxu1 %v6391_v44  ;;  %4594 = vmatprep.subr.bf16.mxu0 %v6401_v58  ;;  %v3602_v32 = vld [vmem:[%s7806_s27 + $0x270] sm:$0xff]  ;;  %v6334_v44 = vcombine.low %v3578_v53, %v3586_v62 }
 0x4b0   : > { %v6351_v58 = vcombine.high %v3594_v56, %v3602_v32  ;;  %v6350_v60 = vcombine.low %v3594_v56, %v3602_v32 }
 0x4b2   : > { %4390 = vmatpush1.bf16.msra.mxu1 %v6390_v61  ;;  %4595 = vmatpush1.bf16.msra.mxu0 %v6400_v63  ;;  %v3626_v63 = vld [vmem:[%s7806_s27 + $0x330] sm:$0xff] }
 0x4b3   : > { %4457 = vmatprep.subr.bf16.mxu1 %v6283_v41  ;;  %v3634_v41 = vld [vmem:[%s7806_s27 + $0x370] sm:$0xff] }
 0x4b4   : > { %v6383_v4 = vcombine.high %v3626_v63, %v3634_v41  ;;  %v6382_v1 = vcombine.low %v3626_v63, %v3634_v41 }
 0x4b5   : > { %4408 = vmatmul.mubr.bf16.vlgmr.msra.gmra.mrb[28].mxu1 %v8420_v51  ;;  %4613 = vmatmul.mubr.bf16.vlgmr.msra.gmra.mrb[32].mxu0 %v8420_v51 }
 0x4b6   : > { %4458 = vmatpush1.bf16.msra.mxu1 %v6282_v5  ;;  %4489 = vmatprep.mubr.bf16.mxu1 %v7628_v3  ;;  %v3642_v5 = vld [vmem:[%s7806_s27 + $0x3b0] sm:$0xff] }
 0x4b7   : > { %4459 = vmatprep.subr.bf16.mxu1 %v6299_v6  ;;  %v3650_v6 = vld [vmem:[%s7806_s27 + $0x3f0] sm:$0xff] }
 0x4b8   : > { %v6399_v7 = vcombine.high %v3642_v5, %v3650_v6 }
 0x4ba   : > { %4460 = vmatpush1.bf16.msra.mxu1 %v6298_v8  ;;  %v6398_v8 = vcombine.low %v3642_v5, %v3650_v6  ;;  %v3522_v5 = vld [vmem:[#allocation2 + $0x10] sm:$0xff] }
 0x4bb   : > { %4461 = vmatprep.subr.bf16.mxu1 %v6315_v9 }
 0x4be   : > { %4462 = vmatpush1.bf16.msra.mxu1 %v6314_v12 }
 0x4bf   : > { %4463 = vmatprep.subr.bf16.mxu1 %v6331_v40 }
 0x4c2   : > { %4464 = vmatpush1.bf16.msra.mxu1 %v6330_v15 }
 0x4c3   : > { %4465 = vmatprep.subr.bf16.mxu1 %v6347_v2 }
 0x4c6   : > { %4466 = vmatpush1.bf16.msra.mxu1 %v6346_v23  ;;  %v4640_v23 = vunpack.c.l.s4 %v7632_v26  ;;  %v4873_v26 = vld [vmem:[%s9461_s3] sm:$0xff] (!%p6402_p5) }
 0x4c7   : > { %4467 = vmatprep.subr.bf16.mxu1 %v6363_v24 }
 0x4c8   : > { %v4641_v24 = vunpack.c.0.s8 %v4640_v23 }
 0x4ca   : > { %4468 = vmatpush1.bf16.msra.mxu1 %v6362_v28  ;;  %v8525_v25 = vsub.s32 %v4641_v24, %v7968_v17  ;;  %v4874_v24 = vld [vmem:[%s9461_s3 + $0x8] sm:$0xff] (!%p6402_p5) }
 0x4cb   : > { %4469 = vmatprep.subr.bf16.mxu1 %v6379_v30 }
 0x4ce   : > { %4470 = vmatpush1.bf16.msra.mxu1 %v6378_v35 }
 0x4cf   : > { %4471 = vmatprep.subr.bf16.mxu1 %v6395_v36 }
 0x4d2   : > { %4472 = vmatpush1.bf16.msra.mxu1 %v6394_v39 }
 0x4d3   : > { %4539 = vmatprep.subr.bf16.mxu1 %v6287_v42 }
 0x4d5   : > { %4490 = vmatmul.mubr.bf16.vlgmr.msra.gmra.mrb[32].mxu1 %v8420_v51 }
 0x4d6   : > { %4540 = vmatpush1.bf16.msra.mxu1 %v6286_v46  ;;  %4571 = vmatprep.mubr.bf16.mxu1 %v7628_v3  ;;  %v3610_v3 = vld [vmem:[%s7806_s27 + $0x2b0] sm:$0xff] }
 0x4d7   : > { %4541 = vmatprep.subr.bf16.mxu1 %v6303_v47  ;;  %v6367_v61 = vcombine.high %v3610_v3, %v3618_v59  ;;  %v6366_v0 = vcombine.low %v3610_v3, %v3618_v59 }
 0x4da   : > { %4542 = vmatpush1.bf16.msra.mxu1 %v6302_v22 }
 0x4db   : > { %4543 = vmatprep.subr.bf16.mxu1 %v6319_v52 }
 0x4de   : > { %4544 = vmatpush1.bf16.msra.mxu1 %v6318_v54 }
 0x4df   : > { %4545 = vmatprep.subr.bf16.mxu1 %v6335_v55 }
 0x4e2   : > { %4546 = vmatpush1.bf16.msra.mxu1 %v6334_v44  ;;  %v3521_v44 = vld [vmem:[#allocation2 + $0x8] sm:$0xff] }
 0x4e3   : > { %4547 = vmatprep.subr.bf16.mxu1 %v6351_v58 }
 0x4e6   : > { %4548 = vmatpush1.bf16.msra.mxu1 %v6350_v60 }
 0x4e7   : > { %4549 = vmatprep.subr.bf16.mxu1 %v6367_v61 }
 0x4ea   : > { %4550 = vmatpush1.bf16.msra.mxu1 %v6366_v0 }
 0x4eb   : > { %4551 = vmatprep.subr.bf16.mxu1 %v6383_v4 }
 0x4ee   : > { %4552 = vmatpush1.bf16.msra.mxu1 %v6382_v1 }
 0x4ef   : > { %4553 = vmatprep.subr.bf16.mxu1 %v6399_v7 }
 0x4f2   : > { %4554 = vmatpush1.bf16.msra.mxu1 %v6398_v8 }
 0x4f5   : > { %4572 = vmatmul.mubr.bf16.vlgmr.msra.gmra.mrb[36].mxu1 %v8420_v51 }
 0x548   : > { %v4327_v9 = vpop.f32.mrb[20].mxu1  ;;  %v4450_v10 = vpop.f32.mrb[24].mxu0 }
 0x549   : > { %v4329_v11 = vpop.f32.mrb[21].mxu1  ;;  %v4452_v12 = vpop.f32.mrb[25].mxu0 }
 0x54a   : > { %v4637_v40 = vcombine.low %v4327_v9, %v4329_v11  ;;  %v4655_v13 = vcombine.low %v4450_v10, %v4452_v12  ;;  %v4331_v14 = vpop.f32.mrb[22].mxu1  ;;  %v4454_v15 = vpop.f32.mrb[26].mxu0 }
 0x54b   : > { %v4332_v2 = vpop.f32.mrb[23].mxu1  ;;  %v4455_v16 = vpop.f32.mrb[27].mxu0 }
 0x54c   : > { %v4645_v39 = vrot.slane %v4637_v40, %v8525_v25  ;;  %v4669_v56 = vrot.slane %v4655_v13, %v8525_v25  ;;  %v3523_v13 = vld [vmem:[#allocation2 + $0x18] sm:$0xff]  ;;  %v4889_v2 = vld [vmem:[%s9461_s3 + $0x80] sm:$0xff] (!%p6402_p5)  ;;  %v4890_v16 = vld [vmem:[%s9461_s3 + $0x88] sm:$0xff] (!%p6402_p5) }
 0x54d   : > { %v6863_v23 = vpack.c.bf16 (!%p6402_p5), %v4890_v16, %v4889_v2  ;;  %v4913_v2 = vld [vmem:[%s9461_s3 + $0x140] sm:$0xff] (!%p6402_p5) }
 0x54f   : > { %6864 = vmatprep.subr.bf16.mxu0 (!%p6402_p5), %v6863_v23  ;;  %v4899_v23 = vld [vmem:[%s9461_s3 + $0xd0] sm:$0xff] (!%p6402_p5) }
 0x568   : > { %v4368_v27 = vpop.f32.mrb[24].mxu1  ;;  %v4532_v28 = vpop.f32.mrb[28].mxu0 }
 0x569   : > { %v4370_v30 = vpop.f32.mrb[25].mxu1  ;;  %v4534_v51 = vpop.f32.mrb[29].mxu0 }
 0x56a   : > { %v4638_v33 = vcombine.low %v4368_v27, %v4370_v30  ;;  %v4672_v34 = vcombine.low %v4532_v28, %v4534_v51  ;;  %v4372_v35 = vpop.f32.mrb[26].mxu1  ;;  %v4536_v36 = vpop.f32.mrb[30].mxu0  ;;  %v4921_v27 = vld [vmem:[%s9461_s3 + $0x180] sm:$0xff] (!%p6402_p5)  ;;  %v4922_v28 = vld [vmem:[%s9461_s3 + $0x188] sm:$0xff] (!%p6402_p5)  ;;  %v6865_v30 = vpack.c.bf16 (!%p6402_p5), %v4874_v24, %v4873_v26  ;;  %v4900_v24 = vld [vmem:[%s9461_s3 + $0xd8] sm:$0xff] (!%p6402_p5) }
 0x56b   : > { %v4373_v37 = vpop.f32.mrb[27].mxu1  ;;  %v4537_v38 = vpop.f32.mrb[31].mxu0  ;;  %v6895_v51 = vpack.c.bf16 (!%p6402_p5), %v4922_v28, %v4921_v27  ;;  %v4891_v35 = vld [vmem:[%s9461_s3 + $0x90] sm:$0xff] (!%p6402_p5)  ;;  %v4914_v26 = vld [vmem:[%s9461_s3 + $0x148] sm:$0xff] (!%p6402_p5)  ;;  %v4932_v28 = vld [vmem:[%s9461_s3 + $0x1d8] sm:$0xff] (!%p6402_p5) }
 0x56c   : > { %v4652_v42 = vrot.slane %v4638_v33, %v8525_v25  ;;  %v4686_v0 = vrot.slane %v4672_v34, %v8525_v25  ;;  %v4905_v33 = vld [vmem:[%s9461_s3 + $0x100] sm:$0xff] (!%p6402_p5)  ;;  %v4906_v34 = vld [vmem:[%s9461_s3 + $0x108] sm:$0xff] (!%p6402_p5)  ;;  %v4892_v37 = vld [vmem:[%s9461_s3 + $0x98] sm:$0xff] (!%p6402_p5)  ;;  %6866 = vmatpush3.bf16.msra.mxu0 (!%p6402_p5), %v6865_v30 }
 0x56d   : > { %v6897_v36 = vpack.c.bf16 (!%p6402_p5), %v4906_v34, %v4905_v33  ;;  %v4875_v38 = vld [vmem:[%s9461_s3 + $0x10] sm:$0xff] (!%p6402_p5)  ;;  %6896 = vmatprep.subr.bf16.mxu1 (!%p6402_p5), %v6895_v51  ;;  %v6913_v51 = vpack.c.bf16 (!%p6402_p5), %v4914_v26, %v4913_v2  ;;  %v6883_v33 = vpack.c.bf16 (!%p6402_p5), %v4900_v24, %v4899_v23 }
 0x56e   : > { %v4653_v45 = vcombine.low %v4645_v39, %v4652_v42  ;;  %v4876_v39 = vld [vmem:[%s9461_s3 + $0x18] sm:$0xff] (!%p6402_p5)  ;;  %v6867_v42 = vpack.c.bf16 (!%p6402_p5), %v4892_v37, %v4891_v35  ;;  %v4931_v27 = vld [vmem:[%s9461_s3 + $0x1d0] sm:$0xff] (!%p6402_p5) }
 0x56f   : > { %6898 = vmatpush3.bf16.msra.mxu1 (!%p6402_p5), %v6897_v36  ;;  %v4883_v34 = vld [vmem:[%s9461_s3 + $0x50] sm:$0xff] (!%p6402_p5)  ;;  %v4884_v35 = vld [vmem:[%s9461_s3 + $0x58] sm:$0xff] (!%p6402_p5)  ;;  %v6915_v37 = vpack.c.bf16 (!%p6402_p5), %v4932_v28, %v4931_v27 }
 0x570   : > { %v4709_v46 = vadd.f32 %v4653_v45, %v3520_v43  ;;  %v6869_v43 = vpack.c.bf16 (!%p6402_p5), %v4876_v39, %v4875_v38  ;;  %v4923_v45 = vld [vmem:[%s9461_s3 + $0x190] sm:$0xff] (!%p6402_p5)  ;;  %6868 = vmatprep.subr.bf16.mxu0 (!%p6402_p5), %v6867_v42  ;;  %v4916_v38 = vld [vmem:[%s9461_s3 + $0x158] sm:$0xff] (!%p6402_p5)  ;;  %v4901_v39 = vld [vmem:[%s9461_s3 + $0xe0] sm:$0xff] (!%p6402_p5) }
 0x571   : > { %v4915_v36 = vld [vmem:[%s9461_s3 + $0x150] sm:$0xff] (!%p6402_p5)  ;;  %v4902_v42 = vld [vmem:[%s9461_s3 + $0xe8] sm:$0xff] (!%p6402_p5) }
 0x572   : > { %4713 = vst [vmem:[#allocation2] sm:$0xff] %v4709_v46  ;;  %v4924_v46 = vld [vmem:[%s9461_s3 + $0x198] sm:$0xff] (!%p6402_p5)  ;;  %6870 = vmatpush3.bf16.msra.mxu0 (!%p6402_p5), %v6869_v43  ;;  %v4933_v43 = vld [vmem:[%s9461_s3 + $0x1e0] sm:$0xff] (!%p6402_p5) }
 0x588   : > { %v4409_v17 = vpop.f32.mrb[28].mxu1  ;;  %v4614_v47 = vpop.f32.mrb[32].mxu0 }
 0x589   : > { %v4411_v19 = vpop.f32.mrb[29].mxu1  ;;  %v4616_v49 = vpop.f32.mrb[33].mxu0 }
 0x58a   : > { %v4654_v22 = vcombine.low %v4409_v17, %v4411_v19  ;;  %v4689_v52 = vcombine.low %v4614_v47, %v4616_v49  ;;  %v4413_v53 = vpop.f32.mrb[30].mxu1  ;;  %v4618_v62 = vpop.f32.mrb[34].mxu0  ;;  %v4907_v17 = vld [vmem:[%s9461_s3 + $0x110] sm:$0xff] (!%p6402_p5)  ;;  %v6899_v47 = vpack.c.bf16 (!%p6402_p5), %v4924_v46, %v4923_v45  ;;  %v4908_v19 = vld [vmem:[%s9461_s3 + $0x118] sm:$0xff] (!%p6402_p5)  ;;  %v4893_v49 = vld [vmem:[%s9461_s3 + $0xa0] sm:$0xff] (!%p6402_p5)  ;;  %v6885_v46 = vpack.c.bf16 (!%p6402_p5), %v4884_v35, %v4883_v34 }
 0x58b   : > { %v4414_v54 = vpop.f32.mrb[31].mxu1  ;;  %v4619_v55 = vpop.f32.mrb[35].mxu0  ;;  %v4877_v62 = vld [vmem:[%s9461_s3 + $0x20] sm:$0xff] (!%p6402_p5)  ;;  %v4934_v45 = vld [vmem:[%s9461_s3 + $0x1e8] sm:$0xff] (!%p6402_p5) }
 0x58c   : > { %v4662_v32 = vrot.slane %v4654_v22, %v8525_v25  ;;  %v4703_v12 = vrot.slane %v4689_v52, %v8525_v25  ;;  %v4894_v22 = vld [vmem:[%s9461_s3 + $0xa8] sm:$0xff] (!%p6402_p5)  ;;  %v6901_v52 = vpack.c.bf16 (!%p6402_p5), %v4908_v19, %v4907_v17  ;;  %v4925_v55 = vld [vmem:[%s9461_s3 + $0x1a0] sm:$0xff] (!%p6402_p5)  ;;  %6900 = vmatprep.subr.bf16.mxu1 (!%p6402_p5), %v6899_v47  ;;  %v6917_v47 = vpack.c.bf16 (!%p6402_p5), %v4916_v38, %v4915_v36 }
 0x58d   : > { %v6871_v53 = vpack.c.bf16 (!%p6402_p5), %v4894_v22, %v4893_v49  ;;  %v4878_v54 = vld [vmem:[%s9461_s3 + $0x28] sm:$0xff] (!%p6402_p5)  ;;  %v4885_v17 = vld [vmem:[%s9461_s3 + $0x60] sm:$0xff] (!%p6402_p5)  ;;  %v6887_v19 = vpack.c.bf16 (!%p6402_p5), %v4902_v42, %v4901_v39  ;;  %v4955_v39 = vld [vmem:[%s9461_s3 + $0x290] sm:$0xff] (!%p6402_p5) }
 0x58e   : > { %v4670_v58 = vcombine.low %v4662_v32, %v4669_v56  ;;  %v4926_v56 = vld [vmem:[%s9461_s3 + $0x1a8] sm:$0xff] (!%p6402_p5)  ;;  %v4909_v32 = vld [vmem:[%s9461_s3 + $0x120] sm:$0xff] (!%p6402_p5)  ;;  %6902 = vmatpush3.bf16.msra.mxu1 (!%p6402_p5), %v6901_v52  ;;  %v4956_v42 = vld [vmem:[%s9461_s3 + $0x298] sm:$0xff] (!%p6402_p5) }
 0x58f   : > { %6872 = vmatprep.subr.bf16.mxu0 (!%p6402_p5), %v6871_v53  ;;  %v4886_v49 = vld [vmem:[%s9461_s3 + $0x68] sm:$0xff] (!%p6402_p5)  ;;  %v4917_v22 = vld [vmem:[%s9461_s3 + $0x160] sm:$0xff] (!%p6402_p5)  ;;  %v6919_v53 = vpack.c.bf16 (!%p6402_p5), %v4934_v45, %v4933_v43 }
 0x590   : > { %v4710_v3 = vadd.f32 %v4670_v58, %v3521_v44  ;;  %v4910_v44 = vld [vmem:[%s9461_s3 + $0x128] sm:$0xff] (!%p6402_p5)  ;;  %v6873_v58 = vpack.c.bf16 (!%p6402_p5), %v4878_v54, %v4877_v62  ;;  %v4725_v52 = vld [vmem:[%s9462_s0] sm:$0xff] (!%p6402_p5)  ;;  %v4903_v54 = vld [vmem:[%s9461_s3 + $0xf0] sm:$0xff] (!%p6402_p5) }
 0x591   : > { %v4918_v62 = vld [vmem:[%s9461_s3 + $0x168] sm:$0xff] (!%p6402_p5)  ;;  %v4752_v2 = vrot.slane (!%p6402_p5), %v4725_v52, %v8059_v57  ;;  %v4760_v26 = vrot.slane (!%p6402_p5), %v4725_v52, %v8001_v50  ;;  %v4937_v35 = vld [vmem:[%s9461_s3 + $0x200] sm:$0xff] (!%p6402_p5) }
 0x592   : > { %4714 = vst [vmem:[#allocation2 + $0x8] sm:$0xff] %v4710_v3  ;;  %v6903_v3 = vpack.c.bf16 (!%p6402_p5), %v4926_v56, %v4925_v55  ;;  %6874 = vmatpush3.bf16.msra.mxu0 (!%p6402_p5), %v6873_v58  ;;  %v4904_v55 = vld [vmem:[%s9461_s3 + $0xf8] sm:$0xff] (!%p6402_p5)  ;;  %v4732_v56 = vrot.slane (!%p6402_p5), %v4725_v52, %v7971_v18  ;;  %v4935_v58 = vld [vmem:[%s9461_s3 + $0x1f0] sm:$0xff] (!%p6402_p5)  ;;  %v4938_v36 = vld [vmem:[%s9461_s3 + $0x208] sm:$0xff] (!%p6402_p5) }
 0x593   : > { %v4969_v43 = vld [vmem:[%s9461_s3 + $0x300] sm:$0xff] (!%p6402_p5)  ;;  %v4970_v45 = vld [vmem:[%s9461_s3 + $0x308] sm:$0xff] (!%p6402_p5) }
 0x594   : > { %6904 = vmatprep.subr.bf16.mxu1 (!%p6402_p5), %v6903_v3  ;;  %v4936_v3 = vld [vmem:[%s9461_s3 + $0x1f8] sm:$0xff] (!%p6402_p5) }
 0x5a8   : > { %v4491_v59 = vpop.f32.mrb[32].mxu1 }
 0x5a9   : > { %v4493_v60 = vpop.f32.mrb[33].mxu1 }
 0x5aa   : > { %v4671_v61 = vcombine.low %v4491_v59, %v4493_v60  ;;  %v4495_v63 = vpop.f32.mrb[34].mxu1  ;;  %v4895_v59 = vld [vmem:[%s9461_s3 + $0xb0] sm:$0xff] (!%p6402_p5)  ;;  %v4896_v60 = vld [vmem:[%s9461_s3 + $0xb8] sm:$0xff] (!%p6402_p5) }
 0x5ab   : > { %v4496_v41 = vpop.f32.mrb[35].mxu1  ;;  %v6905_v63 = vpack.c.bf16 (!%p6402_p5), %v4910_v44, %v4909_v32  ;;  %v4736_v32 = vrot.slane (!%p6402_p5), %v4725_v52, %v7977_v20  ;;  %v4740_v44 = vrot.slane (!%p6402_p5), %v4725_v52, %v8031_v29 }
 0x5ac   : > { %v4679_v4 = vrot.slane %v4671_v61, %v8525_v25  ;;  %v4879_v61 = vld [vmem:[%s9461_s3 + $0x30] sm:$0xff] (!%p6402_p5)  ;;  %v6875_v41 = vpack.c.bf16 (!%p6402_p5), %v4896_v60, %v4895_v59  ;;  %v4744_v59 = vrot.slane (!%p6402_p5), %v4725_v52, %v7980_v21  ;;  %v6889_v60 = vpack.c.bf16 (!%p6402_p5), %v4886_v49, %v4885_v17 }
 0x5ad   : > { %6906 = vmatpush3.bf16.msra.mxu1 (!%p6402_p5), %v6905_v63  ;;  %v4888_v63 = vld [vmem:[%s9461_s3 + $0x78] sm:$0xff] (!%p6402_p5)  ;;  %v6929_v49 = vpack.c.bf16 (!%p6402_p5), %v4938_v36, %v4937_v35  ;;  %v4993_v36 = vld [vmem:[%s9461_s3 + $0x3c0] sm:$0xff] (!%p6402_p5) }
 0x5ae   : > { %v4687_v6 = vcombine.low %v4679_v4, %v4686_v0  ;;  %v4880_v0 = vld [vmem:[%s9461_s3 + $0x38] sm:$0xff] (!%p6402_p5)  ;;  %v4927_v4 = vld [vmem:[%s9461_s3 + $0x1b0] sm:$0xff] (!%p6402_p5)  ;;  %6876 = vmatprep.subr.bf16.mxu0 (!%p6402_p5), %v6875_v41  ;;  %v4793_v41 = vcombine.low (!%p6402_p5), %v4732_v56, %v4736_v32  ;;  %v6961_v56 = vpack.c.bf16 (!%p6402_p5), %v4970_v45, %v4969_v43  ;;  %v4957_v32 = vld [vmem:[%s9461_s3 + $0x2a0] sm:$0xff] (!%p6402_p5) }
 0x5b0   : > { %v4711_v1 = vadd.f32 %v4687_v6, %v3522_v5  ;;  %v4928_v5 = vld [vmem:[%s9461_s3 + $0x1b8] sm:$0xff] (!%p6402_p5) }
 0x5b1   : > { %v6907_v6 = vpack.c.bf16 (!%p6402_p5), %v4928_v5, %v4927_v4  ;;  %v6891_v4 = vpack.c.bf16 (!%p6402_p5), %v4904_v55, %v4903_v54  ;;  %v4919_v5 = vld [vmem:[%s9461_s3 + $0x170] sm:$0xff] (!%p6402_p5)  ;;  %v4940_v54 = vld [vmem:[%s9461_s3 + $0x218] sm:$0xff] (!%p6402_p5) }
 0x5b2   : > { %4715 = vst [vmem:[#allocation2 + $0x10] sm:$0xff] %v4711_v1  ;;  %v4911_v1 = vld [vmem:[%s9461_s3 + $0x130] sm:$0xff] (!%p6402_p5) }
 0x5b3   : > { %6908 = vmatprep.subr.bf16.mxu1 (!%p6402_p5), %v6907_v6  ;;  %v4794_v6 = vcombine.low (!%p6402_p5), %v4740_v44, %v4744_v59  ;;  %v4958_v44 = vld [vmem:[%s9461_s3 + $0x2a8] sm:$0xff] (!%p6402_p5)  ;;  %v4972_v59 = vld [vmem:[%s9461_s3 + $0x318] sm:$0xff] (!%p6402_p5) }
 0x5c8   : > { %v4573_v7 = vpop.f32.mrb[36].mxu1 }
 0x5c9   : > { %v4575_v8 = vpop.f32.mrb[37].mxu1 }
 0x5ca   : > { %v4688_v9 = vcombine.low %v4573_v7, %v4575_v8  ;;  %v4577_v10 = vpop.f32.mrb[38].mxu1  ;;  %v4912_v7 = vld [vmem:[%s9461_s3 + $0x138] sm:$0xff] (!%p6402_p5)  ;;  %v4897_v8 = vld [vmem:[%s9461_s3 + $0xc0] sm:$0xff] (!%p6402_p5) }
 0x5cb   : > { %v4578_v11 = vpop.f32.mrb[39].mxu1  ;;  %v6877_v10 = vpack.c.bf16 (!%p6402_p5), %v4880_v0, %v4879_v61  ;;  %v4887_v61 = vld [vmem:[%s9461_s3 + $0x70] sm:$0xff] (!%p6402_p5)  ;;  %v6921_v0 = vpack.c.bf16 (!%p6402_p5), %v4918_v62, %v4917_v22 }
 0x5cc   : > { %v4696_v40 = vrot.slane %v4688_v9, %v8525_v25  ;;  %4720 = sbr.rel (%p6402_p5) target bundleno = 1824 (0x720), region = 100  ;;  %v4898_v9 = vld [vmem:[%s9461_s3 + $0xc8] sm:$0xff] (!%p6402_p5)  ;;  %v4929_v11 = vld [vmem:[%s9461_s3 + $0x1c0] sm:$0xff] (!%p6402_p5)  ;;  %v4987_v22 = vld [vmem:[%s9461_s3 + $0x390] sm:$0xff] (!%p6402_p5) }
 0x5cd   : > { %6878 = vmatpush3.bf16.msra.mxu0 (!%p6402_p5), %v6877_v10  ;;  %v4954_v10 = vld [vmem:[%s9461_s3 + $0x288] sm:$0xff] (!%p6402_p5)  ;;  %v4939_v62 = vld [vmem:[%s9461_s3 + $0x210] sm:$0xff] (!%p6402_p5) }
 0x5ce   : > { %v4704_v14 = vcombine.low %v4696_v40, %v4703_v12  ;;  %v4930_v12 = vld [vmem:[%s9461_s3 + $0x1c8] sm:$0xff] (!%p6402_p5)  ;;  %v6909_v40 = vpack.c.bf16 (!%p6402_p5), %v4912_v7, %v4911_v1  ;;  %v6923_v1 = vpack.c.bf16 (!%p6402_p5), %v4936_v3, %v4935_v58  ;;  %v4920_v7 = vld [vmem:[%s9461_s3 + $0x178] sm:$0xff] (!%p6402_p5)  ;;  %v4971_v3 = vld [vmem:[%s9461_s3 + $0x310] sm:$0xff] (!%p6402_p5) }
 0x5cf   : > { %v6911_v16 = vpack.c.bf16 (!%p6402_p5), %v4930_v12, %v4929_v11  ;;  %v6893_v11 = vpack.c.bf16 (!%p6402_p5), %v4888_v63, %v4887_v61  ;;  %v4808_v12 = vrot.slane (!%p6402_p5), %v4794_v6, %v8525_v25  ;;  %v6925_v23 = vpack.c.bf16 (!%p6402_p5), %v4920_v7, %v4919_v5  ;;  %v4989_v63 = vld [vmem:[%s9461_s3 + $0x3a0] sm:$0xff] (!%p6402_p5)  ;;  %v4942_v5 = vld [vmem:[%s9461_s3 + $0x228] sm:$0xff] (!%p6402_p5)  ;;  %v4960_v7 = vld [vmem:[%s9461_s3 + $0x2b8] sm:$0xff] (!%p6402_p5) }
 0x5d0   : > { %v4712_v15 = vadd.f32 %v4704_v14, %v3523_v13  ;;  %v6879_v13 = vpack.c.bf16 (!%p6402_p5), %v4898_v9, %v4897_v8  ;;  %v4881_v14 = vld [vmem:[%s9461_s3 + $0x40] sm:$0xff] (!%p6402_p5)  ;;  %6910 = vmatpush3.bf16.msra.mxu1 (!%p6402_p5), %v6909_v40  ;;  %v4801_v8 = vrot.slane (!%p6402_p5), %v4793_v41, %v8525_v25  ;;  %v6933_v61 = vpack.c.bf16 (!%p6402_p5), %v4940_v54, %v4939_v62  ;;  %v4990_v41 = vld [vmem:[%s9461_s3 + $0x3a8] sm:$0xff] (!%p6402_p5)  ;;  %v4995_v62 = vld [vmem:[%s9461_s3 + $0x3d0] sm:$0xff] (!%p6402_p5) }
 0x5d1   : > { %6912 = vmatprep.subr.bf16.mxu1 (!%p6402_p5), %v6911_v16  ;;  %v4953_v9 = vld [vmem:[%s9461_s3 + $0x280] sm:$0xff] (!%p6402_p5)  ;;  %v4756_v16 = vrot.slane (!%p6402_p5), %v4725_v52, %v7997_v48  ;;  %v6965_v6 = vpack.c.bf16 (!%p6402_p5), %v4972_v59, %v4971_v3  ;;  %v4996_v54 = vld [vmem:[%s9461_s3 + $0x3d8] sm:$0xff] (!%p6402_p5)  ;;  %v4966_v3 = vld [vmem:[%s9461_s3 + $0x2e8] sm:$0xff] (!%p6402_p5) }
 0x5d2   : > { %4716 = vst [vmem:[#allocation2 + $0x18] sm:$0xff] %v4712_v15  ;;  %v4882_v15 = vld [vmem:[%s9461_s3 + $0x48] sm:$0xff] (!%p6402_p5)  ;;  %6880 = vmatprep.subr.bf16.mxu0 (!%p6402_p5), %v6879_v13  ;;  %v4985_v40 = vld [vmem:[%s9461_s3 + $0x380] sm:$0xff] (!%p6402_p5)  ;;  %v4809_v24 = vcombine.low (!%p6402_p5), %v4801_v8, %v4808_v12  ;;  %v6927_v27 = vpack.c.bf16 (!%p6402_p5), %v4954_v10, %v4953_v9  ;;  %v6967_v9 = vpack.c.bf16 (!%p6402_p5), %v4990_v41, %v4989_v63 }
 0x5d3   : > { %v6881_v30 = vpack.c.bf16 %v4882_v15, %v4881_v14  ;;  %v4986_v13 = vld [vmem:[%s9461_s3 + $0x388] sm:$0xff]  ;;  %v4721_v14 = vld [vmem:[#allocation2] sm:$0xff]  ;;  %v4748_v15 = vrot.slane %v4725_v52, %v8137_v31  ;;  %v4988_v52 = vld [vmem:[%s9461_s3 + $0x398] sm:$0xff]  ;;  %v6979_v59 = vpack.c.bf16 %v4996_v54, %v4995_v62 }
 0x5d4   : > { %6914 = vmatpush3.bf16.msra.mxu1 %v6913_v51  ;;  %v6959_v28 = vpack.c.bf16 %v4986_v13, %v4985_v40  ;;  %v6963_v58 = vpack.c.bf16 %v4988_v52, %v4987_v22  ;;  %v4722_v8 = vld [vmem:[#allocation2 + $0x8] sm:$0xff]  ;;  %v4973_v10 = vld [vmem:[%s9461_s3 + $0x320] sm:$0xff]  ;;  %v4991_v13 = vld [vmem:[%s9461_s3 + $0x3b0] sm:$0xff] }
 0x5d5   : > { %6882 = vmatpush3.bf16.msra.mxu0 %v6881_v30  ;;  %6916 = vmatprep.subr.bf16.mxu1 %v6915_v37  ;;  %v4865_v30 = vadd.f32 %v4809_v24, %v4721_v14  ;;  %v4810_v51 = vcombine.low %v4748_v15, %v4752_v2  ;;  %v4992_v14 = vld [vmem:[%s9461_s3 + $0x3b8] sm:$0xff]  ;;  %v4943_v2 = vld [vmem:[%s9461_s3 + $0x230] sm:$0xff]  ;;  %v4961_v24 = vld [vmem:[%s9461_s3 + $0x2c0] sm:$0xff] }
 0x5d6   : > { %6884 = vmatprep.subr.bf16.mxu0 %v6883_v33  ;;  %v4811_v33 = vcombine.low %v4756_v16, %v4760_v26  ;;  %v4944_v16 = vld [vmem:[%s9461_s3 + $0x238] sm:$0xff]  ;;  %v4978_v22 = vld [vmem:[%s9461_s3 + $0x348] sm:$0xff]  ;;  %v4997_v41 = vld [vmem:[%s9461_s3 + $0x3e0] sm:$0xff] }
 0x5d7   : > { %v4869_v34 = vmax.f32 %v4865_v30, 0.0  ;;  %v4975_v30 = vld [vmem:[%s9461_s3 + $0x330] sm:$0xff]  ;;  %v6941_v35 = vpack.c.bf16 %v4944_v16, %v4943_v2  ;;  %v4952_v2 = vld [vmem:[%s9461_s3 + $0x278] sm:$0xff]  ;;  %v5017_v16 = vld [vmem:[%s9461_s3 + $0x480] sm:$0xff] }
 0x5d8   : > { %6918 = vmatpush3.bf16.msra.mxu1 %v6917_v47  ;;  %v4825_v17 = vrot.slane %v4811_v33, %v8525_v25  ;;  %v5003_v54 = vld [vmem:[%s9461_s3 + $0x410] sm:$0xff] }
 0x5d9   : > { %6886 = vmatpush3.bf16.msra.mxu0 %v6885_v46  ;;  %6920 = vmatprep.subr.bf16.mxu1 %v6919_v53  ;;  %v5147_v37 = vrot.slane %v4869_v34, %v8525_v25  ;;  %v5140_v38 = vcombine.high %v4869_v34, %v4869_v34  ;;  %v4818_v46 = vrot.slane %v4810_v51, %v8525_v25  ;;  %v4976_v51 = vld [vmem:[%s9461_s3 + $0x338] sm:$0xff] }
 0x5da   : > { %6888 = vmatprep.subr.bf16.mxu0 %v6887_v19  ;;  %v6931_v53 = vpack.c.bf16 %v4956_v42, %v4955_v39  ;;  %v4945_v39 = vld [vmem:[%s9461_s3 + $0x240] sm:$0xff]  ;;  %v4946_v42 = vld [vmem:[%s9461_s3 + $0x248] sm:$0xff] }
 0x5db   : > { %v5155_v47 = vcombine.high %v5147_v37, %v5147_v37  ;;  %v5154_v19 = vrot.slane %v5140_v38, %v8525_v25 }
 0x5dc   : > { %6922 = vmatpush3.bf16.msra.mxu1 %v6921_v0  ;;  %v6935_v0 = vpack.c.bf16 %v4958_v44, %v4957_v32  ;;  %v4948_v32 = vld [vmem:[%s9461_s3 + $0x258] sm:$0xff] }
 0x5dd   : > { %6890 = vmatpush3.bf16.msra.mxu0 %v6889_v60  ;;  %6924 = vmatprep.subr.bf16.mxu1 %v6923_v1  ;;  %v5156_v55 = vcombine.high %v5154_v19, %v5154_v19  ;;  %v4826_v60 = vcombine.low %v4818_v46, %v4825_v17  ;;  %v4959_v1 = vld [vmem:[%s9461_s3 + $0x2b0] sm:$0xff]  ;;  %v6973_v46 = vpack.c.bf16 %v4976_v51, %v4975_v30 }
 0x5de   : > { %6892 = vmatprep.subr.bf16.mxu0 %v6891_v4  ;;  %5288 = vmatprep.mubr.f32.mxu0 %v5155_v47  ;;  %v4941_v4 = vld [vmem:[%s9461_s3 + $0x220] sm:$0xff]  ;;  %v6939_v15 = vpack.c.bf16 %v4960_v7, %v4959_v1  ;;  %v4963_v17 = vld [vmem:[%s9461_s3 + $0x2d0] sm:$0xff]  ;;  %v4964_v47 = vld [vmem:[%s9461_s3 + $0x2d8] sm:$0xff] }
 0x5df   : > { %5358 = vmatprep.mubr.f32.mxu1 %v5156_v55  ;;  %v4866_v12 = vadd.f32 %v4826_v60, %v4722_v8  ;;  %v6937_v40 = vpack.c.bf16 %v4942_v5, %v4941_v4  ;;  %v6947_v55 = vpack.c.bf16 %v4964_v47, %v4963_v17  ;;  %v4979_v60 = vld [vmem:[%s9461_s3 + $0x350] sm:$0xff]  ;;  %v4949_v5 = vld [vmem:[%s9461_s3 + $0x260] sm:$0xff]  ;;  %v4968_v8 = vld [vmem:[%s9461_s3 + $0x2f8] sm:$0xff] }
 0x5e0   : > { %6926 = vmatpush3.bf16.msra.mxu1 %v6925_v23  ;;  %v4967_v7 = vld [vmem:[%s9461_s3 + $0x2f0] sm:$0xff]  ;;  %v5033_v47 = vld [vmem:[%s9461_s3 + $0x500] sm:$0xff] }
 0x5e1   : > { %6894 = vmatpush3.bf16.msra.mxu0 %v6893_v11  ;;  %6960 = vmatprep.subr.bf16.mxu1 %v6959_v28  ;;  %v4974_v11 = vld [vmem:[%s9461_s3 + $0x328] sm:$0xff]  ;;  %v4870_v26 = vmax.f32 %v4866_v12, 0.0  ;;  %v6971_v28 = vpack.c.bf16 %v4992_v14, %v4991_v13  ;;  %v4999_v13 = vld [vmem:[%s9461_s3 + $0x3f0] sm:$0xff]  ;;  %v5000_v14 = vld [vmem:[%s9461_s3 + $0x3f8] sm:$0xff] }
 0x5e2   : > { %6928 = vmatprep.subr.bf16.mxu0 %v6927_v27  ;;  %v6969_v23 = vpack.c.bf16 %v4974_v11, %v4973_v10  ;;  %v4962_v27 = vld [vmem:[%s9461_s3 + $0x2c8] sm:$0xff]  ;;  %v4981_v10 = vld [vmem:[%s9461_s3 + $0x360] sm:$0xff] }
 0x5e3   : > { %5359 = vmatmul.mubr.f32.vlgmr.msra.gmra.mrb[0].mxu1 %v5154_v19  ;;  %v8848_v33 = vrot.slane %v4870_v26, %v8525_v25  ;;  %v5157_v34 = vcombine.high %v4870_v26, %v4870_v26  ;;  %v6943_v38 = vpack.c.bf16 %v4962_v27, %v4961_v24  ;;  %v4982_v11 = vld [vmem:[%s9461_s3 + $0x368] sm:$0xff]  ;;  %v6987_v24 = vpack.c.bf16 %v5000_v14, %v4999_v13  ;;  %v4983_v27 = vld [vmem:[%s9461_s3 + $0x370] sm:$0xff]  ;;  %v5056_v13 = vld [vmem:[%s9461_s3 + $0x5b8] sm:$0xff] }
 0x5e4   : > { %5289 = vmatmul.mubr.f32.vlgmr.msra.gmra.mrb[0].mxu0 %v5147_v37  ;;  %6962 = vmatpush3.bf16.msra.mxu1 %v6961_v56  ;;  %v4994_v37 = vld [vmem:[%s9461_s3 + $0x3c8] sm:$0xff]  ;;  %v4947_v56 = vld [vmem:[%s9461_s3 + $0x250] sm:$0xff] }
 0x5e5   : > { %6930 = vmatpush3.bf16.msra.mxu0 %v6929_v49  ;;  %6964 = vmatprep.subr.bf16.mxu1 %v6963_v58  ;;  %v5172_v43 = vcombine.high %v8848_v33, %v8848_v33  ;;  %v8865_v45 = vrot.slane %v5157_v34, %v8525_v25  ;;  %v6975_v19 = vpack.c.bf16 %v4994_v37, %v4993_v36  ;;  %v4977_v49 = vld [vmem:[%s9461_s3 + $0x340] sm:$0xff]  ;;  %v5018_v26 = vld [vmem:[%s9461_s3 + $0x488] sm:$0xff] }
 0x5e6   : > { %6932 = vmatprep.subr.bf16.mxu0 %v6931_v53  ;;  %v6945_v53 = vpack.c.bf16 %v4946_v42, %v4945_v39  ;;  %v6977_v44 = vpack.c.bf16 %v4978_v22, %v4977_v49  ;;  %v4965_v58 = vld [vmem:[%s9461_s3 + $0x2e0] sm:$0xff]  ;;  %v6949_v63 = vpack.c.bf16 %v4948_v32, %v4947_v56  ;;  %v6991_v51 = vpack.c.bf16 %v5018_v26, %v5017_v16  ;;  %v8962_v36 = vld [vmem:[%s9462_s0 + $0x8] sm:$0xff]  ;;  %v5052_v49 = vld [vmem:[%s9461_s3 + $0x598] sm:$0xff] }
 0x5e7   : > { %5428 = vmatprep.mubr.f32.mxu0 %v5172_v43  ;;  %v5173_v52 = vcombine.high %v8865_v45, %v8865_v45  ;;  %v6951_v4 = vpack.c.bf16 %v4966_v3, %v4965_v58  ;;  %v5049_v34 = vld [vmem:[%s9461_s3 + $0x580] sm:$0xff]  ;;  %v4764_v39 = vrot.slane %v8962_v36, %v7971_v18  ;;  %v4768_v42 = vrot.slane %v8962_v36, %v7977_v20  ;;  %v5020_v18 = vld [vmem:[%s9461_s3 + $0x498] sm:$0xff] }
 0x5e8   : > { %6966 = vmatpush3.bf16.msra.mxu1 %v6965_v6  ;;  %v4950_v6 = vld [vmem:[%s9461_s3 + $0x268] sm:$0xff]  ;;  %v5001_v37 = vld [vmem:[%s9461_s3 + $0x400] sm:$0xff]  ;;  %v4772_v43 = vrot.slane %v8962_v36, %v8031_v29  ;;  %v5051_v29 = vld [vmem:[%s9461_s3 + $0x590] sm:$0xff] }
 0x5e9   : > { %6934 = vmatpush3.bf16.msra.mxu0 %v6933_v61  ;;  %6968 = vmatprep.subr.bf16.mxu1 %v6967_v9  ;;  %v4980_v61 = vld [vmem:[%s9461_s3 + $0x358] sm:$0xff]  ;;  %v6953_v12 = vpack.c.bf16 %v4950_v6, %v4949_v5  ;;  %v4827_v22 = vcombine.low %v4764_v39, %v4768_v42  ;;  %v7027_v58 = vpack.c.bf16 %v5052_v49, %v5051_v29  ;;  %v5021_v3 = vld [vmem:[%s9461_s3 + $0x4a0] sm:$0xff]  ;;  %v5054_v6 = vld [vmem:[%s9461_s3 + $0x5a8] sm:$0xff] }
 0x5ea   : > { %6936 = vmatprep.subr.bf16.mxu0 %v6935_v0  ;;  %5498 = vmatprep.mubr.f32.mxu1 %v5173_v52  ;;  %v4998_v0 = vld [vmem:[%s9461_s3 + $0x3e8] sm:$0xff]  ;;  %v6981_v1 = vpack.c.bf16 %v4980_v61, %v4979_v60  ;;  %v4723_v60 = vld [vmem:[#allocation2 + $0x10] sm:$0xff]  ;;  %v4780_v61 = vrot.slane %v8962_v36, %v8137_v31  ;;  %v4788_v5 = vrot.slane %v8962_v36, %v7997_v48  ;;  %v5005_v48 = vld [vmem:[%s9461_s3 + $0x420] sm:$0xff] }
 0x5eb   : > { %v6983_v9 = vpack.c.bf16 %v4998_v0, %v4997_v41  ;;  %v4835_v56 = vrot.slane %v4827_v22, %v8525_v25  ;;  %v5035_v41 = vld [vmem:[%s9461_s3 + $0x510] sm:$0xff]  ;;  %v5036_v0 = vld [vmem:[%s9461_s3 + $0x518] sm:$0xff]  ;;  %v4792_v31 = vrot.slane %v8962_v36, %v8001_v50  ;;  %v5006_v50 = vld [vmem:[%s9461_s3 + $0x428] sm:$0xff] }
 0x5ec   : > { %6970 = vmatpush3.bf16.msra.mxu1 %v6969_v23  ;;  %v6985_v23 = vpack.c.bf16 %v4982_v11, %v4981_v10  ;;  %v5024_v10 = vld [vmem:[%s9461_s3 + $0x4b8] sm:$0xff]  ;;  %v7001_v16 = vpack.c.bf16 %v5006_v50, %v5005_v48  ;;  %v5027_v49 = vld [vmem:[%s9461_s3 + $0x4d0] sm:$0xff]  ;;  %v5014_v48 = vld [vmem:[%s9461_s3 + $0x468] sm:$0xff] }
 0x5ed   : > { %6938 = vmatpush3.bf16.msra.mxu0 %v6937_v40  ;;  %6972 = vmatprep.subr.bf16.mxu1 %v6971_v28  ;;  %v4951_v40 = vld [vmem:[%s9461_s3 + $0x270] sm:$0xff]  ;;  %v4984_v28 = vld [vmem:[%s9461_s3 + $0x378] sm:$0xff] }
 0x5ee   : > { %6940 = vmatprep.subr.bf16.mxu0 %v6939_v15  ;;  %v6955_v15 = vpack.c.bf16 %v4968_v8, %v4967_v7  ;;  %v6957_v30 = vpack.c.bf16 %v4952_v2, %v4951_v40  ;;  %v6989_v17 = vpack.c.bf16 %v4984_v28, %v4983_v27  ;;  %v7029_v8 = vpack.c.bf16 %v5036_v0, %v5035_v41  ;;  %v5055_v40 = vld [vmem:[%s9461_s3 + $0x5b0] sm:$0xff]  ;;  %v5028_v22 = vld [vmem:[%s9461_s3 + $0x4d8] sm:$0xff] }
 0x5ef   : > { %v4845_v2 = vcombine.low %v4788_v5, %v4792_v31  ;;  %v5043_v0 = vld [vmem:[%s9461_s3 + $0x550] sm:$0xff] }
 0x5f0   : > { %6974 = vmatpush3.bf16.msra.mxu1 %v6973_v46  ;;  %v4776_v46 = vrot.slane %v8962_v36, %v7980_v21  ;;  %v5034_v21 = vld [vmem:[%s9461_s3 + $0x508] sm:$0xff] }
 0x5f1   : > { %6942 = vmatpush3.bf16.msra.mxu0 %v6941_v35  ;;  %6976 = vmatprep.subr.bf16.mxu1 %v6975_v19  ;;  %v5050_v35 = vld [vmem:[%s9461_s3 + $0x588] sm:$0xff]  ;;  %v5019_v19 = vld [vmem:[%s9461_s3 + $0x490] sm:$0xff] }
 0x5f2   : > { %6944 = vmatprep.subr.bf16.mxu0 %v6943_v38  ;;  %v5002_v38 = vld [vmem:[%s9461_s3 + $0x408] sm:$0xff]  ;;  %v7023_v20 = vpack.c.bf16 %v5050_v35, %v5049_v34  ;;  %v4828_v52 = vcombine.low %v4772_v43, %v4776_v46  ;;  %v6995_v62 = vpack.c.bf16 %v5020_v18, %v5019_v19  ;;  %v5025_v34 = vld [vmem:[%s9461_s3 + $0x4c0] sm:$0xff]  ;;  %v4859_v43 = vrot.slane %v4845_v2, %v8525_v25  ;;  %v5016_v2 = vld [vmem:[%s9461_s3 + $0x478] sm:$0xff] }
 0x5f3   : > { %v5026_v35 = vld [vmem:[%s9461_s3 + $0x4c8] sm:$0xff]  ;;  %v5009_v18 = vld [vmem:[%s9461_s3 + $0x440] sm:$0xff] }
 0x5f4   : > { %6978 = vmatpush3.bf16.msra.mxu1 %v6977_v44  ;;  %v4842_v32 = vrot.slane %v4828_v52, %v8525_v25  ;;  %v7025_v44 = vpack.c.bf16 %v5034_v21, %v5033_v47  ;;  %v5058_v47 = vld [vmem:[%s9461_s3 + $0x5c8] sm:$0xff]  ;;  %v7007_v19 = vpack.c.bf16 %v5026_v35, %v5025_v34  ;;  %v5113_v35 = vld [vmem:[%s9461_s3 + $0x780] sm:$0xff] }
 0x5f5   : > { %6946 = vmatpush3.bf16.msra.mxu0 %v6945_v53  ;;  %6980 = vmatprep.subr.bf16.mxu1 %v6979_v59  ;;  %v6993_v53 = vpack.c.bf16 %v5002_v38, %v5001_v37  ;;  %v5022_v59 = vld [vmem:[%s9461_s3 + $0x4a8] sm:$0xff]  ;;  %v5040_v37 = vld [vmem:[%s9461_s3 + $0x538] sm:$0xff] }
 0x5f6   : > { %6948 = vmatprep.subr.bf16.mxu0 %v6947_v55  ;;  %v5004_v55 = vld [vmem:[%s9461_s3 + $0x418] sm:$0xff] }
 0x5f8   : > { %6982 = vmatpush3.bf16.msra.mxu1 %v6981_v1  ;;  %v6999_v1 = vpack.c.bf16 %v5022_v59, %v5021_v3  ;;  %v5012_v3 = vld [vmem:[%s9461_s3 + $0x458] sm:$0xff] }
 0x5f9   : > { %6950 = vmatpush3.bf16.msra.mxu0 %v6949_v63  ;;  %6984 = vmatprep.subr.bf16.mxu1 %v6983_v9  ;;  %v4784_v63 = vrot.slane %v8962_v36, %v8059_v57  ;;  %v6997_v57 = vpack.c.bf16 %v5004_v55, %v5003_v54  ;;  %v5037_v9 = vld [vmem:[%s9461_s3 + $0x520] sm:$0xff]  ;;  %v5039_v36 = vld [vmem:[%s9461_s3 + $0x530] sm:$0xff] }
 0x5fa   : > { %6952 = vmatprep.subr.bf16.mxu0 %v6951_v4  ;;  %v4843_v4 = vcombine.low %v4835_v56, %v4842_v32  ;;  %v7037_v29 = vpack.c.bf16 %v5040_v37, %v5039_v36  ;;  %v5059_v56 = vld [vmem:[%s9461_s3 + $0x5d0] sm:$0xff]  ;;  %v5060_v32 = vld [vmem:[%s9461_s3 + $0x5d8] sm:$0xff]  ;;  %v5114_v36 = vld [vmem:[%s9461_s3 + $0x788] sm:$0xff] }
 0x5fb   : > { %v7043_v41 = vpack.c.bf16 %v5060_v32, %v5059_v56  ;;  %v5086_v56 = vld [vmem:[%s9461_s3 + $0x6a8] sm:$0xff] }
 0x5fc   : > { %6986 = vmatpush3.bf16.msra.mxu1 %v6985_v23  ;;  %v4867_v7 = vadd.f32 %v4843_v4, %v4723_v60  ;;  %v5007_v23 = vld [vmem:[%s9461_s3 + $0x430] sm:$0xff]  ;;  %v5029_v60 = vld [vmem:[%s9461_s3 + $0x4e0] sm:$0xff]  ;;  %v5044_v4 = vld [vmem:[%s9461_s3 + $0x558] sm:$0xff] }
 0x5fd   : > { %6954 = vmatpush3.bf16.msra.mxu0 %v6953_v12  ;;  %6988 = vmatprep.subr.bf16.mxu1 %v6987_v24  ;;  %v5038_v12 = vld [vmem:[%s9461_s3 + $0x528] sm:$0xff]  ;;  %v5008_v24 = vld [vmem:[%s9461_s3 + $0x438] sm:$0xff]  ;;  %v7045_v50 = vpack.c.bf16 %v5044_v4, %v5043_v0  ;;  %v5087_v4 = vld [vmem:[%s9461_s3 + $0x6b0] sm:$0xff] }
 0x5fe   : > { %6956 = vmatprep.subr.bf16.mxu0 %v6955_v15  ;;  %v4871_v14 = vmax.f32 %v4867_v7, 0.0  ;;  %v4844_v15 = vcombine.low %v4780_v61, %v4784_v63  ;;  %v7005_v46 = vpack.c.bf16 %v5008_v24, %v5007_v23  ;;  %v5030_v61 = vld [vmem:[%s9461_s3 + $0x4e8] sm:$0xff]  ;;  %v4724_v63 = vld [vmem:[#allocation2 + $0x18] sm:$0xff]  ;;  %v5031_v7 = vld [vmem:[%s9461_s3 + $0x4f0] sm:$0xff] }
 0x5ff   : > { %v5082_v23 = vld [vmem:[%s9461_s3 + $0x688] sm:$0xff] }
 0x600   : > { %6990 = vmatpush3.bf16.msra.mxu1 %v6989_v17  ;;  %v9063_v27 = vrot.slane %v4871_v14, %v8525_v25  ;;  %v5174_v28 = vcombine.high %v4871_v14, %v4871_v14  ;;  %v4852_v42 = vrot.slane %v4844_v15, %v8525_v25  ;;  %v5057_v17 = vld [vmem:[%s9461_s3 + $0x5c0] sm:$0xff]  ;;  %v5015_v15 = vld [vmem:[%s9461_s3 + $0x470] sm:$0xff] }
 0x601   : > { %6958 = vmatpush3.bf16.msra.mxu0 %v6957_v30  ;;  %7024 = vmatprep.subr.bf16.mxu1 %v7023_v20  ;;  %v7033_v30 = vpack.c.bf16 %v5038_v12, %v5037_v9  ;;  %v5010_v20 = vld [vmem:[%s9461_s3 + $0x448] sm:$0xff]  ;;  %v7039_v52 = vpack.c.bf16 %v5058_v47, %v5057_v17  ;;  %v7021_v34 = vpack.c.bf16 %v5016_v2, %v5015_v15  ;;  %v5083_v17 = vld [vmem:[%s9461_s3 + $0x690] sm:$0xff]  ;;  %v5084_v47 = vld [vmem:[%s9461_s3 + $0x698] sm:$0xff] }
 0x602   : > { %6992 = vmatprep.subr.bf16.mxu0 %v6991_v51  ;;  %v7035_v51 = vpack.c.bf16 %v5056_v13, %v5055_v40  ;;  %v5189_v38 = vcombine.high %v9063_v27, %v9063_v27  ;;  %v9080_v39 = vrot.slane %v5174_v28, %v8525_v25  ;;  %v4860_v54 = vcombine.low %v4852_v42, %v4859_v43  ;;  %v5063_v40 = vld [vmem:[%s9461_s3 + $0x5f0] sm:$0xff]  ;;  %v5064_v13 = vld [vmem:[%s9461_s3 + $0x5f8] sm:$0xff]  ;;  %v5065_v42 = vld [vmem:[%s9461_s3 + $0x600] sm:$0xff] }
 0x603   : > { %5499 = vmatmul.mubr.f32.vlgmr.msra.gmra.mrb[2].mxu1 %v8865_v45  ;;  %v5023_v45 = vld [vmem:[%s9461_s3 + $0x4b0] sm:$0xff]  ;;  %v7009_v55 = vpack.c.bf16 %v5010_v20, %v5009_v18  ;;  %v7051_v28 = vpack.c.bf16 %v5064_v13, %v5063_v40  ;;  %v5066_v43 = vld [vmem:[%s9461_s3 + $0x608] sm:$0xff]  ;;  %v7087_v18 = vpack.c.bf16 %v5114_v36, %v5113_v35  ;;  %v5097_v20 = vld [vmem:[%s9461_s3 + $0x700] sm:$0xff] }
 0x604   : > { %5429 = vmatmul.mubr.f32.vlgmr.msra.gmra.mrb[2].mxu0 %v8848_v33  ;;  %v5053_v33 = vld [vmem:[%s9461_s3 + $0x5a0] sm:$0xff]  ;;  %7026 = vmatpush3.bf16.msra.mxu1 %v7025_v44  ;;  %v7003_v26 = vpack.c.bf16 %v5024_v10, %v5023_v45  ;;  %v5190_v21 = vcombine.high %v9080_v39, %v9080_v39  ;;  %v7011_v44 = vpack.c.bf16 %v5028_v22, %v5027_v49  ;;  %v5115_v49 = vld [vmem:[%s9461_s3 + $0x790] sm:$0xff]  ;;  %v5124_v36 = vld [vmem:[%s9461_s3 + $0x7d8] sm:$0xff] }
 0x605   : > { %6994 = vmatpush3.bf16.msra.mxu0 %v6993_v53  ;;  %7028 = vmatprep.subr.bf16.mxu1 %v7027_v58  ;;  %v7031_v11 = vpack.c.bf16 %v5054_v6, %v5053_v33  ;;  %v5041_v53 = vld [vmem:[%s9461_s3 + $0x540] sm:$0xff]  ;;  %v5011_v58 = vld [vmem:[%s9461_s3 + $0x450] sm:$0xff]  ;;  %v4868_v5 = vadd.f32 %v4860_v54, %v4724_v63  ;;  %v5062_v33 = vld [vmem:[%s9461_s3 + $0x5e8] sm:$0xff]  ;;  %v7015_v6 = vpack.c.bf16 %v5030_v61, %v5029_v60 }
 0x606   : > { %6996 = vmatprep.subr.bf16.mxu0 %v6995_v62  ;;  %5568 = vmatprep.mubr.f32.mxu0 %v5189_v38  ;;  %v5042_v62 = vld [vmem:[%s9461_s3 + $0x548] sm:$0xff]  ;;  %v7013_v31 = vpack.c.bf16 %v5012_v3, %v5011_v58  ;;  %v5045_v10 = vld [vmem:[%s9461_s3 + $0x560] sm:$0xff]  ;;  %v5099_v58 = vld [vmem:[%s9461_s3 + $0x710] sm:$0xff] }
 0x607   : > { %5638 = vmatprep.mubr.f32.mxu1 %v5190_v21  ;;  %v7041_v59 = vpack.c.bf16 %v5042_v62, %v5041_v53  ;;  %v4872_v9 = vmax.f32 %v4868_v5, 0.0  ;;  %v5098_v21 = vld [vmem:[%s9461_s3 + $0x708] sm:$0xff]  ;;  %v5067_v53 = vld [vmem:[%s9461_s3 + $0x610] sm:$0xff]  ;;  %v5068_v62 = vld [vmem:[%s9461_s3 + $0x618] sm:$0xff] }
 0x608   : > { %7030 = vmatpush3.bf16.msra.mxu1 %v7029_v8  ;;  %v5032_v8 = vld [vmem:[%s9461_s3 + $0x4f8] sm:$0xff]  ;;  %v7089_v54 = vpack.c.bf16 %v5098_v21, %v5097_v20  ;;  %v5117_v60 = vld [vmem:[%s9461_s3 + $0x7a0] sm:$0xff]  ;;  %v5123_v35 = vld [vmem:[%s9461_s3 + $0x7d0] sm:$0xff] }
 0x609   : > { %6998 = vmatpush3.bf16.msra.mxu0 %v6997_v57  ;;  %7032 = vmatprep.subr.bf16.mxu1 %v7031_v11  ;;  %v5061_v57 = vld [vmem:[%s9461_s3 + $0x5e0] sm:$0xff]  ;;  %v5046_v11 = vld [vmem:[%s9461_s3 + $0x568] sm:$0xff]  ;;  %v7019_v14 = vpack.c.bf16 %v5032_v8, %v5031_v7  ;;  %v5191_v24 = vcombine.high %v4872_v9, %v4872_v9  ;;  %v9189_v37 = vrot.slane %v4872_v9, %v8525_v25  ;;  %v5100_v3 = vld [vmem:[%s9461_s3 + $0x718] sm:$0xff] }
 0x60a   : > { %7000 = vmatprep.subr.bf16.mxu0 %v6999_v1  ;;  %v5013_v1 = vld [vmem:[%s9461_s3 + $0x460] sm:$0xff]  ;;  %v7047_v45 = vpack.c.bf16 %v5062_v33, %v5061_v57  ;;  %v7093_v0 = vpack.c.bf16 %v5100_v3, %v5099_v58  ;;  %v5102_v57 = vld [vmem:[%s9461_s3 + $0x728] sm:$0xff]  ;;  %v5072_v7 = vld [vmem:[%s9461_s3 + $0x638] sm:$0xff] }
 0x60b   : > { %v7017_v12 = vpack.c.bf16 %v5014_v48, %v5013_v1  ;;  %v5206_v22 = vcombine.high %v9189_v37, %v9189_v37  ;;  %v5069_v63 = vld [vmem:[%s9461_s3 + $0x620] sm:$0xff]  ;;  %v5120_v1 = vld [vmem:[%s9461_s3 + $0x7b8] sm:$0xff]  ;;  %v5107_v20 = vld [vmem:[%s9461_s3 + $0x750] sm:$0xff] }
 0x60c   : > { %7034 = vmatpush3.bf16.msra.mxu1 %v7033_v30  ;;  %v5047_v30 = vld [vmem:[%s9461_s3 + $0x570] sm:$0xff]  ;;  %v5089_v9 = vld [vmem:[%s9461_s3 + $0x6c0] sm:$0xff]  ;;  %v5108_v21 = vld [vmem:[%s9461_s3 + $0x758] sm:$0xff] }
 0x60d   : > { %7002 = vmatpush3.bf16.msra.mxu0 %v7001_v16  ;;  %7036 = vmatprep.subr.bf16.mxu1 %v7035_v51  ;;  %v7049_v16 = vpack.c.bf16 %v5046_v11, %v5045_v10  ;;  %v5048_v51 = vld [vmem:[%s9461_s3 + $0x578] sm:$0xff]  ;;  %v5103_v11 = vld [vmem:[%s9461_s3 + $0x730] sm:$0xff]  ;;  %v5121_v13 = vld [vmem:[%s9461_s3 + $0x7c0] sm:$0xff] }
 0x60e   : > { %7004 = vmatprep.subr.bf16.mxu0 %v7003_v26  ;;  %v5081_v26 = vld [vmem:[%s9461_s3 + $0x680] sm:$0xff]  ;;  %v5127_v3 = vld [vmem:[%s9461_s3 + $0x7f0] sm:$0xff] }
 0x60f   : > { %v7055_v38 = vpack.c.bf16 %v5082_v23, %v5081_v26  ;;  %v5073_v2 = vld [vmem:[%s9461_s3 + $0x640] sm:$0xff]  ;;  %v5091_v23 = vld [vmem:[%s9461_s3 + $0x6d0] sm:$0xff] }
 0x610   : > { %7038 = vmatpush3.bf16.msra.mxu1 %v7037_v29  ;;  %v7057_v29 = vpack.c.bf16 %v5066_v43, %v5065_v42  ;;  %v5075_v42 = vld [vmem:[%s9461_s3 + $0x650] sm:$0xff]  ;;  %v5076_v43 = vld [vmem:[%s9461_s3 + $0x658] sm:$0xff] }
 0x611   : > { %7006 = vmatpush3.bf16.msra.mxu0 %v7005_v46  ;;  %7040 = vmatprep.subr.bf16.mxu1 %v7039_v52  ;;  %v7053_v46 = vpack.c.bf16 %v5048_v51, %v5047_v30  ;;  %v7059_v52 = vpack.c.bf16 %v5084_v47, %v5083_v17  ;;  %v5105_v30 = vld [vmem:[%s9461_s3 + $0x740] sm:$0xff]  ;;  %v5106_v51 = vld [vmem:[%s9461_s3 + $0x748] sm:$0xff] }
 0x612   : > { %7008 = vmatprep.subr.bf16.mxu0 %v7007_v19  ;;  %v9204_v19 = vrot.slane %v5191_v24, %v8525_v25  ;;  %v5116_v25 = vld [vmem:[%s9461_s3 + $0x798] sm:$0xff]  ;;  %v5093_v17 = vld [vmem:[%s9461_s3 + $0x6e0] sm:$0xff]  ;;  %v5094_v47 = vld [vmem:[%s9461_s3 + $0x6e8] sm:$0xff] }
 0x613   : > { %v5092_v24 = vld [vmem:[%s9461_s3 + $0x6d8] sm:$0xff] }
 0x614   : > { %7042 = vmatpush3.bf16.msra.mxu1 %v7041_v59  ;;  %v5207_v32 = vcombine.high %v9204_v19, %v9204_v19  ;;  %v7061_v59 = vpack.c.bf16 %v5068_v62, %v5067_v53  ;;  %v5078_v53 = vld [vmem:[%s9461_s3 + $0x668] sm:$0xff]  ;;  %v7109_v62 = vpack.c.bf16 %v5108_v21, %v5107_v20 }
 0x615   : > { %7010 = vmatpush3.bf16.msra.mxu0 %v7009_v55  ;;  %7044 = vmatprep.subr.bf16.mxu1 %v7043_v41  ;;  %v5085_v55 = vld [vmem:[%s9461_s3 + $0x6a0] sm:$0xff]  ;;  %v5070_v41 = vld [vmem:[%s9461_s3 + $0x628] sm:$0xff] }
 0x616   : > { %7012 = vmatprep.subr.bf16.mxu0 %v7011_v44  ;;  %v7091_v44 = vpack.c.bf16 %v5116_v25, %v5115_v49  ;;  %v7063_v61 = vpack.c.bf16 %v5086_v56, %v5085_v55  ;;  %v7065_v33 = vpack.c.bf16 %v5070_v41, %v5069_v63  ;;  %v5125_v49 = vld [vmem:[%s9461_s3 + $0x7e0] sm:$0xff]  ;;  %v5126_v25 = vld [vmem:[%s9461_s3 + $0x7e8] sm:$0xff]  ;;  %v5096_v55 = vld [vmem:[%s9461_s3 + $0x6f8] sm:$0xff] }
 0x617   : > { %v7111_v56 = vpack.c.bf16 %v5126_v25, %v5125_v49 }
 0x618   : > { %7046 = vmatpush3.bf16.msra.mxu1 %v7045_v50  ;;  %v5071_v50 = vld [vmem:[%s9461_s3 + $0x630] sm:$0xff] }
 0x619   : > { %7014 = vmatpush3.bf16.msra.mxu0 %v7013_v31  ;;  %7048 = vmatprep.subr.bf16.mxu1 %v7047_v45  ;;  %v5101_v31 = vld [vmem:[%s9461_s3 + $0x720] sm:$0xff]  ;;  %v5090_v45 = vld [vmem:[%s9461_s3 + $0x6c8] sm:$0xff]  ;;  %v7069_v40 = vpack.c.bf16 %v5072_v7, %v5071_v50 }
 0x61a   : > { %7016 = vmatprep.subr.bf16.mxu0 %v7015_v6  ;;  %v5119_v6 = vld [vmem:[%s9461_s3 + $0x7b0] sm:$0xff]  ;;  %v7097_v8 = vpack.c.bf16 %v5102_v57, %v5101_v31  ;;  %v7071_v15 = vpack.c.bf16 %v5090_v45, %v5089_v9  ;;  %v6403_v57 = vld [vmem:[%s9463_s15] ss:$0 sm:$0xff] }
 0x61b   : > { %v7099_v10 = vpack.c.bf16 %v5120_v1, %v5119_v6 }
 0x61c   : > { %7050 = vmatpush3.bf16.msra.mxu1 %v7049_v16  ;;  %v5074_v16 = vld [vmem:[%s9461_s3 + $0x648] sm:$0xff] }
 0x61d   : > { %7018 = vmatpush3.bf16.msra.mxu0 %v7017_v12  ;;  %7052 = vmatprep.subr.bf16.mxu1 %v7051_v28  ;;  %v5104_v12 = vld [vmem:[%s9461_s3 + $0x738] sm:$0xff] }
 0x61e   : > { %7020 = vmatprep.subr.bf16.mxu0 %v7019_v14  ;;  %v5122_v14 = vld [vmem:[%s9461_s3 + $0x7c8] sm:$0xff]  ;;  %v7101_v26 = vpack.c.bf16 %v5104_v12, %v5103_v11 }
 0x61f   : > { %v7103_v28 = vpack.c.bf16 %v5122_v14, %v5121_v13 }
 0x620   : > { %7054 = vmatpush3.bf16.msra.mxu1 %v7053_v46  ;;  %v7105_v46 = vpack.c.bf16 %v5106_v51, %v5105_v30 }
 0x621   : > { %7022 = vmatpush3.bf16.msra.mxu0 %v7021_v34  ;;  %7088 = vmatprep.subr.bf16.mxu1 %v7087_v18  ;;  %v7073_v34 = vpack.c.bf16 %v5074_v16, %v5073_v2  ;;  %v7107_v18 = vpack.c.bf16 %v5124_v36, %v5123_v35 }
 0x622   : > { %7056 = vmatprep.subr.bf16.mxu0 %v7055_v38  ;;  %v7075_v38 = vpack.c.bf16 %v5092_v24, %v5091_v23 }
 0x623   : > { %5639 = vmatmul.mubr.f32.vlgmr.msra.gmra.mrb[4].mxu1 %v9080_v39  ;;  %v5088_v39 = vld [vmem:[%s9461_s3 + $0x6b8] sm:$0xff] }
 0x624   : > { %5569 = vmatmul.mubr.f32.vlgmr.msra.gmra.mrb[4].mxu0 %v9063_v27  ;;  %v5118_v27 = vld [vmem:[%s9461_s3 + $0x7a8] sm:$0xff]  ;;  %7090 = vmatpush3.bf16.msra.mxu1 %v7089_v54  ;;  %v7067_v48 = vpack.c.bf16 %v5088_v39, %v5087_v4  ;;  %v5095_v54 = vld [vmem:[%s9461_s3 + $0x6f0] sm:$0xff]  ;;  %v5112_v4 = vld [vmem:[%s9461_s3 + $0x778] sm:$0xff] }
 0x625   : > { %7058 = vmatpush3.bf16.msra.mxu0 %v7057_v29  ;;  %5708 = vmatprep.mubr.f32.mxu0 %v5206_v22  ;;  %v7095_v5 = vpack.c.bf16 %v5118_v27, %v5117_v60  ;;  %v7077_v29 = vpack.c.bf16 %v5076_v43, %v5075_v42  ;;  %v7079_v22 = vpack.c.bf16 %v5094_v47, %v5093_v17  ;;  %v5079_v27 = vld [vmem:[%s9461_s3 + $0x670] sm:$0xff] }
 0x626   : > { %7060 = vmatprep.subr.bf16.mxu0 %v7059_v52  ;;  %5778 = vmatprep.mubr.f32.mxu1 %v5207_v32  ;;  %v5077_v52 = vld [vmem:[%s9461_s3 + $0x660] sm:$0xff]  ;;  %v7083_v60 = vpack.c.bf16 %v5096_v55, %v5095_v54 }
 0x627   : > { %7092 = vmatprep.subr.bf16.mxu1 %v7091_v44  ;;  %v5109_v32 = vld [vmem:[%s9461_s3 + $0x760] sm:$0xff]  ;;  %v5110_v44 = vld [vmem:[%s9461_s3 + $0x768] sm:$0xff]  ;;  %v7081_v58 = vpack.c.bf16 %v5078_v53, %v5077_v52 }
 0x628   : > { %7094 = vmatpush3.bf16.msra.mxu1 %v7093_v0  ;;  %v7113_v63 = vpack.c.bf16 %v5110_v44, %v5109_v32  ;;  %v5111_v0 = vld [vmem:[%s9461_s3 + $0x770] sm:$0xff] }
 0x629   : > { %7062 = vmatpush3.bf16.msra.mxu0 %v7061_v59  ;;  %7096 = vmatprep.subr.bf16.mxu1 %v7095_v5  ;;  %v5128_v59 = vld [vmem:[%s9461_s3 + $0x7f8] sm:$0xff]  ;;  %v7117_v5 = vpack.c.bf16 %v5112_v4, %v5111_v0 }
 0x62a   : > { %7064 = vmatprep.subr.bf16.mxu0 %v7063_v61  ;;  %v5080_v61 = vld [vmem:[%s9461_s3 + $0x678] sm:$0xff]  ;;  %v7115_v41 = vpack.c.bf16 %v5128_v59, %v5127_v3 }
 0x62b   : > { %v7085_v39 = vpack.c.bf16 %v5080_v61, %v5079_v27 }
 0x62c   : > { %7098 = vmatpush3.bf16.msra.mxu1 %v7097_v8 }
 0x62d   : > { %7066 = vmatpush3.bf16.msra.mxu0 %v7065_v33  ;;  %7100 = vmatprep.subr.bf16.mxu1 %v7099_v10 }
 0x62e   : > { %7068 = vmatprep.subr.bf16.mxu0 %v7067_v48 }
 0x630   : > { %7102 = vmatpush3.bf16.msra.mxu1 %v7101_v26 }
 0x631   : > { %7070 = vmatpush3.bf16.msra.mxu0 %v7069_v40  ;;  %7104 = vmatprep.subr.bf16.mxu1 %v7103_v28 }
 0x632   : > { %7072 = vmatprep.subr.bf16.mxu0 %v7071_v15 }
 0x634   : > { %7106 = vmatpush3.bf16.msra.mxu1 %v7105_v46 }
 0x635   : > { %7074 = vmatpush3.bf16.msra.mxu0 %v7073_v34  ;;  %7108 = vmatprep.subr.bf16.mxu1 %v7107_v18 }
 0x636   : > { %7076 = vmatprep.subr.bf16.mxu0 %v7075_v38 }
 0x638   : > { %7110 = vmatpush3.bf16.msra.mxu1 %v7109_v62 }
 0x639   : > { %7078 = vmatpush3.bf16.msra.mxu0 %v7077_v29  ;;  %7112 = vmatprep.subr.bf16.mxu1 %v7111_v56 }
 0x63a   : > { %7080 = vmatprep.subr.bf16.mxu0 %v7079_v22 }
 0x63c   : > { %7114 = vmatpush3.bf16.msra.mxu1 %v7113_v63 }
 0x63d   : > { %7082 = vmatpush3.bf16.msra.mxu0 %v7081_v58  ;;  %7116 = vmatprep.subr.bf16.mxu1 %v7115_v41 }
 0x63e   : > { %7084 = vmatprep.subr.bf16.mxu0 %v7083_v60 }
 0x640   : > { %7118 = vmatpush3.bf16.msra.mxu1 %v7117_v5 }
 0x641   : > { %7086 = vmatpush3.bf16.msra.mxu0 %v7085_v39 }
 0x643   : > { %5779 = vmatmul.mubr.f32.vlgmr.msra.gmra.mrb[6].mxu1 %v9204_v19 }
 0x644   : > { %5709 = vmatmul.mubr.f32.vlgmr.msra.gmra.mrb[6].mxu0 %v9189_v37 }
 0x6b6   : > { %v6515_v1 = vpop.f32.mrb[0].mxu1 }
 0x6b7   : > { %v6480_v31 = vpop.f32.mrb[0].mxu0  ;;  %v6516_v48 = vpop.f32.mrb[1].mxu1 }
 0x6b8   : > { %v6481_v33 = vpop.f32.mrb[1].mxu0  ;;  %v6517_v7 = vadd.f32 %v6516_v48, %v6515_v1 }
 0x6b9   : > { %v6482_v6 = vadd.f32 %v6481_v33, %v6480_v31 }
 0x6bb   : > { %v5291_v50 = vadd.f32 %v6482_v6, %v6403_v57 }
 0x6bd   : > { %v5361_v8 = vadd.f32 %v6517_v7, %v5291_v50 }
 0x6d6   : > { %v6585_v11 = vpop.f32.mrb[2].mxu1 }
 0x6d7   : > { %v6550_v9 = vpop.f32.mrb[2].mxu0  ;;  %v6586_v12 = vpop.f32.mrb[3].mxu1 }
 0x6d8   : > { %v6551_v45 = vpop.f32.mrb[3].mxu0  ;;  %v6587_v40 = vadd.f32 %v6586_v12, %v6585_v11 }
 0x6d9   : > { %v6552_v10 = vadd.f32 %v6551_v45, %v6550_v9 }
 0x6db   : > { %v5431_v37 = vadd.f32 %v6552_v10, %v5361_v8 }
 0x6dd   : > { %v5501_v19 = vadd.f32 %v6587_v40, %v5431_v37 }
 0x6f6   : > { %v6655_v2 = vpop.f32.mrb[4].mxu1 }
 0x6f7   : > { %v6620_v13 = vpop.f32.mrb[4].mxu0  ;;  %v6656_v16 = vpop.f32.mrb[5].mxu1 }
 0x6f8   : > { %v6621_v14 = vpop.f32.mrb[5].mxu0  ;;  %v6657_v23 = vadd.f32 %v6656_v16, %v6655_v2 }
 0x6f9   : > { %v6622_v15 = vadd.f32 %v6621_v14, %v6620_v13 }
 0x6fb   : > { %v5571_v26 = vadd.f32 %v6622_v15, %v5501_v19 }
 0x6fd   : > { %v5641_v24 = vadd.f32 %v6657_v23, %v5571_v26 }
 0x716   : > { %v6725_v34 = vpop.f32.mrb[6].mxu1 }
 0x717   : > { %v6690_v28 = vpop.f32.mrb[6].mxu0  ;;  %v6726_v35 = vpop.f32.mrb[7].mxu1 }
 0x718   : > { %v6691_v30 = vpop.f32.mrb[7].mxu0  ;;  %v6727_v38 = vadd.f32 %v6726_v35, %v6725_v34 }
 0x719   : > { %v6692_v51 = vadd.f32 %v6691_v30, %v6690_v28 }
 0x71b   : > { %v5711_v36 = vadd.f32 %v6692_v51, %v5641_v24 }
 0x71d   : > { %v5781_v42 = vadd.f32 %v6727_v38, %v5711_v36 }
 0x71f   : > { %5785 = vst.msk [vmem:[#allocation3] sm:$0x3] %vm5784_vm3, %v5781_v42 }
 0x720 PF: > { %p7151_p6 = scmp.eq.s32.totalorder %s7735_s28, 5  ;;  %s7633_s1 = smov [#allocation3]  }
 0x721   : > { %s5793_s18 = sshll.u32 %s7633_s1, 4  ;;  %s5794_s18 = int_to_ptr.vmem [resolvable:$true] %s5793_s18 }
 0x722   : > { %s7589_s30 = scalar_lea.vmem %s5794_s18, 32  ;;  %p7596_p10 = scmp.lt.s32.totalorder %s5794_s18, %s5794_s18 }
 0x723   : > { %p7590_p7 = scmp.ne.s32.totalorder %s5794_s18, %s7589_s30  ;;  %p7597_p11 = scmp.lt.s32.totalorder %s7589_s30, %s7589_s30 }
 0x725   : > { %p7591_p8 = pnand %p7590_p7, %p7151_p6  ;;  %p7598_p12 = por %p7597_p11, %p7596_p10 }
 0x727   : > { %p7592_p9 = pneg %p7591_p8 }
 0x729   : > { %p7599_p13 = pnand %p7598_p12, %p7592_p9 }
 0x72b   : > { %7602 = shalt.err (!%p7599_p13)
}
 0x72c   : > { %s9464_s16 = sld [smem:[#allocation18_spill]] }
 0x732   : > { %s7603_s24 = scalar_lea.hbm %s9464_s16, 32 }
 0x733   : > { %p7604_p0 = scmp.ne.s32.totalorder %s9464_s16, %s7603_s24  ;;  %p7609_p3 = scmp.lt.u32.totalorder %s7603_s24, %s9464_s16 }
 0x735   : > { %p7605_p1 = pnand %p7604_p0, %p7151_p6 }
 0x737   : > { %p7606_p2 = pneg %p7605_p1 }
 0x739   : > { %p7611_p4 = pnand %p7609_p3, %p7606_p2 }
 0x73b   : > { %7614 = shalt.err (!%p7611_p4)
}
 0x73c   : > { %7148 = dma.vmem_to_hbm [thread:$0]  (%p7151_p6), %s5794_s18, 32, %s9464_s16, [#allocation4]  }
 0x73d   : > { %7620 = dma.done.wait (%p7151_p6), [#allocation4], 32  }
 0x73e   : > { %7622 = vsyncadd (%p7151_p6), [#allocation4], 4294967264 }
 0x73f PF: > { %s9465_s23 = sld [smem:[#allocation6_spill]] }
 0x745   : > { %s29_s27 = sadd.s32 1, %s9465_s23  }
 0x746   : > { %p26_p5 = scmp.ge.s32.totalorder %s29_s27, 8  }
 0x748   :  { %28 = sbr.rel (!%p26_p5) target bundleno = 13 (0xd), region = 160 }
 0x74f   :  { %5806 = vsyncpa [#allocation4], 1 }
 0x750   :  { %5808 = vsyncpa [#allocation4 + $0x1], 1 }

</bundles_post_ra>
